<compile_context>
chip_gen: v5e
topology: v5e:2x2
jax: 0.10.0
libtpu: 0.0.40
codegen_flags: <defaults>
</compile_context>

<pallas_src>
import functools
import math

import jax
import jax.numpy as jnp
from jax import lax
from jax.experimental import pallas as pl
from jax.experimental.pallas import tpu as pltpu

EPS = 1e-5     # torch.nn.InstanceNorm2d default eps
LANE = 128


def get_same_padding(size, kernel_size, stride):
    out = math.ceil(size / stride)
    pad = max((out - 1) * stride + kernel_size - size, 0)
    return pad // 2


def _rup(x, m):
    return ((x + m - 1) // m) * m


def _encoder_cell_kernel(x_ref, w_ref, gamma_ref, beta_ref, out_ref, patch_ref,
                         *, K, stride, Hout, Wout, Cin):
    # x_ref     : (Bt, Hs, Ws, s*s*Cin)      bf16  padded NHWC, stride space-to-depth
    # w_ref     : (K*K*Cin, Coutp)           bf16  tap-major conv weights (bias dropped)
    # gamma_ref : (Bt, 1, Coutp)             f32   per-sample style IN scale (pre-gathered)
    # beta_ref  : (Bt, 1, Coutp)             f32   per-sample style IN shift (pre-gathered)
    # out_ref   : (Bt, HW, Coutp)            f32   output block (also used as conv buffer)
    # patch_ref : (Bt, Hout, Wout, K*K*Cin)  bf16  VMEM scratch: im2col patch matrix
    Bt, HW, Coutp = out_ref.shape
    KKCin = K * K * Cin

    # --- Phase 1: in-kernel im2col (built ONCE per block, no HBM blow-up) ---
    for ki in range(K):
        qi, ri = divmod(ki, stride)
        for kj in range(K):
            qj, rj = divmod(kj, stride)
            c0 = (ri * stride + rj) * Cin
            tap = ki * K + kj
            patch_ref[:, :, :, tap * Cin:(tap + 1) * Cin] = (
                x_ref[:, qi:qi + Hout, qj:qj + Wout, c0:c0 + Cin])

    # --- Phase 2: ONE fused MXU matmul (M=Bt*HW, Kc=K*K*Cin, N=Coutp), f32 ---
    # Written through out_ref (VMEM-resident until block writeback).
    patches = patch_ref[...].reshape(Bt * HW, KKCin)
    out_ref[...] = jnp.dot(patches, w_ref[...],
                           preferred_element_type=jnp.float32
                           ).reshape(Bt, HW, Coutp)

    # --- Phase 3: per-(sample, channel) IN stats, single pass, f32 ---
    # (Single-pass E[x^2]-E[x]^2 is safe here: the conv bias -- the usual
    #  source of a large pre-norm mean -- has been removed entirely.)
    conv = out_ref[...]
    inv_hw = 1.0 / HW
    ssum = jnp.sum(conv, axis=1, keepdims=True)                 # (Bt, 1, Coutp)
    ssq = jnp.sum(conv * conv, axis=1, keepdims=True)
    mean = ssum * inv_hw
    var = jnp.maximum(ssq * inv_hw - mean * mean, 0.0)
    scale = lax.rsqrt(var + EPS) * gamma_ref[...]               # g / sqrt(var+eps)
    shift = beta_ref[...] - mean * scale

    # --- Phase 4: fused normalize + style affine + ReLU, one vectorized pass ---
    out_ref[...] = jnp.maximum(conv * scale + shift, 0.0)


def visual_encoder_cell(x, labels, w, b, gamma, beta, *,
                        kernel_size, stride, size):
    """x: (B, Cin, H, W) NCHW f32.  Returns (B, Cout, Hout, Wout) NCHW f32."""
    B, Cin, H, W = x.shape
    Cout = w.shape[0]
    K, s = kernel_size, stride
    pad = get_same_padding(size, K, s)
    Hout = (H + 2 * pad - K) // s + 1
    Wout = (W + 2 * pad - K) // s + 1
    HW = Hout * Wout
    Coutp = _rup(Cout, LANE)              # lane-dense output channels
    Cin_r = s * s * Cin
    KKCin = K * K * Cin

    # padded spatial extents: divisible by stride, large enough for every tap
    Hs = max(-(-(H + 2 * pad) // s), Hout + (K - 1) // s)
    Ws = max(-(-(W + 2 * pad) // s), Wout + (K - 1) // s)
    Hp, Wp = Hs * s, Ws * s

    # NCHW -> NHWC, pad, stride space-to-depth (pure layout, same byte count)
    xh = jnp.transpose(x, (0, 2, 3, 1))
    xp = jnp.pad(xh, ((0, 0), (pad, Hp - H - pad), (pad, Wp - W - pad), (0, 0)))
    if s == 1:
        xr = xp
    else:
        xr = xp.reshape(B, Hs, s, Ws, s, Cin)
        xr = xr.transpose(0, 1, 3, 2, 4, 5).reshape(B, Hs, Ws, Cin_r)
    xr = xr.astype(jnp.bfloat16)          # MXU input stream (f32 acc in-kernel)

    # conv weights (Cout, Cin, K, K) OIHW -> (K*K*Cin, Coutp), rows ordered to
    # match the patch-matrix columns (tap-major, then Cin), bf16
    w_t = jnp.transpose(w, (2, 3, 1, 0)).reshape(KKCin, Cout)
    w_t = jnp.pad(w_t, ((0, 0), (0, Coutp - Cout))).astype(jnp.bfloat16)
    # Conv bias `b` is intentionally NOT used: a per-channel bias added before
    # InstanceNorm cancels exactly (mean subtraction), so the kernel skips it.
    _ = b
    # per-sample style affine params, gathered once in the wrapper (tiny HBM)
    gam = jnp.pad(gamma[labels].astype(jnp.float32),
                  ((0, 0), (0, Coutp - Cout))).reshape(B, 1, Coutp)
    bet = jnp.pad(beta[labels].astype(jnp.float32),
                  ((0, 0), (0, Coutp - Cout))).reshape(B, 1, Coutp)

    # --- generation-aware VMEM budgeting ---------------------------------
    try:
        vmem_cap = int(pltpu.get_tpu_info().vmem_capacity_bytes)
    except Exception:  # pragma: no cover - conservative fallback
        vmem_cap = 128 * 2 ** 20
    stream_budget = max(8 * 2 ** 20, int(0.35 * vmem_cap))   # ~45MiB on 128MiB parts, ~22MiB on v7x

    SUB_BF16 = 16   # bf16 sublane tile
    in_blk = Hs * _rup(Ws, SUB_BF16) * _rup(Cin_r, LANE) * 2       # per sample, padded layout
    out_blk = _rup(HW, 8) * Coutp * 4
    gb_blk = 8 * Coutp * 4                                          # one of gamma/beta, per sample
    patch_blk = Hout * _rup(Wout, SUB_BF16) * _rup(KKCin, LANE) * 2
    w_bytes = _rup(KKCin, SUB_BF16) * Coutp * 2

    # Keep >= 2 grid steps when B >= 2 so both v7x TensorCores get work.
    bt_cap = B if B < 2 else max(1, B // 2)
    Bt = 1
    for cand in range(1, bt_cap + 1):
        need = 2 * cand * (in_blk + out_blk + 2 * gb_blk) + cand * patch_blk + 2 * w_bytes
        if need <= stream_budget:
            Bt = cand
    need = (2 * Bt * (in_blk + out_blk + 2 * gb_blk) + Bt * patch_blk
            + 2 * w_bytes + 4 * 2 ** 20)                            # + headroom
    vmem_limit = int(min(max(need, 32 * 2 ** 20), int(0.8 * vmem_cap)))

    kernel = functools.partial(_encoder_cell_kernel, K=K, stride=s,
                               Hout=Hout, Wout=Wout, Cin=Cin)

    out = pl.pallas_call(
        kernel,
        out_shape=jax.ShapeDtypeStruct((B, HW, Coutp), jnp.float32),
        grid_spec=pltpu.PrefetchScalarGridSpec(
            num_scalar_prefetch=0,
            grid=(pl.cdiv(B, Bt),),
            in_specs=[
                pl.BlockSpec((Bt, Hs, Ws, Cin_r), lambda bi: (bi, 0, 0, 0)),
                # constant index_map: fetched once, VMEM-resident across grid
                pl.BlockSpec((KKCin, Coutp), lambda bi: (0, 0)),
                pl.BlockSpec((Bt, 1, Coutp), lambda bi: (bi, 0, 0)),
                pl.BlockSpec((Bt, 1, Coutp), lambda bi: (bi, 0, 0)),
            ],
            out_specs=pl.BlockSpec((Bt, HW, Coutp), lambda bi: (bi, 0, 0)),
            scratch_shapes=[
                pltpu.VMEM((Bt, Hout, Wout, KKCin), jnp.bfloat16),  # im2col patches
            ],
        ),
        compiler_params=pltpu.CompilerParams(
            dimension_semantics=("parallel",),
            vmem_limit_bytes=vmem_limit),
    )(xr, w_t, gam, bet)

    # strip channel padding; NCHW to match the PyTorch module's interface
    out = out[:, :, :Cout].reshape(B, Hout, Wout, Cout)
    return jnp.transpose(out, (0, 3, 1, 2))


def _reference(x, labels, w, b, gamma, beta, *, kernel_size, stride, size):
    # Mirrors the kernel's precision policy (bf16 conv inputs, f32 accumulation
    # and f32 norm/affine math).  Keeps the conv bias so the test verifies that
    # dropping it in the kernel is exactly cancelled by InstanceNorm.
    pad = get_same_padding(size, kernel_size, stride)
    conv = lax.conv_general_dilated(
        x.astype(jnp.bfloat16), w.astype(jnp.bfloat16),
        (stride, stride), [(pad, pad), (pad, pad)],
        dimension_numbers=("NCHW", "OIHW", "NCHW"),
        preferred_element_type=jnp.float32)
    conv = conv + b.reshape(1, -1, 1, 1).astype(jnp.float32)
    mean = conv.mean(axis=(2, 3), keepdims=True)
    var = jnp.mean(jnp.square(conv - mean), axis=(2, 3), keepdims=True)
    xn = (conv - mean) / jnp.sqrt(var + EPS)
    g = gamma[labels].reshape(conv.shape[0], -1, 1, 1)
    bb = beta[labels].reshape(conv.shape[0], -1, 1, 1)
    return jnp.maximum(xn * g + bb, 0.0)


if __name__ == "__main__":
    B, Cin, size = 2, 4, 16
    Cout, K, stride = 32, 3, 1
    n_styles = 62

    key = jax.random.PRNGKey(0)
    kx, kw, kb, kg, kbeta = jax.random.split(key, 5)

    x = jax.random.normal(kx, (B, Cin, size, size), dtype=jnp.float32)
    w = jax.random.normal(kw, (Cout, Cin, K, K), dtype=jnp.float32) * 0.1
    b = jax.random.normal(kb, (Cout,), dtype=jnp.float32) * 0.1
    # per-style affine params (torch default is weight=1, bias=0 -- randomized
    # here so style conditioning is observable)
    gamma = 1.0 + 0.1 * jax.random.normal(kg, (n_styles, Cout), dtype=jnp.float32)
    beta = 0.1 * jax.random.normal(kbeta, (n_styles, Cout), dtype=jnp.float32)
    labels = jnp.array([3, 17], dtype=jnp.int32)

    out = visual_encoder_cell(x, labels, w, b, gamma, beta,
                              kernel_size=K, stride=stride, size=size)
    out = jax.block_until_ready(out)

    ref = _reference(x, labels, w, b, gamma, beta,
                     kernel_size=K, stride=stride, size=size)
    assert out.shape == (B, Cout, size, size)
    err = float(jnp.max(jnp.abs(out - ref)))
    assert err < 2e-3, f"mismatch vs reference: {err}"
    print("KERNEL_OK")
</pallas_src>

<mosaic_0001>
module attributes {stable_mosaic.version = 11 : i64} {
  func.func @_encoder_cell_kernel(%arg0: i32, %arg1: memref<1x18x18x4xbf16, #tpu.memory_space<vmem>>, %arg2: memref<36x128xbf16, #tpu.memory_space<vmem>>, %arg3: memref<1x1x128xf32, #tpu.memory_space<vmem>>, %arg4: memref<1x1x128xf32, #tpu.memory_space<vmem>>, %arg5: memref<1x256x128xf32, #tpu.memory_space<vmem>>, %arg6: memref<1x16x16x36xbf16, #tpu.memory_space<vmem>>) attributes {dimension_semantics = [#tpu.dimension_semantics<parallel>], iteration_bounds = array<i64: 2>, scalar_prefetch = 0 : i64, scratch_operands = 1 : i64, tpu.core_type = #tpu.core_type<tc>, window_params = [{transform_indices = @transform_0, window_bounds = array<i64: 1, 18, 18, 4>}, {pipeline_mode = #tpu.pipeline_mode<synchronous>, transform_indices = @transform_1, window_bounds = array<i64: 36, 128>}, {transform_indices = @transform_2, window_bounds = array<i64: 1, 1, 128>}, {transform_indices = @transform_3, window_bounds = array<i64: 1, 1, 128>}, {transform_indices = @transform_4, window_bounds = array<i64: 1, 256, 128>}]} {
    %c0 = arith.constant 0 : index
    %c0_0 = arith.constant 0 : index
    %c0_1 = arith.constant 0 : index
    %c0_2 = arith.constant 0 : index
    %0 = vector.load %arg1[%c0, %c0_0, %c0_1, %c0_2] : memref<1x18x18x4xbf16, #tpu.memory_space<vmem>>, vector<1x16x16x4xbf16>
    %c0_3 = arith.constant 0 : index
    %c0_4 = arith.constant 0 : index
    %c0_5 = arith.constant 0 : index
    %c0_6 = arith.constant 0 : index
    %1 = vector.load %arg6[%c0_3, %c0_4, %c0_5, %c0_6] : memref<1x16x16x36xbf16, #tpu.memory_space<vmem>>, vector<1x16x16x4xbf16>
    tpu.vector_store %arg6[%c0_3, %c0_4, %c0_5, %c0_6], %0 {strides = array<i32>} : memref<1x16x16x36xbf16, #tpu.memory_space<vmem>>, vector<1x16x16x4xbf16>,
    %c0_7 = arith.constant 0 : index
    %c0_8 = arith.constant 0 : index
    %c1 = arith.constant 1 : index
    %c0_9 = arith.constant 0 : index
    %2 = vector.load %arg1[%c0_7, %c0_8, %c1, %c0_9] : memref<1x18x18x4xbf16, #tpu.memory_space<vmem>>, vector<1x16x16x4xbf16>
    %c0_10 = arith.constant 0 : index
    %c0_11 = arith.constant 0 : index
    %c0_12 = arith.constant 0 : index
    %c4 = arith.constant 4 : index
    %3 = vector.load %arg6[%c0_10, %c0_11, %c0_12, %c4] : memref<1x16x16x36xbf16, #tpu.memory_space<vmem>>, vector<1x16x16x4xbf16>
    tpu.vector_store %arg6[%c0_10, %c0_11, %c0_12, %c4], %2 {strides = array<i32>} : memref<1x16x16x36xbf16, #tpu.memory_space<vmem>>, vector<1x16x16x4xbf16>,
    %c0_13 = arith.constant 0 : index
    %c0_14 = arith.constant 0 : index
    %c2 = arith.constant 2 : index
    %c0_15 = arith.constant 0 : index
    %4 = vector.load %arg1[%c0_13, %c0_14, %c2, %c0_15] : memref<1x18x18x4xbf16, #tpu.memory_space<vmem>>, vector<1x16x16x4xbf16>
    %c0_16 = arith.constant 0 : index
    %c0_17 = arith.constant 0 : index
    %c0_18 = arith.constant 0 : index
    %c8 = arith.constant 8 : index
    %5 = vector.load %arg6[%c0_16, %c0_17, %c0_18, %c8] : memref<1x16x16x36xbf16, #tpu.memory_space<vmem>>, vector<1x16x16x4xbf16>
    tpu.vector_store %arg6[%c0_16, %c0_17, %c0_18, %c8], %4 {strides = array<i32>} : memref<1x16x16x36xbf16, #tpu.memory_space<vmem>>, vector<1x16x16x4xbf16>,
    %c0_19 = arith.constant 0 : index
    %c1_20 = arith.constant 1 : index
    %c0_21 = arith.constant 0 : index
    %c0_22 = arith.constant 0 : index
    %6 = vector.load %arg1[%c0_19, %c1_20, %c0_21, %c0_22] : memref<1x18x18x4xbf16, #tpu.memory_space<vmem>>, vector<1x16x16x4xbf16>
    %c0_23 = arith.constant 0 : index
    %c0_24 = arith.constant 0 : index
    %c0_25 = arith.constant 0 : index
    %c12 = arith.constant 12 : index
    %7 = vector.load %arg6[%c0_23, %c0_24, %c0_25, %c12] : memref<1x16x16x36xbf16, #tpu.memory_space<vmem>>, vector<1x16x16x4xbf16>
    tpu.vector_store %arg6[%c0_23, %c0_24, %c0_25, %c12], %6 {strides = array<i32>} : memref<1x16x16x36xbf16, #tpu.memory_space<vmem>>, vector<1x16x16x4xbf16>,
    %c0_26 = arith.constant 0 : index
    %c1_27 = arith.constant 1 : index
    %c1_28 = arith.constant 1 : index
    %c0_29 = arith.constant 0 : index
    %8 = vector.load %arg1[%c0_26, %c1_27, %c1_28, %c0_29] : memref<1x18x18x4xbf16, #tpu.memory_space<vmem>>, vector<1x16x16x4xbf16>
    %c0_30 = arith.constant 0 : index
    %c0_31 = arith.constant 0 : index
    %c0_32 = arith.constant 0 : index
    %c16 = arith.constant 16 : index
    %9 = vector.load %arg6[%c0_30, %c0_31, %c0_32, %c16] : memref<1x16x16x36xbf16, #tpu.memory_space<vmem>>, vector<1x16x16x4xbf16>
    tpu.vector_store %arg6[%c0_30, %c0_31, %c0_32, %c16], %8 {strides = array<i32>} : memref<1x16x16x36xbf16, #tpu.memory_space<vmem>>, vector<1x16x16x4xbf16>,
    %c0_33 = arith.constant 0 : index
    %c1_34 = arith.constant 1 : index
    %c2_35 = arith.constant 2 : index
    %c0_36 = arith.constant 0 : index
    %10 = vector.load %arg1[%c0_33, %c1_34, %c2_35, %c0_36] : memref<1x18x18x4xbf16, #tpu.memory_space<vmem>>, vector<1x16x16x4xbf16>
    %c0_37 = arith.constant 0 : index
    %c0_38 = arith.constant 0 : index
    %c0_39 = arith.constant 0 : index
    %c20 = arith.constant 20 : index
    %11 = vector.load %arg6[%c0_37, %c0_38, %c0_39, %c20] : memref<1x16x16x36xbf16, #tpu.memory_space<vmem>>, vector<1x16x16x4xbf16>
    tpu.vector_store %arg6[%c0_37, %c0_38, %c0_39, %c20], %10 {strides = array<i32>} : memref<1x16x16x36xbf16, #tpu.memory_space<vmem>>, vector<1x16x16x4xbf16>,
    %c0_40 = arith.constant 0 : index
    %c2_41 = arith.constant 2 : index
    %c0_42 = arith.constant 0 : index
    %c0_43 = arith.constant 0 : index
    %12 = vector.load %arg1[%c0_40, %c2_41, %c0_42, %c0_43] : memref<1x18x18x4xbf16, #tpu.memory_space<vmem>>, vector<1x16x16x4xbf16>
    %c0_44 = arith.constant 0 : index
    %c0_45 = arith.constant 0 : index
    %c0_46 = arith.constant 0 : index
    %c24 = arith.constant 24 : index
    %13 = vector.load %arg6[%c0_44, %c0_45, %c0_46, %c24] : memref<1x16x16x36xbf16, #tpu.memory_space<vmem>>, vector<1x16x16x4xbf16>
    tpu.vector_store %arg6[%c0_44, %c0_45, %c0_46, %c24], %12 {strides = array<i32>} : memref<1x16x16x36xbf16, #tpu.memory_space<vmem>>, vector<1x16x16x4xbf16>,
    %c0_47 = arith.constant 0 : index
    %c2_48 = arith.constant 2 : index
    %c1_49 = arith.constant 1 : index
    %c0_50 = arith.constant 0 : index
    %14 = vector.load %arg1[%c0_47, %c2_48, %c1_49, %c0_50] : memref<1x18x18x4xbf16, #tpu.memory_space<vmem>>, vector<1x16x16x4xbf16>
    %c0_51 = arith.constant 0 : index
    %c0_52 = arith.constant 0 : index
    %c0_53 = arith.constant 0 : index
    %c28 = arith.constant 28 : index
    %15 = vector.load %arg6[%c0_51, %c0_52, %c0_53, %c28] : memref<1x16x16x36xbf16, #tpu.memory_space<vmem>>, vector<1x16x16x4xbf16>
    tpu.vector_store %arg6[%c0_51, %c0_52, %c0_53, %c28], %14 {strides = array<i32>} : memref<1x16x16x36xbf16, #tpu.memory_space<vmem>>, vector<1x16x16x4xbf16>,
    %c0_54 = arith.constant 0 : index
    %c2_55 = arith.constant 2 : index
    %c2_56 = arith.constant 2 : index
    %c0_57 = arith.constant 0 : index
    %16 = vector.load %arg1[%c0_54, %c2_55, %c2_56, %c0_57] : memref<1x18x18x4xbf16, #tpu.memory_space<vmem>>, vector<1x16x16x4xbf16>
    %c0_58 = arith.constant 0 : index
    %c0_59 = arith.constant 0 : index
    %c0_60 = arith.constant 0 : index
    %c32 = arith.constant 32 : index
    %17 = vector.load %arg6[%c0_58, %c0_59, %c0_60, %c32] : memref<1x16x16x36xbf16, #tpu.memory_space<vmem>>, vector<1x16x16x4xbf16>
    tpu.vector_store %arg6[%c0_58, %c0_59, %c0_60, %c32], %16 {strides = array<i32>} : memref<1x16x16x36xbf16, #tpu.memory_space<vmem>>, vector<1x16x16x4xbf16>,
    %c0_61 = arith.constant 0 : index
    %c0_62 = arith.constant 0 : index
    %c0_63 = arith.constant 0 : index
    %c0_64 = arith.constant 0 : index
    %18 = vector.load %arg6[%c0_61, %c0_62, %c0_63, %c0_64] : memref<1x16x16x36xbf16, #tpu.memory_space<vmem>>, vector<1x16x16x36xbf16>
    %19 = vector.shape_cast %18 : vector<1x16x16x36xbf16> to vector<256x36xbf16>
    %c0_65 = arith.constant 0 : index
    %c0_66 = arith.constant 0 : index
    %20 = vector.load %arg2[%c0_65, %c0_66] : memref<36x128xbf16, #tpu.memory_space<vmem>>, vector<36x128xbf16>
    %cst = arith.constant dense<0.000000e+00> : vector<256x128xf32>
    %21 = tpu.matmul %19, %20, %cst {dimension_numbers = #tpu.dot_dimension_numbers<[1], [0], [0], [1], [0, 0, 1, 1], [], []>} : vector<256x36xbf16>, vector<36x128xbf16>, vector<256x128xf32> -> vector<256x128xf32>
    %22 = vector.shape_cast %21 : vector<256x128xf32> to vector<1x256x128xf32>
    %c0_67 = arith.constant 0 : index
    %c0_68 = arith.constant 0 : index
    %c0_69 = arith.constant 0 : index
    %23 = vector.load %arg5[%c0_67, %c0_68, %c0_69] : memref<1x256x128xf32, #tpu.memory_space<vmem>>, vector<1x256x128xf32>
    tpu.vector_store %arg5[%c0_67, %c0_68, %c0_69], %22 {strides = array<i32>} : memref<1x256x128xf32, #tpu.memory_space<vmem>>, vector<1x256x128xf32>,
    %c0_70 = arith.constant 0 : index
    %c0_71 = arith.constant 0 : index
    %c0_72 = arith.constant 0 : index
    %24 = vector.load %arg5[%c0_70, %c0_71, %c0_72] : memref<1x256x128xf32, #tpu.memory_space<vmem>>, vector<1x256x128xf32>
    %cst_73 = arith.constant dense<0.000000e+00> : vector<1x128xf32>
    %25 = vector.multi_reduction <add>, %24, %cst_73 [1] : vector<1x256x128xf32> to vector<1x128xf32>
    %26 = vector.shape_cast %25 : vector<1x128xf32> to vector<1x1x128xf32>
    %27 = arith.mulf %24, %24 : vector<1x256x128xf32>
    %cst_74 = arith.constant dense<0.000000e+00> : vector<1x128xf32>
    %28 = vector.multi_reduction <add>, %27, %cst_74 [1] : vector<1x256x128xf32> to vector<1x128xf32>
    %29 = vector.shape_cast %28 : vector<1x128xf32> to vector<1x1x128xf32>
    %cst_75 = arith.constant 3.906250e-03 : f32
    %30 = vector.broadcast %cst_75 : f32 to vector<1x1x128xf32>
    %31 = arith.mulf %26, %30 : vector<1x1x128xf32>
    %cst_76 = arith.constant 3.906250e-03 : f32
    %32 = vector.broadcast %cst_76 : f32 to vector<1x1x128xf32>
    %33 = arith.mulf %29, %32 : vector<1x1x128xf32>
    %34 = arith.mulf %31, %31 : vector<1x1x128xf32>
    %35 = arith.subf %33, %34 : vector<1x1x128xf32>
    %cst_77 = arith.constant 0.000000e+00 : f32
    %36 = vector.broadcast %cst_77 : f32 to vector<1x1x128xf32>
    %37 = arith.maximumf %35, %36 : vector<1x1x128xf32>
    %cst_78 = arith.constant 9.99999974E-6 : f32
    %38 = vector.broadcast %cst_78 : f32 to vector<1x1x128xf32>
    %39 = arith.addf %37, %38 : vector<1x1x128xf32>
    %40 = math.rsqrt %39 : vector<1x1x128xf32>
    %c0_79 = arith.constant 0 : index
    %c0_80 = arith.constant 0 : index
    %c0_81 = arith.constant 0 : index
    %41 = vector.load %arg3[%c0_79, %c0_80, %c0_81] : memref<1x1x128xf32, #tpu.memory_space<vmem>>, vector<1x1x128xf32>
    %42 = arith.mulf %40, %41 : vector<1x1x128xf32>
    %c0_82 = arith.constant 0 : index
    %c0_83 = arith.constant 0 : index
    %c0_84 = arith.constant 0 : index
    %43 = vector.load %arg4[%c0_82, %c0_83, %c0_84] : memref<1x1x128xf32, #tpu.memory_space<vmem>>, vector<1x1x128xf32>
    %44 = arith.mulf %31, %42 : vector<1x1x128xf32>
    %45 = arith.subf %43, %44 : vector<1x1x128xf32>
    %46 = vector.broadcast %42 : vector<1x1x128xf32> to vector<1x256x128xf32>
    %47 = arith.mulf %24, %46 : vector<1x256x128xf32>
    %48 = vector.broadcast %45 : vector<1x1x128xf32> to vector<1x256x128xf32>
    %49 = arith.addf %47, %48 : vector<1x256x128xf32>
    %cst_85 = arith.constant 0.000000e+00 : f32
    %50 = vector.broadcast %cst_85 : f32 to vector<1x256x128xf32>
    %51 = arith.maximumf %49, %50 : vector<1x256x128xf32>
    %c0_86 = arith.constant 0 : index
    %c0_87 = arith.constant 0 : index
    %c0_88 = arith.constant 0 : index
    %52 = vector.load %arg5[%c0_86, %c0_87, %c0_88] : memref<1x256x128xf32, #tpu.memory_space<vmem>>, vector<1x256x128xf32>
    tpu.vector_store %arg5[%c0_86, %c0_87, %c0_88], %51 {strides = array<i32>} : memref<1x256x128xf32, #tpu.memory_space<vmem>>, vector<1x256x128xf32>,
    return
  }
  func.func @transform_0(%arg0: i32) -> (i32, i32, i32, i32) {
    %c0_i32 = arith.constant 0 : i32
    %c0_i32_0 = arith.constant 0 : i32
    %c0_i32_1 = arith.constant 0 : i32
    %c0_i32_2 = arith.constant 0 : i32
    return %arg0, %c0_i32, %c0_i32_0, %c0_i32_1 : i32, i32, i32, i32
  }
  func.func @transform_1(%arg0: i32) -> (i32, i32) {
    %c0_i32 = arith.constant 0 : i32
    %c0_i32_0 = arith.constant 0 : i32
    %c0_i32_1 = arith.constant 0 : i32
    return %c0_i32, %c0_i32_0 : i32, i32
  }
  func.func @transform_2(%arg0: i32) -> (i32, i32, i32) {
    %c0_i32 = arith.constant 0 : i32
    %c0_i32_0 = arith.constant 0 : i32
    %c0_i32_1 = arith.constant 0 : i32
    return %arg0, %c0_i32, %c0_i32_0 : i32, i32, i32
  }
  func.func @transform_3(%arg0: i32) -> (i32, i32, i32) {
    %c0_i32 = arith.constant 0 : i32
    %c0_i32_0 = arith.constant 0 : i32
    %c0_i32_1 = arith.constant 0 : i32
    return %arg0, %c0_i32, %c0_i32_0 : i32, i32, i32
  }
  func.func @transform_4(%arg0: i32) -> (i32, i32, i32) {
    %c0_i32 = arith.constant 0 : i32
    %c0_i32_0 = arith.constant 0 : i32
    %c0_i32_1 = arith.constant 0 : i32
    return %arg0, %c0_i32, %c0_i32_0 : i32, i32, i32
  }
}

</mosaic_0001>

<bundles_post_ra>
// kernel: tpu_custom_call.1
= control target key start
LH: loop header
LB: loop body
LE: loop exit
PB: predicated region body
PF: predicated region fallthrough
CT: control target
= control target key end

     0   :  { %9 = vsyncpa [#allocation4], 0  ;;  %s6454_s0 = inlined_call_operand.vmem [shape: bf16[2,18,18,4], index: 0, kind: input, shape index: {}]   ;;  %s6455_s1 = inlined_call_operand.vmem [shape: bf16[36,128], index: 1, kind: input, shape index: {}]   ;;  %s6456_s2 = inlined_call_operand.vmem [shape: f32[2,1,128], index: 2, kind: input, shape index: {}]   ;;  %s6457_s3 = inlined_call_operand.vmem [shape: f32[2,1,128], index: 3, kind: input, shape index: {}]   ;;  %s6458_s4 = inlined_call_operand.hbm [shape: f32[2,256,128], index: 4, kind: output, shape index: {}]  }
   0x1   :  { %11 = vsyncpa [#allocation4 + $0x1], 0  ;;  %s4651_s15 = smov 0   ;;  %s4653_s16 = smov 0  }
   0x2   :  { %s4655_s17 = smov 0   ;;  %s4657_s18 = smov 0  }
   0x3 LB: > { %s4672_s19 = sadd.s32 4294967295, %s4615_s18   ;;  %s4071_s20 = sadd.s32 4294967294, %s4615_s18   ;;  %s4615_s18 = sphi %s4657_s18, %s6468_s18   ;;  %s4611_s17 = sphi %s4655_s17, %s6467_s17   ;;  %s4607_s16 = sphi %s4653_s16, %s6466_s16   ;;  %s4603_s15 = sphi %s4651_s15, %s6465_s15  }
   0x4   : > { %s4676_s21 = sadd.s32 1, %s4615_s18   ;;  %s123_s22 = sadd.s32 1, %s4611_s17 }
   0x5   : > { %s120_s23 = ssub.s32 %s4615_s18, %s4676_s21  ;;  %p133_p0 = scmp.ne.s32.totalorder %s4611_s17, %s4607_s16 }
   0x6   : > { %p121_p1 = scmp.eq.s32.totalorder %s120_s23, 0  ;;  %p134_p2 = scmp.eq.s32.totalorder %s4672_s19, 1 }
   0x7   : > { %p139_p3 = scmp.ne.s32.totalorder %s4607_s16, %s4603_s15  ;;  %p140_p4 = scmp.eq.s32.totalorder %s4071_s20, 1 }
   0x8   : > { %s4687_s24 = scalar_select %p121_p1, %s4611_s17, %s123_s22  }
   0x9   : > { %p4689_p5 = por %p134_p2, %p133_p0  ;;  %p4693_p6 = por %p140_p4, %p139_p3 }
   0xa   : > { %p4074_p7 = scmp.ge.s32.totalorder %s4615_s18, 1  ;;  %p181_p8 = scmp.lt.s32.totalorder %s4615_s18, 3 }
   0xc   : > { %p182_p9 = pnand %p4074_p7, %p181_p8 }
   0xd   : > { %p213_p10 = scmp.lt.s32.totalorder (!%p182_p9), %s4672_s19, 1  ;;  %s4617_s6 = smov (!%p182_p9), 4  }
   0xe   : > { %185 = sbr.rel (%p182_p9) target bundleno = 1067 (0x42b), region = 36  ;;  %s4618_s7 = smov (!%p182_p9), 8  }
   0xf   : > { %s4619_s8 = smov (!%p182_p9), 12   ;;  %s4620_s9 = smov (!%p182_p9), 16  }
  0x10   : > { %s4621_s10 = smov (!%p182_p9), 20   ;;  %s4622_s11 = smov (!%p182_p9), 24  }
  0x11   : > { %s4623_s12 = smov (!%p182_p9), 28   ;;  %s4624_s13 = smov (!%p182_p9), 32  }
  0x13   : > { %s4701_s27 = scalar_select %p213_p10, %s4672_s19, 1  ;;  %vm338_vm0 = vsmask.f32 3328  ;;  %vm339_vm1 = vsmask.f32 7440  ;;  %vm950_vm3 = vcmask 1042432  }
  0x14   : > { %vm4718_vm2 = vmor %vm338_vm0, %vm339_vm1  ;;  %vm951_vm4 = vcmask 1046532   ;;  %vm257_vm5 = vcmask 27648   ;;  %vm821_vm7 = vcmask 60448   ;;  %vm1161_vm8 = vcmask 93248  }
  0x15   : > { %s4502_s28 = smul.u32 216, %s4701_s27  ;;  %vm4893_vm6 = vmor %vm950_vm3, %vm951_vm4  ;;  %vm1355_vm9 = vcmask 126048   ;;  %vm1916_vm10 = vcmask 158848   ;;  %vm2253_vm11 = vcmask 191648   ;;  %vm3559_vm12 = vcmask 1041408  }
  0x16   : > { %vm2447_vm13 = vcmask 224448   ;;  %vm3008_vm14 = vcmask 257248   ;;  %vm3345_vm15 = vcmask 290048   ;;  %vm3510_vm0 = vcmask 293888  }
  0x17   : > { %s4707_s5 = scalar_lea.vmem %s6454_s0, %s4502_s28 }
  0x18   : > { %v293_v0 = vld [vmem:[%s4707_s5 + $0xc] sm:$0xf]  ;;  %v294_v1 = vld [vmem:[%s4707_s5 + $0x10] sm:$0xf]  ;;  %v290_v2 = vld [vmem:[%s4707_s5] sm:$0xf] }
  0x19   : > { %v366_v3 = vshrl.u32 %v293_v0, 16  ;;  %v369_v4 = vshll.u32 %v293_v0, 16  ;;  %v375_v5 = vshll.u32 %v294_v1, 16  ;;  %v379_v6 = vshrl.u32 %v294_v1, 16  ;;  %v291_v7 = vld [vmem:[%s4707_s5 + $0x4] sm:$0xf] }
  0x1a   : > { %v342_v8 = vshrl.u32 %v290_v2, 16  ;;  %v345_v9 = vshll.u32 %v290_v2, 16  ;;  %v351_v10 = vshll.u32 %v291_v7, 16  ;;  %v355_v11 = vshrl.u32 %v291_v7, 16  ;;  %v295_v12 = vld [vmem:[%s4707_s5 + $0x14] sm:$0x1] }
  0x1b   : > { %v368_v13 = vrot.slane %v366_v3, 4  ;;  %v371_v14 = vrot.slane %v369_v4, 5  ;;  %v377_v15 = vrot.slane %v375_v5, 5  ;;  %v381_v16 = vrot.slane %v379_v6, 4  ;;  %v292_v17 = vld [vmem:[%s4707_s5 + $0x8] sm:$0x1] }
  0x1c   : > { %v344_v18 = vrot.slane %v342_v8, 4  ;;  %v347_v19 = vrot.slane %v345_v9, 5  ;;  %v357_v20 = vrot.slane %v355_v11, 4  ;;  %v300_v21 = vld [vmem:[%s4707_s5 + $0x28] sm:$0xf]  ;;  %v385_v24 = vshll.u32 %v295_v12, 16 }
  0x1d   : > { %v372_v22 = vor.u32 %v371_v14, %v368_v13  ;;  %v382_v23 = vor.u32 %v381_v16, %v377_v15  ;;  %v353_v27 = vrot.slane %v351_v10, 5  ;;  %v423_v28 = vshll.u32 %v300_v21, 16  ;;  %v299_v30 = vld [vmem:[%s4707_s5 + $0x24] sm:$0xf]  ;;  %v296_v35 = vld [vmem:[%s4707_s5 + $0x18] sm:$0xf] }
  0x1e   : > { %v348_v26 = vor.u32 %v347_v19, %v344_v18  ;;  %v427_v29 = vshrl.u32 %v300_v21, 16  ;;  %v361_v32 = vshll.u32 %v292_v17, 16  ;;  %v387_v38 = vrot.slane %v385_v24, 5  ;;  %v297_v40 = vld [vmem:[%s4707_s5 + $0x1c] sm:$0xf] }
  0x1f   : > { %v373_v31 = vrot.slane %v372_v22, 4  ;;  %v358_v34 = vor.u32 %v357_v20, %v353_v27  ;;  %v383_v37 = vrot.slane %v382_v23, 4  ;;  %v414_v39 = vshrl.u32 %v299_v30, 16  ;;  %v301_v42 = vld [vmem:[%s4707_s5 + $0x2c] sm:$0x1] }
  0x20   : > { %v349_v33 = vrot.slane %v348_v26, 4  ;;  %v4731_v43 = vrot.slane %v423_v28, 5  ;;  %v429_v44 = vrot.slane %v427_v29, 4  ;;  %v417_v45 = vshll.u32 %v299_v30, 16  ;;  %v305_v50 = vld [vmem:[%s4707_s5 + $0x3c] sm:$0xf] }
  0x21   : > { %v378_v36 = vsel %vm4718_vm2, %v373_v31, %v377_v15  ;;  %v363_v46 = vrot.slane %v361_v32, 5  ;;  %v416_v47 = vrot.slane %v414_v39, 4  ;;  %v390_v48 = vshrl.u32 %v296_v35, 16  ;;  %v303_v58 = vld [vmem:[%s4707_s5 + $0x34] sm:$0xf] }
  0x22   : > { %729 = vrot.lane.b32.xlu1 %v378_v36, %s4617_s6  ;;  %v354_v41 = vsel %vm4718_vm2, %v349_v33, %v353_v27  ;;  %v393_v49 = vshll.u32 %v296_v35, 16  ;;  %v359_v51 = vrot.slane %v358_v34, 4  ;;  %v419_v52 = vrot.slane %v417_v45, 5  ;;  %v298_v6 = vld [vmem:[%s4707_s5 + $0x20] sm:$0x1] }
  0x23   : > { %725 = vrot.lane.b32.xlu0 %v354_v41, %s4617_s6  ;;  %v399_v53 = vshll.u32 %v297_v40, 16  ;;  %v403_v54 = vshrl.u32 %v297_v40, 16  ;;  %v433_v55 = vshll.u32 %v301_v42, 16  ;;  %v392_v56 = vrot.slane %v390_v48, 4  ;;  %v306_v15 = vld [vmem:[%s4707_s5 + $0x40] sm:$0xf] }
  0x24   : > { %v395_v57 = vrot.slane %v393_v49, 5  ;;  %v430_v59 = vor.u32 %v429_v44, %v4731_v43  ;;  %v462_v61 = vshrl.u32 %v305_v50, 16  ;;  %v465_v62 = vshll.u32 %v305_v50, 16  ;;  %v304_v16 = vld [vmem:[%s4707_s5 + $0x38] sm:$0x1] }
  0x25   : > { %v405_v60 = vrot.slane %v403_v54, 4  ;;  %v388_v63 = vsel %vm4718_vm2, %v383_v37, %v387_v38  ;;  %v420_v0 = vor.u32 %v419_v52, %v416_v47  ;;  %v401_v2 = vrot.slane %v399_v53, 5  ;;  %v309_v20 = vld [vmem:[%s4707_s5 + $0x4c] sm:$0xf]  ;;  %v302_v21 = vld [vmem:[%s4707_s5 + $0x30] sm:$0xf] }
  0x26   : > { %v396_v1 = vor.u32 %v395_v57, %v392_v56  ;;  %v364_v3 = vsel %vm4718_vm2, %v359_v51, %v363_v46  ;;  %v447_v4 = vshll.u32 %v303_v58, 16  ;;  %v451_v5 = vshrl.u32 %v303_v58, 16  ;;  %v308_v24 = vld [vmem:[%s4707_s5 + $0x48] sm:$0xf]  ;;  %v314_v47 = vld [vmem:[%s4707_s5 + $0x60] sm:$0xf] }
  0x27   : > { %v435_v7 = vrot.slane %v433_v55, 5  ;;  %v431_v9 = vrot.slane %v430_v59, 4  ;;  %v464_v10 = vrot.slane %v462_v61, 4  ;;  %v467_v11 = vrot.slane %v465_v62, 5  ;;  %v310_v49 = vld [vmem:[%s4707_s5 + $0x50] sm:$0x1] }
  0x28   : > { %v397_v8 = vrot.slane %v396_v1, 4  ;;  %v406_v12 = vor.u32 %v405_v60, %v401_v2  ;;  %v421_v13 = vrot.slane %v420_v0, 4  ;;  %v409_v17 = vshll.u32 %v298_v6, 16  ;;  %v312_v53 = vld [vmem:[%s4707_s5 + $0x58] sm:$0xf] }
  0x29   : > { %v4749_v18 = vrot.slane %v447_v4, 5  ;;  %v453_v19 = vrot.slane %v451_v5, 4  ;;  %v436_v26 = vsel %vm4718_vm2, %v431_v9, %v435_v7  ;;  %v468_v27 = vor.u32 %v467_v11, %v464_v10  ;;  %v307_v58 = vld [vmem:[%s4707_s5 + $0x44] sm:$0x1]  ;;  %v318_v11 = vld [vmem:[%s4707_s5 + $0x70] sm:$0xf] }
  0x2a   : > { %731 = vrot.lane.b32.xlu1 %v388_v63, %s4617_s6  ;;  %v402_v14 = vsel %vm4718_vm2, %v397_v8, %v401_v2  ;;  %v407_v22 = vrot.slane %v406_v12, 4  ;;  %v411_v23 = vrot.slane %v409_v17, 5  ;;  %v471_v28 = vshll.u32 %v306_v15, 16  ;;  %v311_v2 = vld [vmem:[%s4707_s5 + $0x54] sm:$0xf] }
  0x2b   : > { %727 = vrot.lane.b32.xlu0 %v364_v3, %s4617_s6  ;;  %733 = vrot.lane.b32.xlu2 %v402_v14, %s4617_s6  ;;  %v457_v29 = vshll.u32 %v304_v16, 16  ;;  %v426_v30 = vsel %vm4718_vm2, %v421_v13, %v4731_v43  ;;  %v495_v31 = vshll.u32 %v309_v20, 16  ;;  %v499_v32 = vshrl.u32 %v309_v20, 16  ;;  %v315_v6 = vld [vmem:[%s4707_s5 + $0x64] sm:$0xf] }
  0x2c   : > { %v438_v33 = vshrl.u32 %v302_v21, 16  ;;  %v454_v34 = vor.u32 %v453_v19, %v4749_v18  ;;  %v486_v35 = vshrl.u32 %v308_v24, 16  ;;  %v489_v36 = vshll.u32 %v308_v24, 16  ;;  %v317_v20 = vld [vmem:[%s4707_s5 + $0x6c] sm:$0xf] }
  0x2d   : > { %v441_v37 = vshll.u32 %v302_v21, 16  ;;  %v475_v38 = vshrl.u32 %v306_v15, 16  ;;  %v412_v39 = vsel %vm4718_vm2, %v407_v22, %v411_v23  ;;  %v473_v41 = vrot.slane %v471_v28, 5  ;;  %v313_v15 = vld [vmem:[%s4707_s5 + $0x5c] sm:$0x1] }
  0x2e   : > { %v440_v40 = vrot.slane %v438_v33, 4  ;;  %v469_v43 = vrot.slane %v468_v27, 4  ;;  %v459_v44 = vrot.slane %v457_v29, 5  ;;  %v4764_v45 = vrot.slane %v495_v31, 5 }
  0x2f   : > { %v443_v42 = vrot.slane %v441_v37, 5  ;;  %v501_v46 = vrot.slane %v499_v32, 4  ;;  %v455_v48 = vrot.slane %v454_v34, 4  ;;  %v488_v50 = vrot.slane %v486_v35, 4 }
  0x30   : > { %v491_v51 = vrot.slane %v489_v36, 5  ;;  %v477_v54 = vrot.slane %v475_v38, 4  ;;  %v534_v56 = vshrl.u32 %v314_v47, 16  ;;  %v537_v57 = vshll.u32 %v314_v47, 16  ;;  %v321_v47 = vld [vmem:[%s4707_s5 + $0x7c] sm:$0xf] }
  0x31   : > { %v444_v52 = vor.u32 %v443_v42, %v440_v40  ;;  %v474_v59 = vsel %vm4718_vm2, %v469_v43, %v473_v41  ;;  %v502_v60 = vor.u32 %v501_v46, %v4764_v45  ;;  %v505_v61 = vshll.u32 %v310_v49, 16  ;;  %v323_v42 = vld [vmem:[%s4707_s5 + $0x84] sm:$0xf]  ;;  %v316_v49 = vld [vmem:[%s4707_s5 + $0x68] sm:$0x1] }
  0x32   : > { %739 = vrot.lane.b32.xlu1 %v436_v26, %s4617_s6  ;;  %v460_v62 = vsel %vm4718_vm2, %v455_v48, %v459_v44  ;;  %v492_v63 = vor.u32 %v491_v51, %v488_v50  ;;  %v519_v0 = vshll.u32 %v312_v53, 16  ;;  %v523_v1 = vshrl.u32 %v312_v53, 16 }
  0x33   : > { %737 = vrot.lane.b32.xlu0 %v426_v30, %s4617_s6  ;;  %735 = vrot.lane.b32.xlu2 %v412_v39, %s4617_s6  ;;  %v445_v55 = vrot.slane %v444_v52, 4  ;;  %v478_v4 = vor.u32 %v477_v54, %v473_v41  ;;  %v481_v5 = vshll.u32 %v307_v58, 16  ;;  %v536_v7 = vrot.slane %v534_v56, 4  ;;  %v319_v41 = vld [vmem:[%s4707_s5 + $0x74] sm:$0x1] }
  0x34   : > { %v539_v8 = vrot.slane %v537_v57, 5  ;;  %v503_v9 = vrot.slane %v502_v60, 4  ;;  %v507_v10 = vrot.slane %v505_v61, 5  ;;  %v510_v12 = vshrl.u32 %v311_v2, 16  ;;  %v320_v54 = vld [vmem:[%s4707_s5 + $0x78] sm:$0xf] }
  0x35   : > { %v450_v3 = vsel %vm4718_vm2, %v445_v55, %v4749_v18  ;;  %v513_v13 = vshll.u32 %v311_v2, 16  ;;  %v493_v14 = vrot.slane %v492_v63, 4  ;;  %v4786_v16 = vrot.slane %v519_v0, 5 }
  0x36   : > { %v525_v17 = vrot.slane %v523_v1, 4  ;;  %v479_v18 = vrot.slane %v478_v4, 4  ;;  %v483_v19 = vrot.slane %v481_v5, 5  ;;  %v512_v21 = vrot.slane %v510_v12, 4  ;;  %v324_v4 = vld [vmem:[%s4707_s5 + $0x88] sm:$0xf] }
  0x37   : > { %v515_v22 = vrot.slane %v513_v13, 5  ;;  %v540_v23 = vor.u32 %v539_v8, %v536_v7  ;;  %v543_v24 = vshll.u32 %v315_v6, 16  ;;  %v567_v26 = vshll.u32 %v318_v11, 16 }
  0x38   : > { %v571_v27 = vshrl.u32 %v318_v11, 16  ;;  %v508_v28 = vsel %vm4718_vm2, %v503_v9, %v507_v10  ;;  %v529_v29 = vshll.u32 %v313_v15, 16  ;;  %v498_v30 = vsel %vm4718_vm2, %v493_v14, %v4764_v45  ;;  %v327_v9 = vld [vmem:[%s4707_s5 + $0x94] sm:$0xf]  ;;  %v322_v11 = vld [vmem:[%s4707_s5 + $0x80] sm:$0x1] }
  0x39   : > { %v526_v31 = vor.u32 %v525_v17, %v4786_v16  ;;  %v558_v32 = vshrl.u32 %v317_v20, 16  ;;  %v561_v33 = vshll.u32 %v317_v20, 16  ;;  %v547_v34 = vshrl.u32 %v315_v6, 16  ;;  %v326_v14 = vld [vmem:[%s4707_s5 + $0x90] sm:$0xf] }
  0x3a   : > { %745 = vrot.lane.b32.xlu1 %v474_v59, %s4617_s6  ;;  %v484_v35 = vsel %vm4718_vm2, %v479_v18, %v483_v19  ;;  %v516_v36 = vor.u32 %v515_v22, %v512_v21  ;;  %v541_v37 = vrot.slane %v540_v23, 4  ;;  %v545_v38 = vrot.slane %v543_v24, 5 }
  0x3b   : > { %743 = vrot.lane.b32.xlu0 %v460_v62, %s4617_s6  ;;  %741 = vrot.lane.b32.xlu2 %v450_v3, %s4617_s6  ;;  %v4798_v39 = vrot.slane %v567_v26, 5  ;;  %v573_v40 = vrot.slane %v571_v27, 4  ;;  %v527_v43 = vrot.slane %v526_v31, 4  ;;  %v531_v44 = vrot.slane %v529_v29, 5 }
  0x3c   : > { %v560_v45 = vrot.slane %v558_v32, 4  ;;  %v563_v46 = vrot.slane %v561_v33, 5  ;;  %v517_v48 = vrot.slane %v516_v36, 4  ;;  %v549_v50 = vrot.slane %v547_v34, 4 }
  0x3d   : > { %v546_v51 = vsel %vm4718_vm2, %v541_v37, %v545_v38  ;;  %v574_v52 = vor.u32 %v573_v40, %v4798_v39  ;;  %v577_v53 = vshll.u32 %v319_v41, 16  ;;  %v606_v55 = vshrl.u32 %v323_v42, 16  ;;  %v328_v37 = vld [vmem:[%s4707_s5 + $0x98] sm:$0x1]  ;;  %v332_v40 = vld [vmem:[%s4707_s5 + $0xa8] sm:$0xf] }
  0x3e   : > { %v609_v56 = vshll.u32 %v323_v42, 16  ;;  %v591_v57 = vshll.u32 %v321_v47, 16  ;;  %v595_v58 = vshrl.u32 %v321_v47, 16  ;;  %v532_v59 = vsel %vm4718_vm2, %v527_v43, %v531_v44  ;;  %v330_v42 = vld [vmem:[%s4707_s5 + $0xa0] sm:$0xf] }
  0x3f   : > { %v564_v60 = vor.u32 %v563_v46, %v560_v45  ;;  %v553_v61 = vshll.u32 %v316_v49, 16  ;;  %v522_v62 = vsel %vm4718_vm2, %v517_v48, %v4786_v16  ;;  %v550_v63 = vor.u32 %v549_v50, %v545_v38  ;;  %v325_v43 = vld [vmem:[%s4707_s5 + $0x8c] sm:$0x1]  ;;  %v329_v47 = vld [vmem:[%s4707_s5 + $0x9c] sm:$0xf] }
  0x40   : > { %v582_v0 = vshrl.u32 %v320_v54, 16  ;;  %v585_v1 = vshll.u32 %v320_v54, 16  ;;  %v575_v2 = vrot.slane %v574_v52, 4  ;;  %v579_v3 = vrot.slane %v577_v53, 5 }
  0x41   : > { %v608_v5 = vrot.slane %v606_v55, 4  ;;  %v611_v6 = vrot.slane %v609_v56, 5  ;;  %v4818_v7 = vrot.slane %v591_v57, 5  ;;  %v597_v8 = vrot.slane %v595_v58, 4 }
  0x42   : > { %751 = vrot.lane.b32.xlu1 %v508_v28, %s4617_s6  ;;  %v565_v10 = vrot.slane %v564_v60, 4  ;;  %v551_v12 = vrot.slane %v550_v63, 4  ;;  %v555_v13 = vrot.slane %v553_v61, 5  ;;  %v584_v15 = vrot.slane %v582_v0, 4 }
  0x43   : > { %749 = vrot.lane.b32.xlu0 %v498_v30, %s4617_s6  ;;  %747 = vrot.lane.b32.xlu2 %v484_v35, %s4617_s6  ;;  %v587_v16 = vrot.slane %v585_v1, 5  ;;  %v615_v17 = vshll.u32 %v324_v4, 16  ;;  %v639_v18 = vshll.u32 %v327_v9, 16  ;;  %v643_v19 = vshrl.u32 %v327_v9, 16  ;;  %v331_v1 = vld [vmem:[%s4707_s5 + $0xa4] sm:$0x1] }
  0x44   : > { %v580_v20 = vsel %vm4718_vm2, %v575_v2, %v579_v3  ;;  %v612_v21 = vor.u32 %v611_v6, %v608_v5  ;;  %v598_v22 = vor.u32 %v597_v8, %v4818_v7  ;;  %v601_v23 = vshll.u32 %v322_v11, 16  ;;  %v336_v5 = vld [vmem:[%s4707_s5 + $0xb8] sm:$0xf]  ;;  %v335_v8 = vld [vmem:[%s4707_s5 + $0xb4] sm:$0xf] }
  0x45   : > { %v570_v24 = vsel %vm4718_vm2, %v565_v10, %v4798_v39  ;;  %v630_v26 = vshrl.u32 %v326_v14, 16  ;;  %v633_v27 = vshll.u32 %v326_v14, 16  ;;  %v619_v28 = vshrl.u32 %v324_v4, 16 }
  0x46   : > { %v556_v29 = vsel %vm4718_vm2, %v551_v12, %v555_v13  ;;  %v588_v30 = vor.u32 %v587_v16, %v584_v15  ;;  %v4833_v31 = vrot.slane %v639_v18, 5  ;;  %v645_v32 = vrot.slane %v643_v19, 4 }
  0x47   : > { %v613_v33 = vrot.slane %v612_v21, 4  ;;  %v617_v34 = vrot.slane %v615_v17, 5  ;;  %v599_v35 = vrot.slane %v598_v22, 4  ;;  %v603_v36 = vrot.slane %v601_v23, 5 }
  0x48   : > { %v632_v38 = vrot.slane %v630_v26, 4  ;;  %v635_v39 = vrot.slane %v633_v27, 5  ;;  %v589_v41 = vrot.slane %v588_v30, 4  ;;  %v621_v44 = vrot.slane %v619_v28, 4 }
  0x49   : > { %v646_v45 = vor.u32 %v645_v32, %v4833_v31  ;;  %v649_v46 = vshll.u32 %v328_v37, 16  ;;  %v618_v48 = vsel %vm4718_vm2, %v613_v33, %v617_v34  ;;  %v604_v49 = vsel %vm4718_vm2, %v599_v35, %v603_v36  ;;  %v334_v36 = vld [vmem:[%s4707_s5 + $0xb0] sm:$0x1] }
  0x4a   : > { %757 = vrot.lane.b32.xlu1 %v546_v51, %s4617_s6  ;;  %v678_v50 = vshrl.u32 %v332_v40, 16  ;;  %v681_v51 = vshll.u32 %v332_v40, 16  ;;  %v636_v52 = vor.u32 %v635_v39, %v632_v38  ;;  %v663_v53 = vshll.u32 %v330_v42, 16 }
  0x4b   : > { %755 = vrot.lane.b32.xlu0 %v532_v59, %s4617_s6  ;;  %753 = vrot.lane.b32.xlu2 %v522_v62, %s4617_s6  ;;  %v667_v54 = vshrl.u32 %v330_v42, 16  ;;  %v625_v55 = vshll.u32 %v325_v43, 16  ;;  %v594_v56 = vsel %vm4718_vm2, %v589_v41, %v4818_v7  ;;  %v622_v57 = vor.u32 %v621_v44, %v617_v34  ;;  %v333_v62 = vld [vmem:[%s4707_s5 + $0xac] sm:$0xf] }
  0x4c   : > { %v654_v58 = vshrl.u32 %v329_v47, 16  ;;  %v657_v59 = vshll.u32 %v329_v47, 16  ;;  %v647_v60 = vrot.slane %v646_v45, 4  ;;  %v651_v61 = vrot.slane %v649_v46, 5 }
  0x4d   : > { %v680_v63 = vrot.slane %v678_v50, 4  ;;  %v683_v0 = vrot.slane %v681_v51, 5  ;;  %v637_v2 = vrot.slane %v636_v52, 4  ;;  %v665_v3 = vrot.slane %v663_v53, 5  ;;  %v857_v51 = vld [vmem:[%s4707_s5 + $0xc] sm:$0xe] }
  0x4e   : > { %v669_v4 = vrot.slane %v667_v54, 4  ;;  %v623_v6 = vrot.slane %v622_v57, 4  ;;  %v627_v7 = vrot.slane %v625_v55, 5  ;;  %v656_v9 = vrot.slane %v654_v58, 4  ;;  %v858_v53 = vld [vmem:[%s4707_s5 + $0x10] sm:$0xf] }
  0x4f   : > { %v659_v10 = vrot.slane %v657_v59, 5  ;;  %v652_v11 = vsel %vm4718_vm2, %v647_v60, %v651_v61  ;;  %v687_v12 = vshll.u32 %v333_v62, 16  ;;  %v684_v13 = vor.u32 %v683_v0, %v680_v63  ;;  %v856_v54 = vld [vmem:[%s4707_s5 + $0x8] sm:$0x1]  ;;  %v854_v61 = vld [vmem:[%s4707_s5] sm:$0xe] }
  0x50   : > { %v673_v14 = vshll.u32 %v331_v1, 16  ;;  %v711_v15 = vshll.u32 %v336_v5, 16  ;;  %v715_v16 = vshrl.u32 %v336_v5, 16  ;;  %v642_v17 = vsel %vm4718_vm2, %v637_v2, %v4833_v31  ;;  %v337_v31 = vld [vmem:[%s4707_s5 + $0xbc] sm:$0x1] }
  0x51   : > { %v670_v18 = vor.u32 %v669_v4, %v665_v3  ;;  %v702_v19 = vshrl.u32 %v335_v8, 16  ;;  %v691_v21 = vshrl.u32 %v333_v62, 16  ;;  %v628_v22 = vsel %vm4718_vm2, %v623_v6, %v627_v7  ;;  %v861_v63 = vld [vmem:[%s4707_s5 + $0x1c] sm:$0xf]  ;;  %v229_v0 = vld [vmem:[%s4707_s5 + $0x18] sm:$0xf] }
  0x52   : > { %763 = vrot.lane.b32.xlu1 %v580_v20, %s4617_s6  ;;  %v705_v20 = vshll.u32 %v335_v8, 16  ;;  %v660_v23 = vor.u32 %v659_v10, %v656_v9  ;;  %v689_v26 = vrot.slane %v687_v12, 5  ;;  %v713_v27 = vrot.slane %v711_v15, 5  ;;  %262 = vst.msk [vmem:[#allocation2 + $0x10] sm:$0xf] %vm257_vm5, %v229_v0 }
  0x53   : > { %761 = vrot.lane.b32.xlu0 %v570_v24, %s4617_s6  ;;  %759 = vrot.lane.b32.xlu2 %v556_v29, %s4617_s6  ;;  %v685_v24 = vrot.slane %v684_v13, 4  ;;  %v717_v28 = vrot.slane %v715_v16, 4  ;;  %v671_v29 = vrot.slane %v670_v18, 4  ;;  %v675_v30 = vrot.slane %v673_v14, 5  ;;  %v227_v2 = vld [vmem:[%s4707_s5 + $0xc] sm:$0xf] }
  0x54   : > { %v704_v32 = vrot.slane %v702_v19, 4  ;;  %v707_v33 = vrot.slane %v705_v20, 5  ;;  %v661_v34 = vrot.slane %v660_v23, 4  ;;  %v693_v35 = vrot.slane %v691_v21, 4  ;;  %260 = vst.msk [vmem:[#allocation2 + $0x8] sm:$0xf] %vm257_vm5, %v227_v2 }
  0x55   : > { %v690_v37 = vsel %vm4718_vm2, %v685_v24, %v689_v26  ;;  %v718_v38 = vor.u32 %v717_v28, %v713_v27  ;;  %v721_v39 = vshll.u32 %v337_v31, 16  ;;  %v676_v40 = vsel %vm4718_vm2, %v671_v29, %v675_v30  ;;  %v862_v6 = vld [vmem:[%s4707_s5 + $0x20] sm:$0x1]  ;;  %v860_v9 = vld [vmem:[%s4707_s5 + $0x18] sm:$0xe] }
  0x56   : > { %v708_v41 = vor.u32 %v707_v33, %v704_v32  ;;  %v666_v42 = vsel %vm4718_vm2, %v661_v34, %v665_v3  ;;  %v694_v43 = vor.u32 %v693_v35, %v689_v26  ;;  %v697_v44 = vshll.u32 %v334_v36, 16  ;;  %v225_v3 = vld [vmem:[%s4707_s5] sm:$0xf]  ;;  %v859_v12 = vld [vmem:[%s4707_s5 + $0x14] sm:$0x1] }
  0x57   : > { %v719_v45 = vrot.slane %v718_v38, 4  ;;  %v723_v46 = vrot.slane %v721_v39, 5  ;;  %v4078_v58 = vrot.slane %v857_v51, 9  ;;  %v962_v59 = vrot.slane %v858_v53, 5  ;;  %258 = vst.msk [vmem:[#allocation2] sm:$0xf] %vm257_vm5, %v225_v3 }
  0x58   : > { %v709_v47 = vrot.slane %v708_v41, 4  ;;  %v699_v50 = vrot.slane %v697_v44, 5  ;;  %v958_v60 = vrot.slane %v856_v54, 5  ;;  %v4077_v4 = vrot.slane %v854_v61, 9  ;;  %v864_v15 = vld [vmem:[%s4707_s5 + $0x28] sm:$0xf] }
  0x59   : > { %v724_v52 = vsel %vm4718_vm2, %v719_v45, %v723_v46  ;;  %v963_v5 = vsel %vm4893_vm6, %v4078_v58, %v962_v59  ;;  %v969_v7 = vrot.slane %v861_v63, 5  ;;  %v4079_v14 = vrot.slane %v860_v9, 9  ;;  %v230_v16 = vld [vmem:[%s4707_s5 + $0x1c] sm:$0xf]  ;;  %v226_v18 = vld [vmem:[%s4707_s5 + $0x4] sm:$0xf] }
  0x5a   : > { %769 = vrot.lane.b32.xlu1 %v618_v48, %s4617_s6  ;;  %v855_v48 = vld [vmem:[%s4707_s5 + $0x4] sm:$0xf]  ;;  %263 = vst.msk [vmem:[#allocation2 + $0x14] sm:$0xf] %vm257_vm5, %v230_v16  ;;  %v964_v19 = vrot.slane %v962_v59, 4  ;;  %v965_v20 = vrot.slane %v859_v12, 5 }
  0x5b   : > { %767 = vrot.lane.b32.xlu0 %v604_v49, %s4617_s6  ;;  %765 = vrot.lane.b32.xlu2 %v594_v56, %s4617_s6  ;;  %v695_v49 = vrot.slane %v694_v43, 4  ;;  %v955_v55 = vrot.slane %v855_v48, 5  ;;  %v714_v56 = vsel %vm4718_vm2, %v709_v47, %v713_v27  ;;  %v971_v13 = vrot.slane %v969_v7, 4  ;;  %259 = vst.msk [vmem:[#allocation2 + $0x4] sm:$0xf] %vm257_vm5, %v226_v18 }
  0x5c   : > { %v867_v23 = vld [vmem:[%s4707_s5 + $0x34] sm:$0xf]  ;;  %v976_v24 = vrot.slane %v864_v15, 5  ;;  %v970_v26 = vsel %vm4893_vm6, %v4079_v14, %v969_v7  ;;  %v865_v27 = vld [vmem:[%s4707_s5 + $0x2c] sm:$0x1]  ;;  %v966_v28 = vsel %vm4893_vm6, %v964_v19, %v965_v20 }
  0x5d   : > { %v700_v57 = vsel %vm4718_vm2, %v695_v49, %v699_v50  ;;  %v957_v62 = vrot.slane %v955_v55, 4  ;;  %v956_v10 = vsel %vm4893_vm6, %v4077_v4, %v955_v55  ;;  %v983_v30 = vrot.slane %v867_v23, 5  ;;  %v863_v31 = vld [vmem:[%s4707_s5 + $0x24] sm:$0xe]  ;;  %v870_v34 = vld [vmem:[%s4707_s5 + $0x40] sm:$0xf] }
  0x5e   : > { %v978_v32 = vrot.slane %v976_v24, 4  ;;  %v979_v33 = vrot.slane %v865_v27, 5  ;;  %v233_v35 = vld [vmem:[%s4707_s5 + $0x30] sm:$0xf]  ;;  %v232_v36 = vld [vmem:[%s4707_s5 + $0x28] sm:$0xf] }
  0x5f   : > { %v959_v8 = vsel %vm4893_vm6, %v957_v62, %v958_v60  ;;  %266 = vst.msk [vmem:[#allocation2 + $0x20] sm:$0xf] %vm257_vm5, %v233_v35  ;;  %v4080_v38 = vrot.slane %v863_v31, 9  ;;  %v990_v41 = vrot.slane %v870_v34, 5  ;;  %v871_v43 = vld [vmem:[%s4707_s5 + $0x44] sm:$0x1] }
  0x60   : > { %265 = vst.msk [vmem:[#allocation2 + $0x1c] sm:$0xf] %vm257_vm5, %v232_v36  ;;  %v869_v44 = vld [vmem:[%s4707_s5 + $0x3c] sm:$0xe]  ;;  %v868_v46 = vld [vmem:[%s4707_s5 + $0x38] sm:$0x1] }
  0x61   : > { %v977_v45 = vsel %vm4893_vm6, %v4080_v38, %v976_v24  ;;  %v992_v47 = vrot.slane %v990_v41, 4  ;;  %v993_v48 = vrot.slane %v871_v43, 5  ;;  %v4082_v49 = vrot.slane %v869_v44, 9  ;;  %v236_v50 = vld [vmem:[%s4707_s5 + $0x40] sm:$0xf] }
  0x62   : > { %775 = vrot.lane.b32.xlu1 %v652_v11, %s4617_s6  ;;  %v972_v11 = vrot.slane %v862_v6, 5  ;;  %269 = vst.msk [vmem:[#allocation2 + $0x2c] sm:$0xf] %vm257_vm5, %v236_v50  ;;  %v235_v51 = vld [vmem:[%s4707_s5 + $0x3c] sm:$0xf]  ;;  %v985_v54 = vrot.slane %v983_v30, 4 }
  0x63   : > { %773 = vrot.lane.b32.xlu0 %v642_v17, %s4617_s6  ;;  %771 = vrot.lane.b32.xlu2 %v628_v22, %s4617_s6  ;;  %v228_v17 = vld [vmem:[%s4707_s5 + $0x10] sm:$0xf]  ;;  %v873_v53 = vld [vmem:[%s4707_s5 + $0x4c] sm:$0xf]  ;;  %v986_v55 = vrot.slane %v868_v46, 5  ;;  %v991_v58 = vsel %vm4893_vm6, %v4082_v49, %v990_v41 }
  0x64   : > { %261 = vst.msk [vmem:[#allocation2 + $0xc] sm:$0xf] %vm257_vm5, %v228_v17  ;;  %v973_v21 = vsel %vm4893_vm6, %v971_v13, %v972_v11  ;;  %v866_v22 = vld [vmem:[%s4707_s5 + $0x30] sm:$0xe]  ;;  %v875_v59 = vld [vmem:[%s4707_s5 + $0x54] sm:$0xe] }
  0x65   : > { %v4081_v29 = vrot.slane %v866_v22, 9  ;;  %268 = vst.msk [vmem:[#allocation2 + $0x28] sm:$0xf] %vm257_vm5, %v235_v51  ;;  %v876_v60 = vld [vmem:[%s4707_s5 + $0x58] sm:$0xf]  ;;  %v997_v61 = vrot.slane %v873_v53, 5  ;;  %v987_v63 = vsel %vm4893_vm6, %v985_v54, %v986_v55 }
  0x66   : > { %v874_v62 = vld [vmem:[%s4707_s5 + $0x50] sm:$0x1]  ;;  %v872_v0 = vld [vmem:[%s4707_s5 + $0x48] sm:$0xe]  ;;  %v4084_v2 = vrot.slane %v875_v59, 9  ;;  %v1004_v3 = vrot.slane %v876_v60, 5 }
  0x67   : > { %v239_v4 = vld [vmem:[%s4707_s5 + $0x54] sm:$0xf]  ;;  %v999_v6 = vrot.slane %v997_v61, 4  ;;  %v1000_v7 = vrot.slane %v874_v62, 5  ;;  %v238_v11 = vld [vmem:[%s4707_s5 + $0x4c] sm:$0xf] }
  0x68   : > { %272 = vst.msk [vmem:[#allocation2 + $0x38] sm:$0xf] %vm257_vm5, %v239_v4  ;;  %v237_v13 = vld [vmem:[%s4707_s5 + $0x48] sm:$0xf]  ;;  %v1005_v14 = vsel %vm4893_vm6, %v4084_v2, %v1004_v3  ;;  %v878_v18 = vld [vmem:[%s4707_s5 + $0x60] sm:$0xe] }
  0x69   : > { %v1001_v16 = vsel %vm4893_vm6, %v999_v6, %v1000_v7  ;;  %v880_v17 = vld [vmem:[%s4707_s5 + $0x68] sm:$0x1]  ;;  %271 = vst.msk [vmem:[#allocation2 + $0x34] sm:$0xf] %vm257_vm5, %v238_v11  ;;  %v877_v20 = vld [vmem:[%s4707_s5 + $0x5c] sm:$0x1] }
  0x6a   : > { %781 = vrot.lane.b32.xlu1 %v690_v37, %s4617_s6  ;;  %v231_v37 = vld [vmem:[%s4707_s5 + $0x24] sm:$0xf]  ;;  %270 = vst.msk [vmem:[#allocation2 + $0x30] sm:$0xf] %vm257_vm5, %v237_v13  ;;  %v1014_v22 = vrot.slane %v880_v17, 5 }
  0x6b   : > { %779 = vrot.lane.b32.xlu0 %v676_v40, %s4617_s6  ;;  %777 = vrot.lane.b32.xlu2 %v666_v42, %s4617_s6  ;;  %264 = vst.msk [vmem:[#allocation2 + $0x18] sm:$0xf] %vm257_vm5, %v231_v37  ;;  %v984_v40 = vsel %vm4893_vm6, %v4081_v29, %v983_v30  ;;  %v980_v42 = vsel %vm4893_vm6, %v978_v32, %v979_v33  ;;  %v242_v23 = vld [vmem:[%s4707_s5 + $0x64] sm:$0xf]  ;;  %v882_v27 = vld [vmem:[%s4707_s5 + $0x70] sm:$0xf] }
  0x6c   : > { %275 = vst.msk [vmem:[#allocation2 + $0x44] sm:$0xf] %vm257_vm5, %v242_v23  ;;  %v1006_v29 = vrot.slane %v1004_v3, 4  ;;  %v1007_v30 = vrot.slane %v877_v20, 5  ;;  %v241_v31 = vld [vmem:[%s4707_s5 + $0x60] sm:$0xf] }
  0x6d   : > { %v240_v33 = vld [vmem:[%s4707_s5 + $0x58] sm:$0xf]  ;;  %v885_v37 = vld [vmem:[%s4707_s5 + $0x7c] sm:$0xf]  ;;  %v1018_v38 = vrot.slane %v882_v27, 5 }
  0x6e   : > { %v884_v35 = vld [vmem:[%s4707_s5 + $0x78] sm:$0xe]  ;;  %274 = vst.msk [vmem:[#allocation2 + $0x40] sm:$0xf] %vm257_vm5, %v241_v31  ;;  %v881_v41 = vld [vmem:[%s4707_s5 + $0x6c] sm:$0xe] }
  0x6f   : > { %273 = vst.msk [vmem:[#allocation2 + $0x3c] sm:$0xf] %vm257_vm5, %v240_v33  ;;  %v1025_v43 = vrot.slane %v885_v37, 5  ;;  %v245_v44 = vld [vmem:[%s4707_s5 + $0x78] sm:$0xf]  ;;  %v1020_v46 = vrot.slane %v1018_v38, 4 }
  0x70   : > { %278 = vst.msk [vmem:[#allocation2 + $0x50] sm:$0xf] %vm257_vm5, %v245_v44  ;;  %v4086_v50 = vrot.slane %v881_v41, 9  ;;  %v244_v51 = vld [vmem:[%s4707_s5 + $0x70] sm:$0xf] }
  0x71   : > { %v243_v53 = vld [vmem:[%s4707_s5 + $0x6c] sm:$0xf]  ;;  %277 = vst.msk [vmem:[#allocation2 + $0x4c] sm:$0xf] %vm257_vm5, %v244_v51  ;;  %v886_v60 = vld [vmem:[%s4707_s5 + $0x80] sm:$0x1] }
  0x72   : > { %787 = vrot.lane.b32.xlu1 %v724_v52, %s4617_s6  ;;  %v234_v52 = vld [vmem:[%s4707_s5 + $0x34] sm:$0xf]  ;;  %v1019_v59 = vsel %vm4893_vm6, %v4086_v50, %v1018_v38  ;;  %276 = vst.msk [vmem:[#allocation2 + $0x48] sm:$0xf] %vm257_vm5, %v243_v53  ;;  %v1028_v6 = vrot.slane %v886_v60, 5 }
  0x73   : > { %785 = vrot.lane.b32.xlu0 %v714_v56, %s4617_s6  ;;  %783 = vrot.lane.b32.xlu2 %v700_v57, %s4617_s6  ;;  %267 = vst.msk [vmem:[#allocation2 + $0x24] sm:$0xf] %vm257_vm5, %v234_v52  ;;  %v994_v57 = vsel %vm4893_vm6, %v992_v47, %v993_v48  ;;  %v888_v48 = vld [vmem:[%s4707_s5 + $0x88] sm:$0xf]  ;;  %v891_v3 = vld [vmem:[%s4707_s5 + $0x94] sm:$0xf]  ;;  %s220_s6 = scalar_lea.vmem %s6456_s2, %s4701_s27 }
  0x74   : > { %v1032_v55 = vrot.slane %v888_v48, 5  ;;  %v247_v7 = vld [vmem:[%s4707_s5 + $0x84] sm:$0xf]  ;;  %v893_v11 = vld [vmem:[%s4707_s5 + $0x9c] sm:$0xe] }
  0x75   : > { %v894_v13 = vld [vmem:[%s4707_s5 + $0xa0] sm:$0xf]  ;;  %280 = vst.msk [vmem:[#allocation2 + $0x58] sm:$0xf] %vm257_vm5, %v247_v7  ;;  %v890_v17 = vld [vmem:[%s4707_s5 + $0x90] sm:$0xe] }
  0x76   : > { %v251_v20 = vld [vmem:[%s4707_s5 + $0x9c] sm:$0xf]  ;;  %v4089_v27 = vrot.slane %v890_v17, 9  ;;  %v895_v37 = vld [vmem:[%s4707_s5 + $0xa4] sm:$0x1] }
  0x77   : > { %284 = vst.msk [vmem:[#allocation2 + $0x68] sm:$0xf] %vm257_vm5, %v251_v20  ;;  %v901_v53 = vld [vmem:[%s4707_s5 + $0xbc] sm:$0x1] }
  0x78   : > { %v4096_v7 = vld [vmem:[%s4707_s5 + $0x1c] sm:$0xf] }
  0x79   : > { %v4101_v20 = vld [vmem:[%s4707_s5 + $0x3c] sm:$0xf] }
  0x7a   : > { %1069 = vrot.lane.b32.xlu1 %v963_v5, %s4618_s7 }
  0x7b   : > { %1067 = vrot.lane.b32.xlu0 %v959_v8, %s4618_s7  ;;  %1065 = vrot.lane.b32.xlu2 %v956_v10, %s4618_s7  ;;  %v879_v8 = vld [vmem:[%s4707_s5 + $0x64] sm:$0xf]  ;;  %v4083_v10 = vrot.slane %v872_v0, 9 }
  0x7c   : > { %v1011_v15 = vrot.slane %v879_v8, 5 }
  0x7d   : > { %v998_v19 = vsel %vm4893_vm6, %v4083_v10, %v997_v61  ;;  %v1034_v61 = vrot.slane %v1032_v55, 4 }
  0x82   : > { %1075 = vrot.lane.b32.xlu1 %v973_v21, %s4618_s7  ;;  %v1013_v21 = vrot.slane %v1011_v15, 4 }
  0x83   : > { %1073 = vrot.lane.b32.xlu0 %v970_v26, %s4618_s7  ;;  %1071 = vrot.lane.b32.xlu2 %v966_v28, %s4618_s7  ;;  %v4085_v26 = vrot.slane %v878_v18, 9  ;;  %v4090_v18 = vrot.slane %v893_v11, 9 }
  0x84   : > { %v1015_v34 = vsel %vm4893_vm6, %v1013_v21, %v1014_v22 }
  0x85   : > { %v734_v39 = vpop.permute.xlu2 %733  ;;  %v1012_v36 = vsel %vm4893_vm6, %v4085_v26, %v1011_v15  ;;  %v892_v15 = vld [vmem:[%s4707_s5 + $0x98] sm:$0x1] }
  0x86   : > { %826 = vst.msk [vmem:[#allocation2 + $0x10] sm:$0xf] %vm821_vm7, %v734_v39  ;;  %v883_v39 = vld [vmem:[%s4707_s5 + $0x74] sm:$0x1]  ;;  %v1042_v23 = vrot.slane %v892_v15, 5 }
  0x87   : > { %v1021_v47 = vrot.slane %v883_v39, 5  ;;  %v4097_v15 = vld [vmem:[%s4707_s5 + $0x24] sm:$0xf] }
  0x8a   : > { %1081 = vrot.lane.b32.xlu1 %v984_v40, %s4618_s7  ;;  %v1008_v40 = vsel %vm4893_vm6, %v1006_v29, %v1007_v30  ;;  %v249_v30 = vld [vmem:[%s4707_s5 + $0x90] sm:$0xf] }
  0x8b   : > { %1079 = vrot.lane.b32.xlu0 %v980_v42, %s4618_s7  ;;  %1077 = vrot.lane.b32.xlu2 %v977_v45, %s4618_s7  ;;  %v4087_v42 = vrot.slane %v884_v35, 9  ;;  %v896_v35 = vld [vmem:[%s4707_s5 + $0xa8] sm:$0xe]  ;;  %282 = vst.msk [vmem:[#allocation2 + $0x60] sm:$0xf] %vm257_vm5, %v249_v30 }
  0x8d   : > { %v736_v56 = vpop.permute.xlu2 %735  ;;  %v1026_v54 = vsel %vm4893_vm6, %v4087_v42, %v1025_v43  ;;  %v4091_v42 = vrot.slane %v896_v35, 9 }
  0x8e   : > { %827 = vst.msk [vmem:[#allocation2 + $0x14] sm:$0xf] %vm821_vm7, %v736_v56  ;;  %v1022_v56 = vsel %vm4893_vm6, %v1020_v46, %v1021_v47  ;;  %v1049_v46 = vrot.slane %v895_v37, 5  ;;  %v253_v47 = vld [vmem:[%s4707_s5 + $0xa8] sm:$0xf] }
  0x8f   : > { %286 = vst.msk [vmem:[#allocation2 + $0x70] sm:$0xf] %vm257_vm5, %v253_v47 }
  0x92   : > { %1087 = vrot.lane.b32.xlu1 %v994_v57, %s4618_s7  ;;  %v889_v57 = vld [vmem:[%s4707_s5 + $0x8c] sm:$0x1] }
  0x93   : > { %1085 = vrot.lane.b32.xlu0 %v991_v58, %s4618_s7  ;;  %1083 = vrot.lane.b32.xlu2 %v987_v63, %s4618_s7  ;;  %v887_v58 = vld [vmem:[%s4707_s5 + $0x84] sm:$0xe]  ;;  %v1035_v62 = vrot.slane %v889_v57, 5  ;;  %v248_v63 = vld [vmem:[%s4707_s5 + $0x88] sm:$0xf] }
  0x94   : > { %v730_v5 = vpop.permute.xlu1 %729  ;;  %v4088_v2 = vrot.slane %v887_v58, 9  ;;  %281 = vst.msk [vmem:[#allocation2 + $0x5c] sm:$0xf] %vm257_vm5, %v248_v63  ;;  %v1063_v58 = vrot.slane %v901_v53, 5  ;;  %v255_v63 = vld [vmem:[%s4707_s5 + $0xb4] sm:$0xf] }
  0x95   : > { %824 = vst.msk [vmem:[#allocation2 + $0x8] sm:$0xf] %vm821_vm7, %v730_v5  ;;  %v726_v9 = vpop.permute.xlu0 %725  ;;  %v742_v12 = vpop.permute.xlu2 %741  ;;  %v1027_v5 = vrot.slane %v1025_v43, 4  ;;  %v1036_v10 = vsel %vm4893_vm6, %v1034_v61, %v1035_v62  ;;  %v900_v43 = vld [vmem:[%s4707_s5 + $0xb8] sm:$0xf] }
  0x96   : > { %822 = vst.msk [vmem:[#allocation2] sm:$0xf] %vm821_vm7, %v726_v9  ;;  %v246_v9 = vld [vmem:[%s4707_s5 + $0x7c] sm:$0xf]  ;;  %v256_v61 = vld [vmem:[%s4707_s5 + $0xb8] sm:$0xf] }
  0x97   : > { %830 = vst.msk [vmem:[#allocation2 + $0x20] sm:$0xf] %vm821_vm7, %v742_v12  ;;  %v1033_v12 = vsel %vm4893_vm6, %v4088_v2, %v1032_v55  ;;  %v899_v55 = vld [vmem:[%s4707_s5 + $0xb4] sm:$0xe]  ;;  %v4126_v53 = vld [vmem:[%s4707_s5 + $0x10] sm:$0xf] }
  0x98   : > { %279 = vst.msk [vmem:[#allocation2 + $0x54] sm:$0xf] %vm257_vm5, %v246_v9  ;;  %v4092_v60 = vrot.slane %v899_v55, 9  ;;  %v4094_v9 = vld [vmem:[%s4707_s5 + $0x10] sm:$0xf] }
  0x99   : > { %289 = vst.msk [vmem:[#allocation2 + $0x7c] sm:$0xf] %vm257_vm5, %v256_v61  ;;  %v4119_v61 = vld [vmem:[%s4707_s5 + $0xa8] sm:$0xf] }
  0x9a   : > { %1093 = vrot.lane.b32.xlu1 %v1005_v14, %s4618_s7  ;;  %v1039_v14 = vrot.slane %v891_v3, 5  ;;  %288 = vst.msk [vmem:[#allocation2 + $0x78] sm:$0xf] %vm257_vm5, %v255_v63 }
  0x9b   : > { %1091 = vrot.lane.b32.xlu0 %v1001_v16, %s4618_s7  ;;  %1089 = vrot.lane.b32.xlu2 %v998_v19, %s4618_s7  ;;  %v1029_v16 = vsel %vm4893_vm6, %v1027_v5, %v1028_v6  ;;  %v1046_v19 = vrot.slane %v894_v13, 5  ;;  %v4099_v13 = vld [vmem:[%s4707_s5 + $0x30] sm:$0xf] }
  0x9c   : > { %v732_v24 = vpop.permute.xlu1 %731  ;;  %v1041_v22 = vrot.slane %v1039_v14, 4 }
  0x9d   : > { %825 = vst.msk [vmem:[#allocation2 + $0xc] sm:$0xf] %vm821_vm7, %v732_v24  ;;  %v728_v28 = vpop.permute.xlu0 %727  ;;  %v748_v32 = vpop.permute.xlu2 %747  ;;  %v897_v24 = vld [vmem:[%s4707_s5 + $0xac] sm:$0xf]  ;;  %v1047_v31 = vsel %vm4893_vm6, %v4090_v18, %v1046_v19 }
  0x9e   : > { %823 = vst.msk [vmem:[#allocation2 + $0x4] sm:$0xf] %vm821_vm7, %v728_v28  ;;  %v250_v28 = vld [vmem:[%s4707_s5 + $0x94] sm:$0xf]  ;;  %v1043_v33 = vsel %vm4893_vm6, %v1041_v22, %v1042_v23 }
  0x9f   : > { %833 = vst.msk [vmem:[#allocation2 + $0x2c] sm:$0xf] %vm821_vm7, %v748_v32  ;;  %v1053_v32 = vrot.slane %v897_v24, 5 }
  0xa0   : > { %283 = vst.msk [vmem:[#allocation2 + $0x64] sm:$0xf] %vm257_vm5, %v250_v28  ;;  %v4103_v28 = vld [vmem:[%s4707_s5 + $0x48] sm:$0xf] }
  0xa1   : > { %v1055_v38 = vrot.slane %v1053_v32, 4  ;;  %v1054_v51 = vsel %vm4893_vm6, %v4091_v42, %v1053_v32  ;;  %v4108_v32 = vld [vmem:[%s4707_s5 + $0x64] sm:$0xf] }
  0xa2   : > { %1099 = vrot.lane.b32.xlu1 %v1015_v34, %s4618_s7  ;;  %v898_v34 = vld [vmem:[%s4707_s5 + $0xb0] sm:$0x1] }
  0xa3   : > { %1097 = vrot.lane.b32.xlu0 %v1012_v36, %s4618_s7  ;;  %1095 = vrot.lane.b32.xlu2 %v1008_v40, %s4618_s7  ;;  %v1040_v36 = vsel %vm4893_vm6, %v4089_v27, %v1039_v14  ;;  %v1056_v39 = vrot.slane %v898_v34, 5  ;;  %v254_v40 = vld [vmem:[%s4707_s5 + $0xac] sm:$0xf]  ;;  %v4098_v14 = vld [vmem:[%s4707_s5 + $0x28] sm:$0xf] }
  0xa4   : > { %v740_v45 = vpop.permute.xlu1 %739  ;;  %287 = vst.msk [vmem:[#allocation2 + $0x74] sm:$0xf] %vm257_vm5, %v254_v40  ;;  %v4104_v27 = vld [vmem:[%s4707_s5 + $0x4c] sm:$0xf]  ;;  %v4106_v34 = vld [vmem:[%s4707_s5 + $0x58] sm:$0xf] }
  0xa5   : > { %829 = vst.msk [vmem:[#allocation2 + $0x1c] sm:$0xf] %vm821_vm7, %v740_v45  ;;  %v738_v49 = vpop.permute.xlu0 %737  ;;  %v754_v52 = vpop.permute.xlu2 %753  ;;  %v1048_v45 = vrot.slane %v1046_v19, 4  ;;  %v1057_v50 = vsel %vm4893_vm6, %v1055_v38, %v1056_v39  ;;  %v4102_v19 = vld [vmem:[%s4707_s5 + $0x40] sm:$0xf] }
  0xa6   : > { %828 = vst.msk [vmem:[#allocation2 + $0x18] sm:$0xf] %vm821_vm7, %v738_v49  ;;  %v252_v49 = vld [vmem:[%s4707_s5 + $0xa0] sm:$0xf]  ;;  %v4111_v38 = vld [vmem:[%s4707_s5 + $0x78] sm:$0xf] }
  0xa7   : > { %836 = vst.msk [vmem:[#allocation2 + $0x38] sm:$0xf] %vm821_vm7, %v754_v52  ;;  %v1060_v52 = vrot.slane %v900_v43, 5  ;;  %v4110_v39 = vld [vmem:[%s4707_s5 + $0x70] sm:$0xf] }
  0xa8   : > { %285 = vst.msk [vmem:[#allocation2 + $0x6c] sm:$0xf] %vm257_vm5, %v252_v49  ;;  %v4109_v40 = vld [vmem:[%s4707_s5 + $0x6c] sm:$0xf] }
  0xa9   : > { %v1062_v57 = vrot.slane %v1060_v52, 4  ;;  %v1061_v3 = vsel %vm4893_vm6, %v4092_v60, %v1060_v52  ;;  %v4115_v52 = vld [vmem:[%s4707_s5 + $0x90] sm:$0xf]  ;;  %v4120_v60 = vld [vmem:[%s4707_s5 + $0xac] sm:$0xf] }
  0xaa   : > { %1105 = vrot.lane.b32.xlu1 %v1026_v54, %s4618_s7  ;;  %v1050_v54 = vsel %vm4893_vm6, %v1048_v45, %v1049_v46  ;;  %v4113_v45 = vld [vmem:[%s4707_s5 + $0x84] sm:$0xf]  ;;  %v4112_v46 = vld [vmem:[%s4707_s5 + $0x7c] sm:$0xf] }
  0xab   : > { %1103 = vrot.lane.b32.xlu0 %v1022_v56, %s4618_s7  ;;  %1101 = vrot.lane.b32.xlu2 %v1019_v59, %s4618_s7  ;;  %v1064_v2 = vsel %vm4893_vm6, %v1062_v57, %v1063_v58  ;;  %v1446_v58 = vshll.u32 %v4126_v53, 16 }
  0xac   : > { %v746_v0 = vpop.permute.xlu1 %745 }
  0xad   : > { %832 = vst.msk [vmem:[#allocation2 + $0x28] sm:$0xf] %vm821_vm7, %v746_v0  ;;  %v744_v4 = vpop.permute.xlu0 %743  ;;  %v760_v8 = vpop.permute.xlu2 %759  ;;  %v4093_v0 = vld [vmem:[%s4707_s5 + $0xc] sm:$0xf] }
  0xae   : > { %831 = vst.msk [vmem:[#allocation2 + $0x24] sm:$0xf] %vm821_vm7, %v744_v4 }
  0xaf   : > { %839 = vst.msk [vmem:[#allocation2 + $0x44] sm:$0xf] %vm821_vm7, %v760_v8  ;;  %v4095_v8 = vld [vmem:[%s4707_s5 + $0x18] sm:$0xf] }
  0xb2   : > { %1111 = vrot.lane.b32.xlu1 %v1036_v10, %s4618_s7 }
  0xb3   : > { %1109 = vrot.lane.b32.xlu0 %v1033_v12, %s4618_s7  ;;  %1107 = vrot.lane.b32.xlu2 %v1029_v16, %s4618_s7 }
  0xb4   : > { %v752_v21 = vpop.permute.xlu1 %751 }
  0xb5   : > { %835 = vst.msk [vmem:[#allocation2 + $0x34] sm:$0xf] %vm821_vm7, %v752_v21  ;;  %v750_v26 = vpop.permute.xlu0 %749  ;;  %v766_v29 = vpop.permute.xlu2 %765  ;;  %v4100_v21 = vld [vmem:[%s4707_s5 + $0x34] sm:$0xf] }
  0xb6   : > { %834 = vst.msk [vmem:[#allocation2 + $0x30] sm:$0xf] %vm821_vm7, %v750_v26  ;;  %v4105_v26 = vld [vmem:[%s4707_s5 + $0x54] sm:$0xf] }
  0xb7   : > { %842 = vst.msk [vmem:[#allocation2 + $0x50] sm:$0xf] %vm821_vm7, %v766_v29 }
  0xba   : > { %1117 = vrot.lane.b32.xlu1 %v1047_v31, %s4618_s7 }
  0xbb   : > { %1115 = vrot.lane.b32.xlu0 %v1043_v33, %s4618_s7  ;;  %1113 = vrot.lane.b32.xlu2 %v1040_v36, %s4618_s7  ;;  %v4107_v33 = vld [vmem:[%s4707_s5 + $0x60] sm:$0xf] }
  0xbc   : > { %v758_v41 = vpop.permute.xlu1 %757 }
  0xbd   : > { %838 = vst.msk [vmem:[#allocation2 + $0x40] sm:$0xf] %vm821_vm7, %v758_v41  ;;  %v756_v44 = vpop.permute.xlu0 %755  ;;  %v772_v48 = vpop.permute.xlu2 %771 }
  0xbe   : > { %837 = vst.msk [vmem:[#allocation2 + $0x3c] sm:$0xf] %vm821_vm7, %v756_v44  ;;  %v4114_v44 = vld [vmem:[%s4707_s5 + $0x88] sm:$0xf] }
  0xbf   : > { %845 = vst.msk [vmem:[#allocation2 + $0x5c] sm:$0xf] %vm821_vm7, %v772_v48 }
  0xc2   : > { %1123 = vrot.lane.b32.xlu1 %v1057_v50, %s4618_s7  ;;  %v4117_v50 = vld [vmem:[%s4707_s5 + $0x9c] sm:$0xf] }
  0xc3   : > { %1121 = vrot.lane.b32.xlu0 %v1054_v51, %s4618_s7  ;;  %1119 = vrot.lane.b32.xlu2 %v1050_v54, %s4618_s7  ;;  %v4116_v51 = vld [vmem:[%s4707_s5 + $0x94] sm:$0xf] }
  0xc4   : > { %v764_v56 = vpop.permute.xlu1 %763 }
  0xc5   : > { %841 = vst.msk [vmem:[#allocation2 + $0x4c] sm:$0xf] %vm821_vm7, %v764_v56  ;;  %v762_v59 = vpop.permute.xlu0 %761  ;;  %v778_v62 = vpop.permute.xlu2 %777  ;;  %v4125_v56 = vld [vmem:[%s4707_s5 + $0xc] sm:$0xf] }
  0xc6   : > { %840 = vst.msk [vmem:[#allocation2 + $0x48] sm:$0xf] %vm821_vm7, %v762_v59  ;;  %v1450_v59 = vshrl.u32 %v4126_v53, 16  ;;  %v1440_v63 = vshll.u32 %v4125_v56, 16  ;;  %v4124_v53 = vld [vmem:[%s4707_s5 + $0xc4] sm:$0xf] }
  0xc7   : > { %848 = vst.msk [vmem:[#allocation2 + $0x68] sm:$0xf] %vm821_vm7, %v778_v62  ;;  %v1437_v62 = vshrl.u32 %v4125_v56, 16 }
  0xca   : > { %1259 = vrot.lane.b32.xlu1 %v4093_v0, %s4619_s8  ;;  %v4118_v0 = vld [vmem:[%s4707_s5 + $0xa0] sm:$0xf] }
  0xcb   : > { %1127 = vrot.lane.b32.xlu0 %v1064_v2, %s4618_s7  ;;  %1125 = vrot.lane.b32.xlu2 %v1061_v3, %s4618_s7  ;;  %v5205_v2 = vrot.slane %v1446_v58, 5  ;;  %v1452_v3 = vrot.slane %v1450_v59, 4 }
  0xcc   : > { %v770_v4 = vpop.permute.xlu1 %769 }
  0xcd   : > { %844 = vst.msk [vmem:[#allocation2 + $0x58] sm:$0xf] %vm821_vm7, %v770_v4  ;;  %v768_v5 = vpop.permute.xlu0 %767  ;;  %v784_v6 = vpop.permute.xlu2 %783  ;;  %v4127_v4 = vld [vmem:[%s4707_s5 + $0x14] sm:$0x1] }
  0xce   : > { %843 = vst.msk [vmem:[#allocation2 + $0x54] sm:$0xf] %vm821_vm7, %v768_v5 }
  0xcf   : > { %851 = vst.msk [vmem:[#allocation2 + $0x74] sm:$0xf] %vm821_vm7, %v784_v6  ;;  %v1439_v6 = vrot.slane %v1437_v62, 4  ;;  %v4140_v62 = vld [vmem:[%s4707_s5 + $0x48] sm:$0xf] }
  0xd2   : > { %1265 = vrot.lane.b32.xlu1 %v4096_v7, %s4619_s8  ;;  %v1442_v7 = vrot.slane %v1440_v63, 5 }
  0xd3   : > { %1263 = vrot.lane.b32.xlu0 %v4095_v8, %s4619_s8  ;;  %1261 = vrot.lane.b32.xlu2 %v4094_v9, %s4619_s8  ;;  %v4131_v8 = vld [vmem:[%s4707_s5 + $0x24] sm:$0xf] }
  0xd4   : > { %v776_v10 = vpop.permute.xlu1 %775 }
  0xd5   : > { %847 = vst.msk [vmem:[#allocation2 + $0x64] sm:$0xf] %vm821_vm7, %v776_v10  ;;  %v774_v11 = vpop.permute.xlu0 %773  ;;  %v1066_v12 = vpop.permute.xlu2 %1065  ;;  %v4129_v10 = vld [vmem:[%s4707_s5 + $0x1c] sm:$0xf] }
  0xd6   : > { %846 = vst.msk [vmem:[#allocation2 + $0x60] sm:$0xf] %vm821_vm7, %v774_v11  ;;  %v1453_v11 = vor.u32 %v1452_v3, %v5205_v2  ;;  %v4138_v3 = vld [vmem:[%s4707_s5 + $0x40] sm:$0xf] }
  0xd7   : > { %1162 = vst.msk [vmem:[#allocation2] sm:$0xf] %vm1161_vm8, %v1066_v12  ;;  %v1456_v12 = vshll.u32 %v4127_v4, 16 }
  0xda   : > { %1271 = vrot.lane.b32.xlu1 %v4099_v13, %s4619_s8 }
  0xdb   : > { %1269 = vrot.lane.b32.xlu0 %v4098_v14, %s4619_s8  ;;  %1267 = vrot.lane.b32.xlu2 %v4097_v15, %s4619_s8  ;;  %v4128_v14 = vld [vmem:[%s4707_s5 + $0x18] sm:$0xf]  ;;  %v4123_v15 = vld [vmem:[%s4707_s5 + $0xc0] sm:$0xf] }
  0xdc   : > { %v782_v16 = vpop.permute.xlu1 %781 }
  0xdd   : > { %850 = vst.msk [vmem:[#allocation2 + $0x70] sm:$0xf] %vm821_vm7, %v782_v16  ;;  %v780_v17 = vpop.permute.xlu0 %779  ;;  %v1072_v18 = vpop.permute.xlu2 %1071  ;;  %v1485_v16 = vshrl.u32 %v4131_v8, 16 }
  0xde   : > { %849 = vst.msk [vmem:[#allocation2 + $0x6c] sm:$0xf] %vm821_vm7, %v780_v17  ;;  %v1488_v17 = vshll.u32 %v4131_v8, 16 }
  0xdf   : > { %1165 = vst.msk [vmem:[#allocation2 + $0xc] sm:$0xf] %vm1161_vm8, %v1072_v18  ;;  %v4122_v18 = vld [vmem:[%s4707_s5 + $0xb8] sm:$0xf] }
  0xe2   : > { %1277 = vrot.lane.b32.xlu1 %v4102_v19, %s4619_s8  ;;  %v1443_v19 = vor.u32 %v1442_v7, %v1439_v6  ;;  %v4137_v7 = vld [vmem:[%s4707_s5 + $0x3c] sm:$0xf] }
  0xe3   : > { %1275 = vrot.lane.b32.xlu0 %v4101_v20, %s4619_s8  ;;  %1273 = vrot.lane.b32.xlu2 %v4100_v21, %s4619_s8  ;;  %v1470_v20 = vshll.u32 %v4129_v10, 16  ;;  %v1474_v21 = vshrl.u32 %v4129_v10, 16 }
  0xe4   : > { %v788_v22 = vpop.permute.xlu1 %787 }
  0xe5   : > { %853 = vst.msk [vmem:[#allocation2 + $0x7c] sm:$0xf] %vm821_vm7, %v788_v22  ;;  %v786_v23 = vpop.permute.xlu0 %785  ;;  %v1078_v24 = vpop.permute.xlu2 %1077  ;;  %v4121_v22 = vld [vmem:[%s4707_s5 + $0xb4] sm:$0xf] }
  0xe6   : > { %852 = vst.msk [vmem:[#allocation2 + $0x78] sm:$0xf] %vm821_vm7, %v786_v23  ;;  %v1461_v23 = vshrl.u32 %v4128_v14, 16 }
  0xe7   : > { %1168 = vst.msk [vmem:[#allocation2 + $0x18] sm:$0xf] %vm1161_vm8, %v1078_v24  ;;  %v1464_v24 = vshll.u32 %v4128_v14, 16 }
  0xea   : > { %1283 = vrot.lane.b32.xlu1 %v4105_v26, %s4619_s8  ;;  %v1454_v26 = vrot.slane %v1453_v11, 4 }
  0xeb   : > { %1281 = vrot.lane.b32.xlu0 %v4104_v27, %s4619_s8  ;;  %1279 = vrot.lane.b32.xlu2 %v4103_v28, %s4619_s8  ;;  %v1458_v27 = vrot.slane %v1456_v12, 5  ;;  %v1487_v28 = vrot.slane %v1485_v16, 4  ;;  %v1557_v12 = vshrl.u32 %v4140_v62, 16  ;;  %v1542_v16 = vshll.u32 %v4138_v3, 16 }
  0xec   : > { %v1070_v29 = vpop.permute.xlu1 %1069 }
  0xed   : > { %1164 = vst.msk [vmem:[#allocation2 + $0x8] sm:$0xf] %vm1161_vm8, %v1070_v29  ;;  %v1068_v30 = vpop.permute.xlu0 %1067  ;;  %v1084_v31 = vpop.permute.xlu2 %1083  ;;  %v1490_v29 = vrot.slane %v1488_v17, 5  ;;  %v1546_v17 = vshrl.u32 %v4138_v3, 16 }
  0xee   : > { %1163 = vst.msk [vmem:[#allocation2 + $0x4] sm:$0xf] %vm1161_vm8, %v1068_v30  ;;  %v4135_v30 = vld [vmem:[%s4707_s5 + $0x34] sm:$0xf] }
  0xef   : > { %1171 = vst.msk [vmem:[#allocation2 + $0x24] sm:$0xf] %vm1161_vm8, %v1084_v31  ;;  %v4134_v31 = vld [vmem:[%s4707_s5 + $0x30] sm:$0xf] }
  0xf2   : > { %1289 = vrot.lane.b32.xlu1 %v4108_v32, %s4619_s8 }
  0xf3   : > { %1287 = vrot.lane.b32.xlu0 %v4107_v33, %s4619_s8  ;;  %1285 = vrot.lane.b32.xlu2 %v4106_v34, %s4619_s8  ;;  %v1444_v33 = vrot.slane %v1443_v19, 4  ;;  %v4132_v34 = vld [vmem:[%s4707_s5 + $0x28] sm:$0xf]  ;;  %v4144_v19 = vld [vmem:[%s4707_s5 + $0x58] sm:$0xf] }
  0xf4   : > { %v1076_v35 = vpop.permute.xlu1 %1075 }
  0xf5   : > { %1167 = vst.msk [vmem:[#allocation2 + $0x14] sm:$0xf] %vm1161_vm8, %v1076_v35  ;;  %v1074_v36 = vpop.permute.xlu0 %1073  ;;  %v1090_v37 = vpop.permute.xlu2 %1089  ;;  %v5226_v35 = vrot.slane %v1470_v20, 5  ;;  %v1533_v20 = vshrl.u32 %v4137_v7, 16 }
  0xf6   : > { %1166 = vst.msk [vmem:[#allocation2 + $0x10] sm:$0xf] %vm1161_vm8, %v1074_v36  ;;  %v1476_v36 = vrot.slane %v1474_v21, 4  ;;  %v1536_v21 = vshll.u32 %v4137_v7, 16  ;;  %v4147_v7 = vld [vmem:[%s4707_s5 + $0x64] sm:$0xf] }
  0xf7   : > { %1174 = vst.msk [vmem:[#allocation2 + $0x30] sm:$0xf] %vm1161_vm8, %v1090_v37 }
  0xfa   : > { %1295 = vrot.lane.b32.xlu1 %v4111_v38, %s4619_s8  ;;  %v4130_v38 = vld [vmem:[%s4707_s5 + $0x20] sm:$0x1] }
  0xfb   : > { %1293 = vrot.lane.b32.xlu0 %v4110_v39, %s4619_s8  ;;  %1291 = vrot.lane.b32.xlu2 %v4109_v40, %s4619_s8  ;;  %v1463_v39 = vrot.slane %v1461_v23, 4  ;;  %v1466_v40 = vrot.slane %v1464_v24, 5 }
  0xfc   : > { %v1082_v41 = vpop.permute.xlu1 %1081 }
  0xfd   : > { %1170 = vst.msk [vmem:[#allocation2 + $0x20] sm:$0xf] %vm1161_vm8, %v1082_v41  ;;  %v1080_v42 = vpop.permute.xlu0 %1079  ;;  %v1096_v43 = vpop.permute.xlu2 %1095 }
  0xfe   : > { %1169 = vst.msk [vmem:[#allocation2 + $0x1c] sm:$0xf] %vm1161_vm8, %v1080_v42  ;;  %v1518_v42 = vshll.u32 %v4135_v30, 16 }
  0xff   : > { %1177 = vst.msk [vmem:[#allocation2 + $0x3c] sm:$0xf] %vm1161_vm8, %v1096_v43  ;;  %v1522_v43 = vshrl.u32 %v4135_v30, 16  ;;  %v1559_v30 = vrot.slane %v1557_v12, 4 }
 0x101   : > { %v1524_v56 = vrot.slane %v1522_v43, 4 }
 0x102   : > { %1301 = vrot.lane.b32.xlu1 %v4114_v44, %s4619_s8  ;;  %v1509_v44 = vshrl.u32 %v4134_v31, 16 }
 0x103   : > { %1299 = vrot.lane.b32.xlu0 %v4113_v45, %s4619_s8  ;;  %1297 = vrot.lane.b32.xlu2 %v4112_v46, %s4619_s8  ;;  %v1512_v45 = vshll.u32 %v4134_v31, 16  ;;  %v1459_v46 = vsel %vm4718_vm2, %v1454_v26, %v1458_v27 }
 0x104   : > { %v1088_v47 = vpop.permute.xlu1 %1087 }
 0x105   : > { %1173 = vst.msk [vmem:[#allocation2 + $0x2c] sm:$0xf] %vm1161_vm8, %v1088_v47  ;;  %v1086_v48 = vpop.permute.xlu0 %1085  ;;  %v1102_v49 = vpop.permute.xlu2 %1101  ;;  %v1491_v47 = vor.u32 %v1490_v29, %v1487_v28  ;;  %v1514_v58 = vrot.slane %v1512_v45, 5  ;;  %v4141_v29 = vld [vmem:[%s4707_s5 + $0x4c] sm:$0xf] }
 0x106   : > { %1172 = vst.msk [vmem:[#allocation2 + $0x28] sm:$0xf] %vm1161_vm8, %v1086_v48  ;;  %v1494_v48 = vshll.u32 %v4132_v34, 16 }
 0x107   : > { %1180 = vst.msk [vmem:[#allocation2 + $0x48] sm:$0xf] %vm1161_vm8, %v1102_v49  ;;  %v1449_v49 = vsel %vm4718_vm2, %v1444_v33, %v5205_v2  ;;  %v1492_v59 = vrot.slane %v1491_v47, 4  ;;  %v5265_v33 = vrot.slane %v1542_v16, 5 }
 0x10a   : > { %1307 = vrot.lane.b32.xlu1 %v4117_v50, %s4619_s8  ;;  %v1477_v50 = vor.u32 %v1476_v36, %v5226_v35  ;;  %v1590_v36 = vshll.u32 %v4144_v19, 16 }
 0x10b   : > { %1305 = vrot.lane.b32.xlu0 %v4116_v51, %s4619_s8  ;;  %1303 = vrot.lane.b32.xlu2 %v4115_v52, %s4619_s8  ;;  %v1480_v51 = vshll.u32 %v4130_v38, 16  ;;  %v1498_v52 = vshrl.u32 %v4132_v34, 16  ;;  %v1548_v34 = vrot.slane %v1546_v17, 4  ;;  %v4143_v38 = vld [vmem:[%s4707_s5 + $0x54] sm:$0xf]  ;;  %v1614_v17 = vshll.u32 %v4147_v7, 16 }
 0x10c   : > { %v1094_v54 = vpop.permute.xlu1 %1093 }
 0x10d   : > { %1176 = vst.msk [vmem:[#allocation2 + $0x38] sm:$0xf] %vm1161_vm8, %v1094_v54  ;;  %v1092_v55 = vpop.permute.xlu0 %1091  ;;  %v1108_v57 = vpop.permute.xlu2 %1107  ;;  %v1467_v54 = vor.u32 %v1466_v40, %v1463_v39  ;;  %v1482_v2 = vrot.slane %v1480_v51, 5  ;;  %v1500_v6 = vrot.slane %v1498_v52, 4  ;;  %v1535_v39 = vrot.slane %v1533_v20, 4 }
 0x10e   : > { %1175 = vst.msk [vmem:[#allocation2 + $0x34] sm:$0xf] %vm1161_vm8, %v1092_v55  ;;  %v5240_v55 = vrot.slane %v1518_v42, 5  ;;  %v1538_v40 = vrot.slane %v1536_v21, 5  ;;  %v1581_v51 = vshrl.u32 %v4143_v38, 16  ;;  %v5278_v52 = vrot.slane %v1590_v36, 5 }
 0x10f   : > { %1183 = vst.msk [vmem:[#allocation2 + $0x54] sm:$0xf] %vm1161_vm8, %v1108_v57  ;;  %v1511_v57 = vrot.slane %v1509_v44, 4 }
 0x110   : > { %v1525_v8 = vor.u32 %v1524_v56, %v5240_v55  ;;  %v1539_v56 = vor.u32 %v1538_v40, %v1535_v39 }
 0x111   : > { %v1515_v10 = vor.u32 %v1514_v58, %v1511_v57  ;;  %v1570_v57 = vshrl.u32 %v4141_v29, 16 }
 0x112   : > { %1313 = vrot.lane.b32.xlu1 %v4120_v60, %s4619_s8  ;;  %v1496_v60 = vrot.slane %v1494_v48, 5  ;;  %v1526_v26 = vrot.slane %v1525_v8, 4 }
 0x113   : > { %1311 = vrot.lane.b32.xlu0 %v4119_v61, %s4619_s8  ;;  %1309 = vrot.lane.b32.xlu2 %v4118_v0, %s4619_s8  ;;  %v4136_v61 = vld [vmem:[%s4707_s5 + $0x38] sm:$0x1]  ;;  %v1478_v0 = vrot.slane %v1477_v50, 4  ;;  %v1516_v28 = vrot.slane %v1515_v10, 4 }
 0x114   : > { %v1100_v5 = vpop.permute.xlu1 %1099  ;;  %v1497_v14 = vsel %vm4718_vm2, %v1492_v59, %v1496_v60  ;;  %v1501_v23 = vor.u32 %v1500_v6, %v1496_v60  ;;  %v4149_v60 = vld [vmem:[%s4707_s5 + $0x6c] sm:$0xf]  ;;  %v1540_v6 = vrot.slane %v1539_v56, 4 }
 0x115   : > { %1179 = vst.msk [vmem:[#allocation2 + $0x44] sm:$0xf] %vm1161_vm8, %v1100_v5  ;;  %v1098_v9 = vpop.permute.xlu0 %1097  ;;  %v1114_v13 = vpop.permute.xlu2 %1113  ;;  %v1468_v5 = vrot.slane %v1467_v54, 4  ;;  %v1521_v45 = vsel %vm4718_vm2, %v1516_v28, %v5240_v55  ;;  %v1584_v54 = vshll.u32 %v4143_v38, 16  ;;  %v4145_v55 = vld [vmem:[%s4707_s5 + $0x5c] sm:$0x1] }
 0x116   : > { %1178 = vst.msk [vmem:[#allocation2 + $0x40] sm:$0xf] %vm1161_vm8, %v1098_v9  ;;  %v1528_v9 = vshll.u32 %v4136_v61, 16  ;;  %v1502_v42 = vrot.slane %v1501_v23, 4  ;;  %v1632_v10 = vshll.u32 %v4149_v60, 16 }
 0x117   : > { %1186 = vst.msk [vmem:[#allocation2 + $0x60] sm:$0xf] %vm1161_vm8, %v1114_v13  ;;  %v4133_v13 = vld [vmem:[%s4707_s5 + $0x2c] sm:$0x1]  ;;  %v4148_v38 = vld [vmem:[%s4707_s5 + $0x68] sm:$0x1] }
 0x118   : > { %v1504_v24 = vshll.u32 %v4133_v13, 16  ;;  %v1530_v27 = vrot.slane %v1528_v9, 5  ;;  %v1629_v9 = vshrl.u32 %v4149_v60, 16  ;;  %v4142_v13 = vld [vmem:[%s4707_s5 + $0x50] sm:$0x1] }
 0x11a   : > { %1319 = vrot.lane.b32.xlu1 %v4123_v15, %s4619_s8  ;;  %v1560_v15 = vshll.u32 %v4140_v62, 16  ;;  %v1506_v43 = vrot.slane %v1504_v24, 5  ;;  %v1531_v44 = vsel %vm4718_vm2, %v1526_v26, %v1530_v27  ;;  %v1576_v24 = vshll.u32 %v4142_v13, 16 }
 0x11b   : > { %1317 = vrot.lane.b32.xlu0 %v4122_v18, %s4619_s8  ;;  %1315 = vrot.lane.b32.xlu2 %v4121_v22, %s4619_s8  ;;  %v1483_v18 = vsel %vm4718_vm2, %v1478_v0, %v1482_v2  ;;  %v1473_v22 = vsel %vm4718_vm2, %v1468_v5, %v5226_v35  ;;  %v1594_v35 = vshrl.u32 %v4144_v19, 16  ;;  %v1583_v0 = vrot.slane %v1581_v51, 4 }
 0x11c   : > { %v1106_v32 = vpop.permute.xlu1 %1105  ;;  %v1562_v31 = vrot.slane %v1560_v15, 5  ;;  %v1507_v58 = vsel %vm4718_vm2, %v1502_v42, %v1506_v43  ;;  %v1586_v5 = vrot.slane %v1584_v54, 5  ;;  %v1631_v28 = vrot.slane %v1629_v9, 4  ;;  %v4155_v9 = vld [vmem:[%s4707_s5 + $0x84] sm:$0xf] }
 0x11d   : > { %1182 = vst.msk [vmem:[#allocation2 + $0x50] sm:$0xf] %vm1161_vm8, %v1106_v32  ;;  %v1104_v37 = vpop.permute.xlu0 %1103  ;;  %v1120_v41 = vpop.permute.xlu2 %1119  ;;  %v4139_v32 = vld [vmem:[%s4707_s5 + $0x44] sm:$0x1] }
 0x11e   : > { %1181 = vst.msk [vmem:[#allocation2 + $0x4c] sm:$0xf] %vm1161_vm8, %v1104_v37  ;;  %v1563_v48 = vor.u32 %v1562_v31, %v1559_v30  ;;  %v1552_v50 = vshll.u32 %v4139_v32, 16  ;;  %v1587_v21 = vor.u32 %v1586_v5, %v1583_v0  ;;  %v5303_v30 = vrot.slane %v1614_v17, 5  ;;  %v4153_v32 = vld [vmem:[%s4707_s5 + $0x7c] sm:$0xf] }
 0x11f   : > { %1189 = vst.msk [vmem:[#allocation2 + $0x6c] sm:$0xf] %vm1161_vm8, %v1120_v41  ;;  %v4156_v5 = vld [vmem:[%s4707_s5 + $0x88] sm:$0xf] }
 0x120   : > { %v1564_v61 = vrot.slane %v1563_v48, 4 }
 0x122   : > { %1822 = vrot.lane.b32.xlu1 %v1459_v46, %s4620_s9  ;;  %v1566_v46 = vshll.u32 %v4141_v29, 16  ;;  %v1634_v29 = vrot.slane %v1632_v10, 5 }
 0x123   : > { %1820 = vrot.lane.b32.xlu0 %v1449_v49, %s4620_s9  ;;  %1321 = vrot.lane.b32.xlu2 %v4124_v53, %s4619_s8  ;;  %v1549_v49 = vor.u32 %v1548_v34, %v5265_v33  ;;  %v1596_v53 = vrot.slane %v1594_v35, 4  ;;  %v4152_v34 = vld [vmem:[%s4707_s5 + $0x78] sm:$0xf]  ;;  %v4150_v35 = vld [vmem:[%s4707_s5 + $0x70] sm:$0xf]  ;;  %s4573_s8 = scalar_lea.hbm %s6458_s4, 512 }
 0x124   : > { %v1112_v63 = vpop.permute.xlu1 %1111  ;;  %v1568_v59 = vrot.slane %v1566_v46, 5  ;;  %v1666_v46 = vshrl.u32 %v4153_v32, 16  ;;  %v1656_v48 = vshll.u32 %v4152_v34, 16  ;;  %v1642_v56 = vshrl.u32 %v4150_v35, 16 }
 0x125   : > { %1185 = vst.msk [vmem:[#allocation2 + $0x5c] sm:$0xf] %vm1161_vm8, %v1112_v63  ;;  %v1110_v4 = vpop.permute.xlu0 %1109  ;;  %v1126_v11 = vpop.permute.xlu2 %1125  ;;  %v1550_v62 = vrot.slane %v1549_v49, 4  ;;  %v1554_v63 = vrot.slane %v1552_v50, 5  ;;  %v1597_v3 = vor.u32 %v1596_v53, %v5278_v52  ;;  %v1635_v49 = vor.u32 %v1634_v29, %v1631_v28 }
 0x126   : > { %1184 = vst.msk [vmem:[#allocation2 + $0x58] sm:$0xf] %vm1161_vm8, %v1110_v4  ;;  %v1600_v4 = vshll.u32 %v4145_v55, 16  ;;  %v1569_v15 = vsel %vm4718_vm2, %v1564_v61, %v1568_v59  ;;  %v1638_v50 = vshll.u32 %v4150_v35, 16  ;;  %v1624_v53 = vshll.u32 %v4148_v38, 16 }
 0x127   : > { %1192 = vst.msk [vmem:[#allocation2 + $0x78] sm:$0xf] %vm1161_vm8, %v1126_v11  ;;  %v1572_v11 = vrot.slane %v1570_v57, 4  ;;  %v1555_v16 = vsel %vm4718_vm2, %v1550_v62, %v1554_v63  ;;  %v1598_v19 = vrot.slane %v1597_v3, 4  ;;  %v1658_v61 = vrot.slane %v1656_v48, 5 }
 0x128   : > { %v1602_v20 = vrot.slane %v1600_v4, 5  ;;  %v1636_v62 = vrot.slane %v1635_v49, 4  ;;  %v1640_v63 = vrot.slane %v1638_v50, 5  ;;  %v1626_v0 = vrot.slane %v1624_v53, 5  ;;  %v4158_v4 = vld [vmem:[%s4707_s5 + $0x90] sm:$0xf] }
 0x129   : > { %v1573_v23 = vor.u32 %v1572_v11, %v1568_v59  ;;  %v1668_v59 = vrot.slane %v1666_v46, 4  ;;  %v1701_v17 = vshrl.u32 %v4158_v4, 16 }
 0x12a   : > { %1828 = vrot.lane.b32.xlu1 %v1497_v14, %s4620_s9  ;;  %v4146_v14 = vld [vmem:[%s4707_s5 + $0x60] sm:$0xf] }
 0x12b   : > { %1826 = vrot.lane.b32.xlu0 %v1483_v18, %s4620_s9  ;;  %1824 = vrot.lane.b32.xlu2 %v1473_v22, %s4620_s9  ;;  %v1618_v18 = vshrl.u32 %v4147_v7, 16  ;;  %v1545_v22 = vsel %vm4718_vm2, %v1540_v6, %v5265_v33  ;;  %v1605_v26 = vshrl.u32 %v4146_v14, 16  ;;  %v1608_v27 = vshll.u32 %v4146_v14, 16  ;;  %v4151_v14 = vld [vmem:[%s4707_s5 + $0x74] sm:$0x1] }
 0x12c   : > { %v1118_v37 = vpop.permute.xlu1 %1117  ;;  %v1603_v33 = vsel %vm4718_vm2, %v1598_v19, %v1602_v20  ;;  %v1574_v40 = vrot.slane %v1573_v23, 4  ;;  %v1686_v19 = vshll.u32 %v4156_v5, 16  ;;  %v1690_v20 = vshrl.u32 %v4156_v5, 16 }
 0x12d   : > { %1188 = vst.msk [vmem:[#allocation2 + $0x68] sm:$0xf] %vm1161_vm8, %v1118_v37  ;;  %v1116_v41 = vpop.permute.xlu0 %1115  ;;  %v1262_v47 = vpop.permute.xlu2 %1261  ;;  %v1620_v31 = vrot.slane %v1618_v18, 4  ;;  %v1588_v37 = vrot.slane %v1587_v21, 4  ;;  %v1607_v42 = vrot.slane %v1605_v26, 4  ;;  %v1610_v43 = vrot.slane %v1608_v27, 5 }
 0x12e   : > { %1187 = vst.msk [vmem:[#allocation2 + $0x64] sm:$0xf] %vm1161_vm8, %v1116_v41  ;;  %v1578_v41 = vrot.slane %v1576_v24, 5  ;;  %v1704_v18 = vshll.u32 %v4158_v4, 16  ;;  %v1677_v21 = vshrl.u32 %v4155_v9, 16  ;;  %v1648_v26 = vshll.u32 %v4151_v14, 16 }
 0x12f   : > { %1357 = vst.msk [vmem:[#allocation2 + $0x4] sm:$0xf] %vm1355_vm9, %v1262_v47  ;;  %v1653_v47 = vshrl.u32 %v4152_v34, 16  ;;  %v1621_v51 = vor.u32 %v1620_v31, %v5303_v30  ;;  %v1593_v54 = vsel %vm4718_vm2, %v1588_v37, %v5278_v52  ;;  %v1703_v31 = vrot.slane %v1701_v17, 4  ;;  %v4162_v34 = vld [vmem:[%s4707_s5 + $0xa0] sm:$0xf] }
 0x130   : > { %v1579_v57 = vsel %vm4718_vm2, %v1574_v40, %v1578_v41  ;;  %v4159_v37 = vld [vmem:[%s4707_s5 + $0x94] sm:$0xf]  ;;  %v5348_v35 = vrot.slane %v1686_v19, 5  ;;  %v1679_v38 = vrot.slane %v1677_v21, 4  ;;  %v4157_v41 = vld [vmem:[%s4707_s5 + $0x8c] sm:$0x1] }
 0x131   : > { %v1655_v60 = vrot.slane %v1653_v47, 4  ;;  %v1622_v52 = vrot.slane %v1621_v51, 4  ;;  %v1738_v46 = vshrl.u32 %v4162_v34, 16  ;;  %v1710_v51 = vshll.u32 %v4159_v37, 16  ;;  %v4160_v14 = vld [vmem:[%s4707_s5 + $0x98] sm:$0x1] }
 0x132   : > { %1834 = vrot.lane.b32.xlu1 %v1531_v44, %s4620_s9 }
 0x133   : > { %1832 = vrot.lane.b32.xlu0 %v1521_v45, %s4620_s9  ;;  %1830 = vrot.lane.b32.xlu2 %v1507_v58, %s4620_s9  ;;  %v1662_v45 = vshll.u32 %v4153_v32, 16  ;;  %v1611_v58 = vor.u32 %v1610_v43, %v1607_v42  ;;  %v1706_v32 = vrot.slane %v1704_v18, 5  ;;  %v1650_v43 = vrot.slane %v1648_v26, 5 }
 0x134   : > { %v1124_v2 = vpop.permute.xlu1 %1123 }
 0x135   : > { %1191 = vst.msk [vmem:[#allocation2 + $0x74] sm:$0xf] %vm1161_vm8, %v1124_v2  ;;  %v1122_v8 = vpop.permute.xlu0 %1121  ;;  %v1268_v12 = vpop.permute.xlu2 %1267  ;;  %v5322_v55 = vrot.slane %v1662_v45, 5  ;;  %v4154_v2 = vld [vmem:[%s4707_s5 + $0x80] sm:$0x1]  ;;  %v1612_v7 = vrot.slane %v1611_v58, 4  ;;  %v1707_v50 = vor.u32 %v1706_v32, %v1703_v31 }
 0x136   : > { %1190 = vst.msk [vmem:[#allocation2 + $0x70] sm:$0xf] %vm1161_vm8, %v1122_v8  ;;  %v1644_v8 = vrot.slane %v1642_v56, 4  ;;  %v1672_v11 = vshll.u32 %v4154_v2, 16  ;;  %v1734_v45 = vshll.u32 %v4162_v34, 16  ;;  %v1696_v56 = vshll.u32 %v4157_v41, 16 }
 0x137   : > { %1360 = vst.msk [vmem:[#allocation2 + $0x10] sm:$0xf] %vm1355_vm9, %v1268_v12  ;;  %v1669_v10 = vor.u32 %v1668_v59, %v5322_v55  ;;  %v1659_v12 = vor.u32 %v1658_v61, %v1655_v60  ;;  %v1617_v23 = vsel %vm4718_vm2, %v1612_v7, %v5303_v30  ;;  %v1692_v30 = vrot.slane %v1690_v20, 4  ;;  %v4163_v60 = vld [vmem:[%s4707_s5 + $0xa4] sm:$0x1] }
 0x138   : > { %v1645_v24 = vor.u32 %v1644_v8, %v1640_v63  ;;  %v1674_v28 = vrot.slane %v1672_v11, 5  ;;  %v1714_v58 = vshrl.u32 %v4159_v37, 16  ;;  %v5364_v61 = vrot.slane %v1734_v45, 5  ;;  %v4168_v32 = vld [vmem:[%s4707_s5 + $0xb8] sm:$0xf] }
 0x139   : > { %v1670_v27 = vrot.slane %v1669_v10, 4  ;;  %v1660_v29 = vrot.slane %v1659_v12, 4  ;;  %v1698_v4 = vrot.slane %v1696_v56, 5  ;;  %v1744_v8 = vshll.u32 %v4163_v60, 16 }
 0x13a   : > { %1840 = vrot.lane.b32.xlu1 %v1569_v15, %s4620_s9  ;;  %v1641_v15 = vsel %vm4718_vm2, %v1636_v62, %v1640_v63  ;;  %v1646_v42 = vrot.slane %v1645_v24, 4  ;;  %v1740_v62 = vrot.slane %v1738_v46, 4  ;;  %v1716_v10 = vrot.slane %v1714_v58, 4 }
 0x13b   : > { %1838 = vrot.lane.b32.xlu0 %v1555_v16, %s4620_s9  ;;  %1836 = vrot.lane.b32.xlu2 %v1545_v22, %s4620_s9  ;;  %v1627_v16 = vsel %vm4718_vm2, %v1622_v52, %v1626_v0  ;;  %v1680_v22 = vshll.u32 %v4155_v9, 16  ;;  %v1675_v49 = vsel %vm4718_vm2, %v1670_v27, %v1674_v28  ;;  %v1665_v53 = vsel %vm4718_vm2, %v1660_v29, %v5322_v55  ;;  %v4165_v9 = vld [vmem:[%s4707_s5 + $0xac] sm:$0xf] }
 0x13c   : > { %v1260_v36 = vpop.permute.xlu1 %1259  ;;  %v1651_v59 = vsel %vm4718_vm2, %v1646_v42, %v1650_v43  ;;  %v1708_v55 = vrot.slane %v1707_v50, 4  ;;  %v1712_v0 = vrot.slane %v1710_v51, 5  ;;  %v1741_v11 = vor.u32 %v1740_v62, %v5364_v61 }
 0x13d   : > { %1356 = vst.msk [vmem:[#allocation2] sm:$0xf] %vm1355_vm9, %v1260_v36  ;;  %v1128_v39 = vpop.permute.xlu0 %1127  ;;  %v1274_v44 = vpop.permute.xlu2 %1273  ;;  %v4161_v36 = vld [vmem:[%s4707_s5 + $0x9c] sm:$0xf]  ;;  %v1758_v21 = vshll.u32 %v4165_v9, 16  ;;  %v1720_v24 = vshll.u32 %v4160_v14, 16 }
 0x13e   : > { %1193 = vst.msk [vmem:[#allocation2 + $0x7c] sm:$0xf] %vm1161_vm8, %v1128_v39  ;;  %v1682_v39 = vrot.slane %v1680_v22, 5  ;;  %v1725_v47 = vshrl.u32 %v4161_v36, 16  ;;  %v1728_v48 = vshll.u32 %v4161_v36, 16  ;;  %v1762_v22 = vshrl.u32 %v4165_v9, 16 }
 0x13f   : > { %1363 = vst.msk [vmem:[#allocation2 + $0x1c] sm:$0xf] %vm1355_vm9, %v1274_v44  ;;  %v1742_v28 = vrot.slane %v1741_v11, 4  ;;  %v1746_v29 = vrot.slane %v1744_v8, 5  ;;  %v1722_v42 = vrot.slane %v1720_v24, 5  ;;  %v1786_v58 = vshrl.u32 %v4168_v32, 16 }
 0x140   : > { %v1727_v63 = vrot.slane %v1725_v47, 4  ;;  %v1730_v52 = vrot.slane %v1728_v48, 5  ;;  %v4174_v24 = vld [vmem:[%s4707_s5 + $0x10] sm:$0xf] }
 0x141   : > { %v1747_v45 = vsel %vm4718_vm2, %v1742_v28, %v1746_v29  ;;  %v1788_v8 = vrot.slane %v1786_v58, 4 }
 0x142   : > { %1846 = vrot.lane.b32.xlu1 %v1603_v33, %s4620_s9  ;;  %v1731_v12 = vor.u32 %v1730_v52, %v1727_v63 }
 0x143   : > { %1844 = vrot.lane.b32.xlu0 %v1593_v54, %s4620_s9  ;;  %1842 = vrot.lane.b32.xlu2 %v1579_v57, %s4620_s9  ;;  %v1693_v54 = vor.u32 %v1692_v30, %v5348_v35  ;;  %v1683_v57 = vor.u32 %v1682_v39, %v1679_v38  ;;  %v1764_v30 = vrot.slane %v1762_v22, 4  ;;  %v4171_v38 = vld [vmem:[%s4707_s5 + $0xc4] sm:$0xf]  ;;  %v4170_v39 = vld [vmem:[%s4707_s5 + $0xc0] sm:$0xf] }
 0x144   : > { %v1266_v3 = vpop.permute.xlu1 %1265  ;;  %v1732_v31 = vrot.slane %v1731_v12, 4  ;;  %v1806_v50 = vshll.u32 %v4171_v38, 16  ;;  %v1810_v51 = vshrl.u32 %v4171_v38, 16  ;;  %v1797_v56 = vshrl.u32 %v4170_v39, 16 }
 0x145   : > { %1359 = vst.msk [vmem:[#allocation2 + $0xc] sm:$0xf] %vm1355_vm9, %v1266_v3  ;;  %v1264_v6 = vpop.permute.xlu0 %1263  ;;  %v1280_v13 = vpop.permute.xlu2 %1279  ;;  %v1694_v3 = vrot.slane %v1693_v54, 4  ;;  %v1684_v5 = vrot.slane %v1683_v57, 4  ;;  %v1800_v57 = vshll.u32 %v4170_v39, 16 }
 0x146   : > { %1358 = vst.msk [vmem:[#allocation2 + $0x8] sm:$0xf] %vm1355_vm9, %v1264_v6  ;;  %v4167_v6 = vld [vmem:[%s4707_s5 + $0xb4] sm:$0xf]  ;;  %v1737_v46 = vsel %vm4718_vm2, %v1732_v31, %v5364_v61  ;;  %v1808_v63 = vrot.slane %v1806_v50, 5  ;;  %v1812_v52 = vrot.slane %v1810_v51, 4 }
 0x147   : > { %1366 = vst.msk [vmem:[#allocation2 + $0x28] sm:$0xf] %vm1355_vm9, %v1280_v13  ;;  %v1773_v17 = vshrl.u32 %v4167_v6, 16  ;;  %v1776_v18 = vshll.u32 %v4167_v6, 16  ;;  %v1699_v19 = vsel %vm4718_vm2, %v1694_v3, %v1698_v4  ;;  %v1689_v20 = vsel %vm4718_vm2, %v1684_v5, %v5348_v35  ;;  %v4172_v3 = vld [vmem:[%s4707_s5 + $0xc8] sm:$0x1] }
 0x148   : > { %v1760_v35 = vrot.slane %v1758_v21, 5  ;;  %v1799_v4 = vrot.slane %v1797_v56, 4  ;;  %v1802_v5 = vrot.slane %v1800_v57, 5  ;;  %v1813_v12 = vor.u32 %v1812_v52, %v1808_v63  ;;  %v4179_v50 = vld [vmem:[%s4707_s5 + $0x24] sm:$0xe] }
 0x149   : > { %v1775_v34 = vrot.slane %v1773_v17, 4  ;;  %v1778_v36 = vrot.slane %v1776_v18, 5  ;;  %v4223_v58 = vrot.slane %v4179_v50, 9  ;;  %v4271_v50 = vld [vmem:[%s4707_s5 + $0x20] sm:$0x1] }
 0x14a   : > { %1852 = vrot.lane.b32.xlu1 %v1641_v15, %s4620_s9  ;;  %v4164_v15 = vld [vmem:[%s4707_s5 + $0xa8] sm:$0xf] }
 0x14b   : > { %1850 = vrot.lane.b32.xlu0 %v1627_v16, %s4620_s9  ;;  %1848 = vrot.lane.b32.xlu2 %v1617_v23, %s4620_s9  ;;  %v1713_v16 = vsel %vm4718_vm2, %v1708_v55, %v1712_v0  ;;  %v1717_v23 = vor.u32 %v1716_v10, %v1712_v0  ;;  %v1749_v26 = vshrl.u32 %v4164_v15, 16  ;;  %v1752_v27 = vshll.u32 %v4164_v15, 16  ;;  %v4169_v10 = vld [vmem:[%s4707_s5 + $0xbc] sm:$0x1] }
 0x14c   : > { %v1272_v33 = vpop.permute.xlu1 %1271  ;;  %v1779_v48 = vor.u32 %v1778_v36, %v1775_v34  ;;  %v1803_v15 = vor.u32 %v1802_v5, %v1799_v4  ;;  %v1792_v18 = vshll.u32 %v4169_v10, 16  ;;  %v4177_v34 = vld [vmem:[%s4707_s5 + $0x1c] sm:$0xf]  ;;  %v2047_v36 = vrot.slane %v4174_v24, 5  ;;  %v4184_v4 = vld [vmem:[%s4707_s5 + $0x38] sm:$0x1] }
 0x14d   : > { %1362 = vst.msk [vmem:[#allocation2 + $0x18] sm:$0xf] %vm1355_vm9, %v1272_v33  ;;  %v1270_v40 = vpop.permute.xlu0 %1269  ;;  %v1286_v44 = vpop.permute.xlu2 %1285  ;;  %v4166_v33 = vld [vmem:[%s4707_s5 + $0xb0] sm:$0x1]  ;;  %v1718_v41 = vrot.slane %v1717_v23, 4  ;;  %v1751_v43 = vrot.slane %v1749_v26, 4 }
 0x14e   : > { %1361 = vst.msk [vmem:[#allocation2 + $0x14] sm:$0xf] %vm1355_vm9, %v1270_v40  ;;  %v1768_v54 = vshll.u32 %v4166_v33, 16  ;;  %v1780_v61 = vrot.slane %v1779_v48, 4  ;;  %v1804_v22 = vrot.slane %v1803_v15, 4  ;;  %v2054_v38 = vrot.slane %v4177_v34, 5 }
 0x14f   : > { %1369 = vst.msk [vmem:[#allocation2 + $0x34] sm:$0xf] %vm1355_vm9, %v1286_v44  ;;  %v1754_v44 = vrot.slane %v1752_v27, 5  ;;  %v1794_v27 = vrot.slane %v1792_v18, 5  ;;  %v4175_v33 = vld [vmem:[%s4707_s5 + $0x14] sm:$0x1] }
 0x150   : > { %v1809_v31 = vsel %vm4718_vm2, %v1804_v22, %v1808_v63  ;;  %v4187_v22 = vld [vmem:[%s4707_s5 + $0x44] sm:$0x1] }
 0x151   : > { %v1755_v60 = vor.u32 %v1754_v44, %v1751_v43  ;;  %v2078_v34 = vrot.slane %v4187_v22, 5 }
 0x152   : > { %1858 = vrot.lane.b32.xlu1 %v1675_v49, %s4620_s9  ;;  %v1782_v49 = vshll.u32 %v4168_v32, 16  ;;  %v4176_v32 = vld [vmem:[%s4707_s5 + $0x18] sm:$0xe] }
 0x153   : > { %1856 = vrot.lane.b32.xlu0 %v1665_v53, %s4620_s9  ;;  %1854 = vrot.lane.b32.xlu2 %v1651_v59, %s4620_s9  ;;  %v1765_v53 = vor.u32 %v1764_v30, %v1760_v35  ;;  %v1723_v59 = vsel %vm4718_vm2, %v1718_v41, %v1722_v42  ;;  %v4222_v30 = vrot.slane %v4176_v32, 9  ;;  %v2050_v41 = vrot.slane %v4175_v33, 5  ;;  %v4180_v42 = vld [vmem:[%s4707_s5 + $0x28] sm:$0xf] }
 0x154   : > { %v1278_v2 = vpop.permute.xlu1 %1277  ;;  %v1784_v62 = vrot.slane %v1782_v49, 5  ;;  %v4181_v49 = vld [vmem:[%s4707_s5 + $0x2c] sm:$0x1] }
 0x155   : > { %1365 = vst.msk [vmem:[#allocation2 + $0x24] sm:$0xf] %vm1355_vm9, %v1278_v2  ;;  %v1276_v7 = vpop.permute.xlu0 %1275  ;;  %v1292_v13 = vpop.permute.xlu2 %1291  ;;  %v1766_v0 = vrot.slane %v1765_v53, 4  ;;  %v1770_v2 = vrot.slane %v1768_v54, 5  ;;  %v4178_v53 = vld [vmem:[%s4707_s5 + $0x20] sm:$0x1] }
 0x156   : > { %1364 = vst.msk [vmem:[#allocation2 + $0x20] sm:$0xf] %vm1355_vm9, %v1276_v7  ;;  %v1756_v7 = vrot.slane %v1755_v60, 4  ;;  %v1785_v11 = vsel %vm4718_vm2, %v1780_v61, %v1784_v62  ;;  %v1789_v17 = vor.u32 %v1788_v8, %v1784_v62  ;;  %v2064_v56 = vrot.slane %v4181_v49, 5  ;;  %v4183_v60 = vld [vmem:[%s4707_s5 + $0x34] sm:$0xf] }
 0x157   : > { %1372 = vst.msk [vmem:[#allocation2 + $0x40] sm:$0xf] %vm1355_vm9, %v1292_v13  ;;  %v1816_v13 = vshll.u32 %v4172_v3, 16  ;;  %v1771_v14 = vsel %vm4718_vm2, %v1766_v0, %v1770_v2  ;;  %v2056_v61 = vrot.slane %v2054_v38, 4  ;;  %v2057_v62 = vrot.slane %v4178_v53, 5 }
 0x158   : > { %v1790_v26 = vrot.slane %v1789_v17, 4  ;;  %v4185_v0 = vld [vmem:[%s4707_s5 + $0x3c] sm:$0xe]  ;;  %v4186_v2 = vld [vmem:[%s4707_s5 + $0x40] sm:$0xf]  ;;  %v2068_v3 = vrot.slane %v4183_v60, 5 }
 0x159   : > { %v2058_v5 = vsel %vm4893_vm6, %v2056_v61, %v2057_v62  ;;  %v2075_v8 = vrot.slane %v4186_v2, 5  ;;  %v2548_v60 = vshll.u32 %v4271_v50, 16 }
 0x15a   : > { %1864 = vrot.lane.b32.xlu1 %v1713_v16, %s4620_s9  ;;  %v1761_v16 = vsel %vm4718_vm2, %v1756_v7, %v1760_v35  ;;  %v4173_v35 = vld [vmem:[%s4707_s5 + $0xc] sm:$0xe]  ;;  %v4225_v7 = vrot.slane %v4185_v0, 9  ;;  %v2070_v10 = vrot.slane %v2068_v3, 4 }
 0x15b   : > { %1862 = vrot.lane.b32.xlu0 %v1699_v19, %s4620_s9  ;;  %1860 = vrot.lane.b32.xlu2 %v1689_v20, %s4620_s9  ;;  %v1814_v19 = vrot.slane %v1813_v12, 4  ;;  %v1818_v20 = vrot.slane %v1816_v13, 5  ;;  %v4221_v44 = vrot.slane %v4173_v35, 9  ;;  %v4189_v12 = vld [vmem:[%s4707_s5 + $0x4c] sm:$0xf]  ;;  %v2077_v32 = vrot.slane %v2075_v8, 4 }
 0x15c   : > { %v1284_v37 = vpop.permute.xlu1 %1283  ;;  %v2082_v17 = vrot.slane %v4189_v12, 5 }
 0x15d   : > { %1368 = vst.msk [vmem:[#allocation2 + $0x30] sm:$0xf] %vm1355_vm9, %v1284_v37  ;;  %v1282_v40 = vpop.permute.xlu0 %1281  ;;  %v1298_v47 = vpop.permute.xlu2 %1297  ;;  %v1819_v29 = vsel %vm4718_vm2, %v1814_v19, %v1818_v20  ;;  %v1795_v37 = vsel %vm4718_vm2, %v1790_v26, %v1794_v27  ;;  %v2048_v51 = vsel %vm4893_vm6, %v4221_v44, %v2047_v36  ;;  %v4190_v19 = vld [vmem:[%s4707_s5 + $0x50] sm:$0x1]  ;;  %v4188_v20 = vld [vmem:[%s4707_s5 + $0x48] sm:$0xe] }
 0x15e   : > { %1367 = vst.msk [vmem:[#allocation2 + $0x2c] sm:$0xf] %vm1355_vm9, %v1282_v40  ;;  %v2049_v40 = vrot.slane %v2047_v36, 4  ;;  %v2085_v24 = vrot.slane %v4190_v19, 5  ;;  %v4226_v27 = vrot.slane %v4188_v20, 9 }
 0x15f   : > { %1375 = vst.msk [vmem:[#allocation2 + $0x4c] sm:$0xf] %vm1355_vm9, %v1298_v47  ;;  %v2061_v47 = vrot.slane %v4180_v42, 5  ;;  %v4269_v36 = vld [vmem:[%s4707_s5 + $0x18] sm:$0xf] }
 0x160   : > { %v2051_v48 = vsel %vm4893_vm6, %v2049_v40, %v2050_v41  ;;  %v2529_v40 = vshrl.u32 %v4269_v36, 16  ;;  %v2532_v41 = vshll.u32 %v4269_v36, 16  ;;  %v4193_v42 = vld [vmem:[%s4707_s5 + $0x5c] sm:$0x1]  ;;  %v4191_v44 = vld [vmem:[%s4707_s5 + $0x54] sm:$0xe] }
 0x161   : > { %v2063_v54 = vrot.slane %v2061_v47, 4  ;;  %v2092_v49 = vrot.slane %v4193_v42, 5  ;;  %v4272_v20 = vld [vmem:[%s4707_s5 + $0x24] sm:$0xf]  ;;  %v4246_v42 = vld [vmem:[%s4707_s5 + $0x4c] sm:$0xf] }
 0x162   : > { %1870 = vrot.lane.b32.xlu1 %v1747_v45, %s4620_s9  ;;  %v2534_v53 = vrot.slane %v2532_v41, 5 }
 0x163   : > { %1868 = vrot.lane.b32.xlu0 %v1737_v46, %s4620_s9  ;;  %1866 = vrot.lane.b32.xlu2 %v1723_v59, %s4620_s9  ;;  %v2055_v46 = vsel %vm4893_vm6, %v4222_v30, %v2054_v38  ;;  %v2065_v52 = vsel %vm4893_vm6, %v2063_v54, %v2064_v56  ;;  %v2083_v38 = vsel %vm4893_vm6, %v4226_v27, %v2082_v17  ;;  %v4227_v56 = vrot.slane %v4191_v44, 9 }
 0x164   : > { %v1290_v55 = vpop.permute.xlu1 %1289 }
 0x165   : > { %1371 = vst.msk [vmem:[#allocation2 + $0x3c] sm:$0xf] %vm1355_vm9, %v1290_v55  ;;  %v1288_v6 = vpop.permute.xlu0 %1287  ;;  %v1304_v9 = vpop.permute.xlu2 %1303  ;;  %v2062_v55 = vsel %vm4893_vm6, %v4223_v58, %v2061_v47  ;;  %v4237_v58 = vld [vmem:[%s4707_s5 + $0x18] sm:$0xf] }
 0x166   : > { %1370 = vst.msk [vmem:[#allocation2 + $0x38] sm:$0xf] %vm1355_vm9, %v1288_v6  ;;  %v4182_v6 = vld [vmem:[%s4707_s5 + $0x30] sm:$0xe] }
 0x167   : > { %1378 = vst.msk [vmem:[#allocation2 + $0x58] sm:$0xf] %vm1355_vm9, %v1304_v9 }
 0x16a   : > { %1876 = vrot.lane.b32.xlu1 %v1785_v11, %s4620_s9  ;;  %v2071_v11 = vrot.slane %v4184_v4, 5  ;;  %v4318_v4 = vld [vmem:[%s4707_s5 + $0x1c] sm:$0xf] }
 0x16b   : > { %1874 = vrot.lane.b32.xlu0 %v1771_v14, %s4620_s9  ;;  %1872 = vrot.lane.b32.xlu2 %v1761_v16, %s4620_s9  ;;  %v4224_v14 = vrot.slane %v4182_v6, 9  ;;  %v2076_v16 = vsel %vm4893_vm6, %v4225_v7, %v2075_v8  ;;  %v3139_v8 = vrot.slane %v4318_v4, 5 }
 0x16c   : > { %v1296_v21 = vpop.permute.xlu1 %1295  ;;  %v2072_v18 = vsel %vm4893_vm6, %v2070_v10, %v2071_v11  ;;  %v4238_v10 = vld [vmem:[%s4707_s5 + $0x1c] sm:$0xf]  ;;  %v4317_v11 = vld [vmem:[%s4707_s5 + $0x18] sm:$0xe] }
 0x16d   : > { %1374 = vst.msk [vmem:[#allocation2 + $0x48] sm:$0xf] %vm1355_vm9, %v1296_v21  ;;  %v1294_v23 = vpop.permute.xlu0 %1293  ;;  %v1310_v28 = vpop.permute.xlu2 %1309  ;;  %v2069_v21 = vsel %vm4893_vm6, %v4224_v14, %v2068_v3 }
 0x16e   : > { %1373 = vst.msk [vmem:[#allocation2 + $0x44] sm:$0xf] %vm1355_vm9, %v1294_v23  ;;  %v2084_v23 = vrot.slane %v2082_v17, 4  ;;  %v4365_v17 = vrot.slane %v4317_v11, 9 }
 0x16f   : > { %1381 = vst.msk [vmem:[#allocation2 + $0x64] sm:$0xf] %vm1355_vm9, %v1310_v28  ;;  %v4192_v28 = vld [vmem:[%s4707_s5 + $0x58] sm:$0xf] }
 0x172   : > { %1882 = vrot.lane.b32.xlu1 %v1819_v29, %s4620_s9  ;;  %v4270_v29 = vld [vmem:[%s4707_s5 + $0x1c] sm:$0xf] }
 0x173   : > { %1880 = vrot.lane.b32.xlu0 %v1809_v31, %s4620_s9  ;;  %1878 = vrot.lane.b32.xlu2 %v1795_v37, %s4620_s9  ;;  %v2086_v37 = vsel %vm4893_vm6, %v2084_v23, %v2085_v24  ;;  %v2538_v35 = vshll.u32 %v4270_v29, 16  ;;  %v2542_v30 = vshrl.u32 %v4270_v29, 16  ;;  %v2553_v29 = vshrl.u32 %v4272_v20, 16 }
 0x174   : > { %v1302_v39 = vpop.permute.xlu1 %1301 }
 0x175   : > { %1377 = vst.msk [vmem:[#allocation2 + $0x54] sm:$0xf] %vm1355_vm9, %v1302_v39  ;;  %v1300_v43 = vpop.permute.xlu0 %1299  ;;  %v1316_v45 = vpop.permute.xlu2 %1315  ;;  %v2089_v39 = vrot.slane %v4192_v28, 5  ;;  %v3140_v28 = vsel %vm4893_vm6, %v4365_v17, %v3139_v8 }
 0x176   : > { %1376 = vst.msk [vmem:[#allocation2 + $0x50] sm:$0xf] %vm1355_vm9, %v1300_v43  ;;  %v2079_v43 = vsel %vm4893_vm6, %v2077_v32, %v2078_v34 }
 0x177   : > { %1384 = vst.msk [vmem:[#allocation2 + $0x70] sm:$0xf] %vm1355_vm9, %v1316_v45  ;;  %v2540_v45 = vrot.slane %v2538_v35, 5 }
 0x17a   : > { %2161 = vrot.lane.b32.xlu1 %v2055_v46, %s4621_s10  ;;  %v2544_v46 = vrot.slane %v2542_v30, 4 }
 0x17b   : > { %2159 = vrot.lane.b32.xlu0 %v2051_v48, %s4621_s10  ;;  %2157 = vrot.lane.b32.xlu2 %v2048_v51, %s4621_s10  ;;  %v2091_v48 = vrot.slane %v2089_v39, 4  ;;  %v2531_v51 = vrot.slane %v2529_v40, 4 }
 0x17c   : > { %v1308_v57 = vpop.permute.xlu1 %1307 }
 0x17d   : > { %1380 = vst.msk [vmem:[#allocation2 + $0x60] sm:$0xf] %vm1355_vm9, %v1308_v57  ;;  %v1306_v59 = vpop.permute.xlu0 %1305  ;;  %v1322_v63 = vpop.permute.xlu2 %1321  ;;  %v2093_v61 = vsel %vm4893_vm6, %v2091_v48, %v2092_v49  ;;  %v2535_v62 = vor.u32 %v2534_v53, %v2531_v51  ;;  %v4240_v49 = vld [vmem:[%s4707_s5 + $0x28] sm:$0xf] }
 0x17e   : > { %1379 = vst.msk [vmem:[#allocation2 + $0x5c] sm:$0xf] %vm1355_vm9, %v1306_v59  ;;  %v2545_v59 = vor.u32 %v2544_v46, %v2540_v45 }
 0x17f   : > { %1387 = vst.msk [vmem:[#allocation2 + $0x7c] sm:$0xf] %vm1355_vm9, %v1322_v63  ;;  %v2090_v63 = vsel %vm4893_vm6, %v4227_v56, %v2089_v39  ;;  %v2536_v2 = vrot.slane %v2535_v62, 4  ;;  %v2555_v39 = vrot.slane %v2553_v29, 4 }
 0x181   : > { %v2541_v7 = vsel %vm4718_vm2, %v2536_v2, %v2540_v45  ;;  %v4245_v45 = vld [vmem:[%s4707_s5 + $0x48] sm:$0xf]  ;;  %v4322_v2 = vld [vmem:[%s4707_s5 + $0x2c] sm:$0x1] }
 0x182   : > { %2167 = vrot.lane.b32.xlu1 %v2065_v52, %s4621_s10  ;;  %v2546_v52 = vrot.slane %v2545_v59, 4 }
 0x183   : > { %2165 = vrot.lane.b32.xlu0 %v2062_v55, %s4621_s10  ;;  %2163 = vrot.lane.b32.xlu2 %v2058_v5, %s4621_s10  ;;  %v2550_v55 = vrot.slane %v2548_v60, 5 }
 0x184   : > { %v1314_v9 = vpop.permute.xlu1 %1313 }
 0x185   : > { %1383 = vst.msk [vmem:[#allocation2 + $0x6c] sm:$0xf] %vm1355_vm9, %v1314_v9  ;;  %v1312_v13 = vpop.permute.xlu0 %1311  ;;  %v1825_v15 = vpop.permute.xlu2 %1824  ;;  %v2551_v6 = vsel %vm4718_vm2, %v2546_v52, %v2550_v55  ;;  %v4319_v9 = vld [vmem:[%s4707_s5 + $0x20] sm:$0x1] }
 0x186   : > { %1382 = vst.msk [vmem:[#allocation2 + $0x68] sm:$0xf] %vm1355_vm9, %v1312_v13  ;;  %v3141_v13 = vrot.slane %v3139_v8, 4  ;;  %v3142_v14 = vrot.slane %v4319_v9, 5  ;;  %v3149_v8 = vrot.slane %v4322_v2, 5 }
 0x187   : > { %1919 = vst.msk [vmem:[#allocation2 + $0x8] sm:$0xf] %vm1916_vm10, %v1825_v15  ;;  %v4281_v15 = vld [vmem:[%s4707_s5 + $0x48] sm:$0xf] }
 0x188   : > { %v2625_v22 = vshrl.u32 %v4281_v15, 16  ;;  %v2628_v23 = vshll.u32 %v4281_v15, 16  ;;  %v3143_v24 = vsel %vm4893_vm6, %v3141_v13, %v3142_v14 }
 0x18a   : > { %2173 = vrot.lane.b32.xlu1 %v2076_v16, %s4621_s10  ;;  %v2627_v32 = vrot.slane %v2625_v22, 4  ;;  %v2630_v34 = vrot.slane %v2628_v23, 5  ;;  %v4329_v23 = vld [vmem:[%s4707_s5 + $0x48] sm:$0xe] }
 0x18b   : > { %2171 = vrot.lane.b32.xlu0 %v2072_v18, %s4621_s10  ;;  %2169 = vrot.lane.b32.xlu2 %v2069_v21, %s4621_s10  ;;  %v4273_v18 = vld [vmem:[%s4707_s5 + $0x28] sm:$0xf]  ;;  %v4239_v21 = vld [vmem:[%s4707_s5 + $0x24] sm:$0xf] }
 0x18c   : > { %v1320_v26 = vpop.permute.xlu1 %1319  ;;  %v2566_v27 = vshrl.u32 %v4273_v18, 16 }
 0x18d   : > { %1386 = vst.msk [vmem:[#allocation2 + $0x78] sm:$0xf] %vm1355_vm9, %v1320_v26  ;;  %v1318_v31 = vpop.permute.xlu0 %1317  ;;  %v1831_v33 = vpop.permute.xlu2 %1830  ;;  %v2562_v26 = vshll.u32 %v4273_v18, 16  ;;  %v4197_v18 = vld [vmem:[%s4707_s5 + $0x6c] sm:$0xe] }
 0x18e   : > { %1385 = vst.msk [vmem:[#allocation2 + $0x74] sm:$0xf] %vm1355_vm9, %v1318_v31  ;;  %v2556_v31 = vshll.u32 %v4272_v20, 16  ;;  %v2568_v35 = vrot.slane %v2566_v27, 4 }
 0x18f   : > { %1922 = vst.msk [vmem:[#allocation2 + $0x14] sm:$0xf] %vm1916_vm10, %v1831_v33  ;;  %v4282_v33 = vld [vmem:[%s4707_s5 + $0x4c] sm:$0xf] }
 0x190   : > { %v2558_v40 = vrot.slane %v2556_v31, 5  ;;  %v2634_v44 = vshll.u32 %v4282_v33, 16  ;;  %v2638_v48 = vshrl.u32 %v4282_v33, 16  ;;  %v4293_v33 = vld [vmem:[%s4707_s5 + $0x78] sm:$0xf] }
 0x192   : > { %2179 = vrot.lane.b32.xlu1 %v2086_v37, %s4621_s10  ;;  %v2564_v37 = vrot.slane %v2562_v26, 5  ;;  %v2559_v50 = vor.u32 %v2558_v40, %v2555_v39  ;;  %v2636_v53 = vrot.slane %v2634_v44, 5  ;;  %v2721_v40 = vshrl.u32 %v4293_v33, 16  ;;  %v4295_v44 = vld [vmem:[%s4707_s5 + $0x80] sm:$0x1] }
 0x193   : > { %2177 = vrot.lane.b32.xlu0 %v2083_v38, %s4621_s10  ;;  %2175 = vrot.lane.b32.xlu2 %v2079_v43, %s4621_s10  ;;  %v4274_v38 = vld [vmem:[%s4707_s5 + $0x2c] sm:$0x1]  ;;  %v2631_v43 = vor.u32 %v2630_v34, %v2627_v32  ;;  %v4369_v32 = vrot.slane %v4329_v23, 9  ;;  %v4294_v34 = vld [vmem:[%s4707_s5 + $0x7c] sm:$0xf] }
 0x194   : > { %v1823_v47 = vpop.permute.xlu1 %1822  ;;  %v2569_v46 = vor.u32 %v2568_v35, %v2564_v37  ;;  %v2560_v60 = vrot.slane %v2559_v50, 4  ;;  %v2723_v50 = vrot.slane %v2721_v40, 4 }
 0x195   : > { %1918 = vst.msk [vmem:[#allocation2 + $0x4] sm:$0xf] %vm1916_vm10, %v1823_v47  ;;  %v1821_v54 = vpop.permute.xlu0 %1820  ;;  %v1837_v57 = vpop.permute.xlu2 %1836  ;;  %v2572_v47 = vshll.u32 %v4274_v38, 16  ;;  %v2632_v51 = vrot.slane %v2631_v43, 4  ;;  %v2734_v38 = vshrl.u32 %v4294_v34, 16 }
 0x196   : > { %1917 = vst.msk [vmem:[#allocation2] sm:$0xf] %vm1916_vm10, %v1821_v54  ;;  %v2570_v56 = vrot.slane %v2569_v46, 4  ;;  %v2565_v4 = vsel %vm4718_vm2, %v2560_v60, %v2564_v37  ;;  %v2740_v60 = vshll.u32 %v4295_v44, 16 }
 0x197   : > { %1925 = vst.msk [vmem:[#allocation2 + $0x20] sm:$0xf] %vm1916_vm10, %v1837_v57  ;;  %v2574_v57 = vrot.slane %v2572_v47, 5  ;;  %v2637_v52 = vsel %vm4718_vm2, %v2632_v51, %v2636_v53  ;;  %v2736_v46 = vrot.slane %v2734_v38, 4 }
 0x198   : > { %v2742_v2 = vrot.slane %v2740_v60, 5 }
 0x19a   : > { %2351 = vrot.lane.b32.xlu1 %v4237_v58, %s4622_s11  ;;  %v4321_v58 = vld [vmem:[%s4707_s5 + $0x28] sm:$0xf] }
 0x19b   : > { %2183 = vrot.lane.b32.xlu0 %v2093_v61, %s4621_s10  ;;  %2181 = vrot.lane.b32.xlu2 %v2090_v63, %s4621_s10  ;;  %v2640_v61 = vrot.slane %v2638_v48, 4  ;;  %v4283_v63 = vld [vmem:[%s4707_s5 + $0x50] sm:$0x1]  ;;  %v3146_v55 = vrot.slane %v4321_v58, 5  ;;  %v4342_v58 = vld [vmem:[%s4707_s5 + $0x7c] sm:$0xf] }
 0x19c   : > { %v1829_v0 = vpop.permute.xlu1 %1828 }
 0x19d   : > { %1921 = vst.msk [vmem:[#allocation2 + $0x10] sm:$0xf] %vm1916_vm10, %v1829_v0  ;;  %v1827_v3 = vpop.permute.xlu0 %1826  ;;  %v1843_v5 = vpop.permute.xlu2 %1842  ;;  %v2575_v0 = vsel %vm4718_vm2, %v2570_v56, %v2574_v57  ;;  %v4253_v56 = vld [vmem:[%s4707_s5 + $0x78] sm:$0xf] }
 0x19e   : > { %1920 = vst.msk [vmem:[#allocation2 + $0xc] sm:$0xf] %vm1916_vm10, %v1827_v3  ;;  %v4320_v3 = vld [vmem:[%s4707_s5 + $0x24] sm:$0xe]  ;;  %v4341_v57 = vld [vmem:[%s4707_s5 + $0x78] sm:$0xe] }
 0x19f   : > { %1928 = vst.msk [vmem:[#allocation2 + $0x2c] sm:$0xf] %vm1916_vm10, %v1843_v5  ;;  %v2641_v5 = vor.u32 %v2640_v61, %v2636_v53 }
 0x1a1   : > { %v2642_v13 = vrot.slane %v2641_v5, 4 }
 0x1a2   : > { %2914 = vrot.lane.b32.xlu1 %v2551_v6, %s4623_s12  ;;  %v2644_v6 = vshll.u32 %v4283_v63, 16  ;;  %v4373_v63 = vrot.slane %v4341_v57, 9 }
 0x1a3   : > { %2912 = vrot.lane.b32.xlu0 %v2541_v7, %s4623_s12  ;;  %2353 = vrot.lane.b32.xlu2 %v4238_v10, %s4622_s11  ;;  %v3148_v7 = vrot.slane %v3146_v55, 4  ;;  %v4366_v10 = vrot.slane %v4320_v3, 9  ;;  %v4275_v3 = vld [vmem:[%s4707_s5 + $0x30] sm:$0xf] }
 0x1a4   : > { %v1835_v12 = vpop.permute.xlu1 %1834  ;;  %v2646_v14 = vrot.slane %v2644_v6, 5 }
 0x1a5   : > { %1924 = vst.msk [vmem:[#allocation2 + $0x1c] sm:$0xf] %vm1916_vm10, %v1835_v12  ;;  %v1833_v16 = vpop.permute.xlu0 %1832  ;;  %v1849_v19 = vpop.permute.xlu2 %1848  ;;  %v4330_v12 = vld [vmem:[%s4707_s5 + $0x4c] sm:$0xf]  ;;  %v3147_v17 = vsel %vm4893_vm6, %v4366_v10, %v3146_v55 }
 0x1a6   : > { %1923 = vst.msk [vmem:[#allocation2 + $0x18] sm:$0xf] %vm1916_vm10, %v1833_v16  ;;  %v3150_v16 = vsel %vm4893_vm6, %v3148_v7, %v3149_v8  ;;  %v3167_v20 = vrot.slane %v4330_v12, 5  ;;  %v2647_v22 = vsel %vm4718_vm2, %v2642_v13, %v2646_v14  ;;  %v2577_v8 = vshrl.u32 %v4275_v3, 16  ;;  %v4343_v12 = vld [vmem:[%s4707_s5 + $0x80] sm:$0x1] }
 0x1a7   : > { %1931 = vst.msk [vmem:[#allocation2 + $0x38] sm:$0xf] %vm1916_vm10, %v1849_v19  ;;  %v4198_v19 = vld [vmem:[%s4707_s5 + $0x70] sm:$0xf] }
 0x1a8   : > { %v2103_v26 = vrot.slane %v4198_v19, 5  ;;  %v3168_v39 = vsel %vm4893_vm6, %v4369_v32, %v3167_v20  ;;  %v2579_v13 = vrot.slane %v2577_v8, 4 }
 0x1aa   : > { %2355 = vrot.lane.b32.xlu1 %v4239_v21, %s4622_s11  ;;  %v4331_v21 = vld [vmem:[%s4707_s5 + $0x50] sm:$0x1]  ;;  %v2105_v48 = vrot.slane %v2103_v26, 4 }
 0x1ab   : > { %3251 = vrot.lane.b32.xlu0 %v3143_v24, %s4624_s13  ;;  %3249 = vrot.lane.b32.xlu2 %v3140_v28, %s4624_s13  ;;  %v4229_v24 = vrot.slane %v4197_v18, 9  ;;  %v3169_v28 = vrot.slane %v3167_v20, 4  ;;  %v3170_v29 = vrot.slane %v4331_v21, 5  ;;  %v3198_v20 = vrot.slane %v4343_v12, 5  ;;  %v4284_v21 = vld [vmem:[%s4707_s5 + $0x54] sm:$0xf] }
 0x1ac   : > { %v1841_v36 = vpop.permute.xlu1 %1840  ;;  %v2652_v32 = vshll.u32 %v4284_v21, 16 }
 0x1ad   : > { %1927 = vst.msk [vmem:[#allocation2 + $0x28] sm:$0xf] %vm1916_vm10, %v1841_v36  ;;  %v1839_v30 = vpop.permute.xlu0 %1838  ;;  %v1855_v41 = vpop.permute.xlu2 %1854  ;;  %v2104_v37 = vsel %vm4893_vm6, %v4229_v24, %v2103_v26  ;;  %v3171_v35 = vsel %vm4893_vm6, %v3169_v28, %v3170_v29  ;;  %v4241_v29 = vld [vmem:[%s4707_s5 + $0x30] sm:$0xf] }
 0x1ae   : > { %1926 = vst.msk [vmem:[#allocation2 + $0x24] sm:$0xf] %vm1916_vm10, %v1839_v30  ;;  %v2730_v30 = vshll.u32 %v4294_v34, 16 }
 0x1af   : > { %1934 = vst.msk [vmem:[#allocation2 + $0x44] sm:$0xf] %vm1916_vm10, %v1855_v41  ;;  %v2724_v41 = vshll.u32 %v4293_v33, 16 }
 0x1b1   : > { %v2726_v51 = vrot.slane %v2724_v41, 5  ;;  %v2654_v41 = vrot.slane %v2652_v32, 5 }
 0x1b2   : > { %2369 = vrot.lane.b32.xlu1 %v4246_v42, %s4622_s11  ;;  %v4199_v42 = vld [vmem:[%s4707_s5 + $0x74] sm:$0x1] }
 0x1b3   : > { %2367 = vrot.lane.b32.xlu0 %v4245_v45, %s4622_s11  ;;  %2357 = vrot.lane.b32.xlu2 %v4240_v49, %s4622_s11  ;;  %v2732_v45 = vrot.slane %v2730_v30, 5  ;;  %v2106_v49 = vrot.slane %v4199_v42, 5 }
 0x1b4   : > { %v1847_v54 = vpop.permute.xlu1 %1846 }
 0x1b5   : > { %1930 = vst.msk [vmem:[#allocation2 + $0x34] sm:$0xf] %vm1916_vm10, %v1847_v54  ;;  %v1845_v59 = vpop.permute.xlu0 %1844  ;;  %v1861_v62 = vpop.permute.xlu2 %1860  ;;  %v4254_v54 = vld [vmem:[%s4707_s5 + $0x7c] sm:$0xf]  ;;  %v2107_v61 = vsel %vm4893_vm6, %v2105_v48, %v2106_v49  ;;  %v4248_v49 = vld [vmem:[%s4707_s5 + $0x58] sm:$0xf] }
 0x1b6   : > { %1929 = vst.msk [vmem:[#allocation2 + $0x30] sm:$0xf] %vm1916_vm10, %v1845_v59  ;;  %v2737_v59 = vor.u32 %v2736_v46, %v2732_v45 }
 0x1b7   : > { %1937 = vst.msk [vmem:[#allocation2 + $0x50] sm:$0xf] %vm1916_vm10, %v1861_v62  ;;  %v2727_v62 = vor.u32 %v2726_v51, %v2723_v50  ;;  %v4247_v51 = vld [vmem:[%s4707_s5 + $0x54] sm:$0xf] }
 0x1b9   : > { %v2728_v5 = vrot.slane %v2727_v62, 4 }
 0x1ba   : > { %2928 = vrot.lane.b32.xlu1 %v2637_v52, %s4623_s12  ;;  %v3195_v52 = vrot.slane %v4342_v58, 5 }
 0x1bb   : > { %2918 = vrot.lane.b32.xlu0 %v2575_v0, %s4623_s12  ;;  %2916 = vrot.lane.b32.xlu2 %v2565_v4, %s4623_s12  ;;  %v2738_v0 = vrot.slane %v2737_v59, 4 }
 0x1bc   : > { %v1853_v9 = vpop.permute.xlu1 %1852  ;;  %v3196_v7 = vsel %vm4893_vm6, %v4373_v63, %v3195_v52  ;;  %v3197_v19 = vrot.slane %v3195_v52, 4 }
 0x1bd   : > { %1933 = vst.msk [vmem:[#allocation2 + $0x40] sm:$0xf] %vm1916_vm10, %v1853_v9  ;;  %v1851_v11 = vpop.permute.xlu0 %1850  ;;  %v1867_v15 = vpop.permute.xlu2 %1866  ;;  %v2580_v9 = vshll.u32 %v4275_v3, 16  ;;  %v2743_v10 = vsel %vm4718_vm2, %v2738_v0, %v2742_v2  ;;  %v4332_v2 = vld [vmem:[%s4707_s5 + $0x54] sm:$0xe] }
 0x1be   : > { %1932 = vst.msk [vmem:[#allocation2 + $0x3c] sm:$0xf] %vm1916_vm10, %v1851_v11  ;;  %v2733_v11 = vsel %vm4718_vm2, %v2728_v5, %v2732_v45  ;;  %v4277_v45 = vld [vmem:[%s4707_s5 + $0x38] sm:$0x1]  ;;  %v4370_v8 = vrot.slane %v4332_v2, 9 }
 0x1bf   : > { %1940 = vst.msk [vmem:[#allocation2 + $0x5c] sm:$0xf] %vm1916_vm10, %v1867_v15  ;;  %v2582_v14 = vrot.slane %v2580_v9, 5  ;;  %v4333_v3 = vld [vmem:[%s4707_s5 + $0x58] sm:$0xf] }
 0x1c0   : > { %v4325_v5 = vld [vmem:[%s4707_s5 + $0x38] sm:$0x1]  ;;  %v3174_v9 = vrot.slane %v4333_v3, 5 }
 0x1c1   : > { %v2583_v24 = vor.u32 %v2582_v14, %v2579_v13  ;;  %v3156_v12 = vrot.slane %v4325_v5, 5  ;;  %v4201_v13 = vld [vmem:[%s4707_s5 + $0x7c] sm:$0xf] }
 0x1c2   : > { %3255 = vrot.lane.b32.xlu1 %v3150_v16, %s4624_s13  ;;  %v4276_v16 = vld [vmem:[%s4707_s5 + $0x34] sm:$0xf] }
 0x1c3   : > { %3253 = vrot.lane.b32.xlu0 %v3147_v17, %s4624_s13  ;;  %2930 = vrot.lane.b32.xlu2 %v2647_v22, %s4623_s12  ;;  %v4285_v17 = vld [vmem:[%s4707_s5 + $0x58] sm:$0xf]  ;;  %v4242_v22 = vld [vmem:[%s4707_s5 + $0x34] sm:$0xf]  ;;  %v2586_v26 = vshll.u32 %v4276_v16, 16  ;;  %v2590_v34 = vshrl.u32 %v4276_v16, 16 }
 0x1c4   : > { %v1859_v27 = vpop.permute.xlu1 %1858  ;;  %v2662_v28 = vshrl.u32 %v4285_v17, 16  ;;  %v2584_v33 = vrot.slane %v2583_v24, 4 }
 0x1c5   : > { %1936 = vst.msk [vmem:[#allocation2 + $0x4c] sm:$0xf] %vm1916_vm10, %v1859_v27  ;;  %v1857_v31 = vpop.permute.xlu0 %1856  ;;  %v1873_v36 = vpop.permute.xlu2 %1872  ;;  %v2658_v27 = vshll.u32 %v4285_v17, 16  ;;  %v3175_v17 = vsel %vm4893_vm6, %v4370_v8, %v3174_v9  ;;  %v4298_v8 = vld [vmem:[%s4707_s5 + $0x8c] sm:$0x1] }
 0x1c6   : > { %1935 = vst.msk [vmem:[#allocation2 + $0x48] sm:$0xf] %vm1916_vm10, %v1857_v31  ;;  %v2649_v31 = vshrl.u32 %v4284_v21, 16  ;;  %v2664_v30 = vrot.slane %v2662_v28, 4  ;;  %v3414_v21 = vld [vmem:[%s6455_s1 + $0x10] sm:$0x3] }
 0x1c7   : > { %1943 = vst.msk [vmem:[#allocation2 + $0x68] sm:$0xf] %vm1916_vm10, %v1873_v36  ;;  %v3199_v36 = vsel %vm4893_vm6, %v3197_v19, %v3198_v20  ;;  %v4202_v20 = vld [vmem:[%s4707_s5 + $0x80] sm:$0x1]  ;;  %v3504_v24 = vunpack.c.l.b16 %v3414_v21 }
 0x1c8   : > { %v2651_v40 = vrot.slane %v2649_v31, 4  ;;  %v2113_v28 = vrot.slane %v4202_v20, 5 }
 0x1ca   : > { %2189 = vrot.lane.b32.xlu1 %v2104_v37, %s4621_s10  ;;  %v2588_v37 = vrot.slane %v2586_v26, 5  ;;  %v2655_v50 = vor.u32 %v2654_v41, %v2651_v40  ;;  %v4334_v26 = vld [vmem:[%s4707_s5 + $0x5c] sm:$0x1] }
 0x1cb   : > { %3267 = vrot.lane.b32.xlu0 %v3171_v35, %s4624_s13  ;;  %3265 = vrot.lane.b32.xlu2 %v3168_v39, %s4624_s13  ;;  %v2660_v35 = vrot.slane %v2658_v27, 5  ;;  %v4286_v39 = vld [vmem:[%s4707_s5 + $0x5c] sm:$0x1] }
 0x1cc   : > { %v1865_v43 = vpop.permute.xlu1 %1864  ;;  %v2589_v46 = vsel %vm4718_vm2, %v2584_v33, %v2588_v37  ;;  %v2668_v48 = vshll.u32 %v4286_v39, 16  ;;  %v2656_v59 = vrot.slane %v2655_v50, 4  ;;  %v3176_v33 = vrot.slane %v3174_v9, 4 }
 0x1cd   : > { %1939 = vst.msk [vmem:[#allocation2 + $0x58] sm:$0xf] %vm1916_vm10, %v1865_v43  ;;  %v1863_v47 = vpop.permute.xlu0 %1862  ;;  %v1879_v53 = vpop.permute.xlu2 %1878  ;;  %v2592_v43 = vrot.slane %v2590_v34, 4  ;;  %v4210_v34 = vld [vmem:[%s4707_s5 + $0xa0] sm:$0xf] }
 0x1ce   : > { %1938 = vst.msk [vmem:[#allocation2 + $0x54] sm:$0xf] %vm1916_vm10, %v1863_v47  ;;  %v2665_v47 = vor.u32 %v2664_v30, %v2660_v35  ;;  %v2670_v57 = vrot.slane %v2668_v48, 5  ;;  %v2661_v0 = vsel %vm4718_vm2, %v2656_v59, %v2660_v35  ;;  %v2131_v41 = vrot.slane %v4210_v34, 5  ;;  %v4307_v34 = vld [vmem:[%s4707_s5 + $0xb0] sm:$0x1] }
 0x1cf   : > { %1946 = vst.msk [vmem:[#allocation2 + $0x74] sm:$0xf] %vm1916_vm10, %v1879_v53  ;;  %v2593_v53 = vor.u32 %v2592_v43, %v2588_v37  ;;  %v3177_v37 = vrot.slane %v4334_v26, 5 }
 0x1d1   : > { %v2594_v62 = vrot.slane %v2593_v53, 4  ;;  %v3178_v43 = vsel %vm4893_vm6, %v3176_v33, %v3177_v37  ;;  %v4297_v53 = vld [vmem:[%s4707_s5 + $0x88] sm:$0xf] }
 0x1d2   : > { %2385 = vrot.lane.b32.xlu1 %v4254_v54, %s4622_s11  ;;  %v2596_v54 = vshll.u32 %v4277_v45, 16  ;;  %v4490_v45 = vld [vmem:[%s6455_s1] sm:$0xff] }
 0x1d3   : > { %2383 = vrot.lane.b32.xlu0 %v4253_v56, %s4622_s11  ;;  %2191 = vrot.lane.b32.xlu2 %v2107_v61, %s4621_s10  ;;  %v2666_v56 = vrot.slane %v2665_v47, 4  ;;  %v4324_v61 = vld [vmem:[%s4707_s5 + $0x34] sm:$0xf]  ;;  %v2133_v47 = vrot.slane %v2131_v41, 4 }
 0x1d4   : > { %v1871_v55 = vpop.permute.xlu1 %1870  ;;  %v2598_v63 = vrot.slane %v2596_v54, 5 }
 0x1d5   : > { %1942 = vst.msk [vmem:[#allocation2 + $0x64] sm:$0xf] %vm1916_vm10, %v1871_v55  ;;  %v1869_v4 = vpop.permute.xlu0 %1868  ;;  %v2158_v6 = vpop.permute.xlu2 %2157  ;;  %v2671_v55 = vsel %vm4718_vm2, %v2666_v56, %v2670_v57  ;;  %v4296_v56 = vld [vmem:[%s4707_s5 + $0x84] sm:$0xf] }
 0x1d6   : > { %1941 = vst.msk [vmem:[#allocation2 + $0x60] sm:$0xf] %vm1916_vm10, %v1869_v4  ;;  %v3153_v4 = vrot.slane %v4324_v61, 5  ;;  %v4255_v57 = vld [vmem:[%s4707_s5 + $0x84] sm:$0xf]  ;;  %v2754_v61 = vshll.u32 %v4297_v53, 16 }
 0x1d7   : > { %2254 = vst.msk [vmem:[#allocation2] sm:$0xf] %vm2253_vm11, %v2158_v6  ;;  %v2599_v6 = vsel %vm4718_vm2, %v2594_v62, %v2598_v63  ;;  %v2758_v62 = vshrl.u32 %v4297_v53, 16 }
 0x1d8   : > { %v2756_v5 = vrot.slane %v2754_v61, 5  ;;  %v4287_v61 = vld [vmem:[%s4707_s5 + $0x60] sm:$0xf] }
 0x1da   : > { %3281 = vrot.lane.b32.xlu1 %v3196_v7, %s4624_s13  ;;  %v4323_v7 = vld [vmem:[%s4707_s5 + $0x30] sm:$0xe] }
 0x1db   : > { %2946 = vrot.lane.b32.xlu0 %v2743_v10, %s4623_s12  ;;  %2944 = vrot.lane.b32.xlu2 %v2733_v11, %s4623_s12  ;;  %v3155_v11 = vrot.slane %v3153_v4, 4 }
 0x1dc   : > { %v1877_v15 = vpop.permute.xlu1 %1876 }
 0x1dd   : > { %1945 = vst.msk [vmem:[#allocation2 + $0x70] sm:$0xf] %vm1916_vm10, %v1877_v15  ;;  %v1875_v18 = vpop.permute.xlu0 %1874  ;;  %v2164_v23 = vpop.permute.xlu2 %2163  ;;  %v4367_v15 = vrot.slane %v4323_v7, 9  ;;  %v3157_v19 = vsel %vm4893_vm6, %v3155_v11, %v3156_v12  ;;  %v4262_v12 = vld [vmem:[%s4707_s5 + $0xac] sm:$0xf] }
 0x1de   : > { %1944 = vst.msk [vmem:[#allocation2 + $0x6c] sm:$0xf] %vm1916_vm10, %v1875_v18  ;;  %v2110_v18 = vrot.slane %v4201_v13, 5 }
 0x1df   : > { %2257 = vst.msk [vmem:[#allocation2 + $0xc] sm:$0xf] %vm2253_vm11, %v2164_v23  ;;  %v3154_v23 = vsel %vm4893_vm6, %v4367_v15, %v3153_v4  ;;  %v4306_v4 = vld [vmem:[%s4707_s5 + $0xac] sm:$0xf]  ;;  %v4261_v15 = vld [vmem:[%s4707_s5 + $0xa8] sm:$0xf] }
 0x1e0   : > { %v2112_v27 = vrot.slane %v2110_v18, 4 }
 0x1e2   : > { %2361 = vrot.lane.b32.xlu1 %v4242_v22, %s4622_s11  ;;  %v4200_v22 = vld [vmem:[%s4707_s5 + $0x78] sm:$0xe]  ;;  %v2114_v39 = vsel %vm4893_vm6, %v2112_v27, %v2113_v28  ;;  %v4345_v27 = vld [vmem:[%s4707_s5 + $0x88] sm:$0xf] }
 0x1e3   : > { %2359 = vrot.lane.b32.xlu0 %v4241_v29, %s4622_s11  ;;  %3283 = vrot.lane.b32.xlu2 %v3199_v36, %s4624_s13  ;;  %v3507_v29 = vpack.c.b16 %v3504_v24, %v3504_v24  ;;  %v4230_v32 = vrot.slane %v4200_v22, 9  ;;  %v3202_v33 = vrot.slane %v4345_v27, 5  ;;  %v4249_v27 = vld [vmem:[%s4707_s5 + $0x60] sm:$0xf] }
 0x1e4   : > { %v1883_v38 = vpop.permute.xlu1 %1882 }
 0x1e5   : > { %1948 = vst.msk [vmem:[#allocation2 + $0x7c] sm:$0xf] %vm1916_vm10, %v1883_v38  ;;  %v1881_v42 = vpop.permute.xlu0 %1880  ;;  %v2170_v44 = vpop.permute.xlu2 %2169  ;;  %v3561_v35 = vsel %vm3559_vm12, %v3507_v29, 0  ;;  %v4491_v38 = vld [vmem:[%s6455_s1 + $0x8] sm:$0xff]  ;;  %v2111_v40 = vsel %vm4893_vm6, %v4230_v32, %v2110_v18  ;;  %v2830_v18 = vshrl.u32 %v4306_v4, 16 }
 0x1e6   : > { %1947 = vst.msk [vmem:[#allocation2 + $0x78] sm:$0xf] %vm1916_vm10, %v1881_v42  ;;  %3568 = vmatpush.bf16.msra.mxu0 %v3561_v35  ;;  %4493 = vmatpush.bf16.msra.mxu1 %v3561_v35  ;;  %v4211_v42 = vld [vmem:[%s4707_s5 + $0xa4] sm:$0x1] }
 0x1e7   : > { %2260 = vst.msk [vmem:[#allocation2 + $0x18] sm:$0xf] %vm2253_vm11, %v2170_v44  ;;  %4494 = vmatpush.bf16.msra.mxu2 %v3561_v35  ;;  %4495 = vmatpush.bf16.msra.mxu3 %v3561_v35  ;;  %v4209_v44 = vld [vmem:[%s4707_s5 + $0x9c] sm:$0xe]  ;;  %v2134_v48 = vrot.slane %v4211_v42, 5 }
 0x1e8   : > { %v4346_v35 = vld [vmem:[%s4707_s5 + $0x8c] sm:$0x1] }
 0x1e9   : > { %v3205_v42 = vrot.slane %v4346_v35, 5 }
 0x1ea   : > { %2920 = vrot.lane.b32.xlu1 %v2589_v46, %s4623_s12  ;;  %3569 = vmatpush.bf16.msra.mxu0 %v4491_v38 }
 0x1eb   : > { %2373 = vrot.lane.b32.xlu0 %v4248_v49, %s4622_s11  ;;  %2371 = vrot.lane.b32.xlu2 %v4247_v51, %s4622_s11  ;;  %v4305_v49 = vld [vmem:[%s4707_s5 + $0xa8] sm:$0xf]  ;;  %v4233_v51 = vrot.slane %v4209_v44, 9 }
 0x1ec   : > { %v2162_v58 = vpop.permute.xlu1 %2161  ;;  %4496 = vmatpush.bf16.msra.mxu1 %v4491_v38  ;;  %4497 = vmatpush.bf16.msra.mxu2 %v4491_v38  ;;  %v2820_v59 = vshll.u32 %v4305_v49, 16 }
 0x1ed   : > { %2256 = vst.msk [vmem:[#allocation2 + $0x8] sm:$0xf] %vm2253_vm11, %v2162_v58  ;;  %v2160_v60 = vpop.permute.xlu0 %2159  ;;  %v2176_v52 = vpop.permute.xlu2 %2175  ;;  %4498 = vmatpush.bf16.msra.mxu3 %v4491_v38  ;;  %v2817_v58 = vshrl.u32 %v4305_v49, 16  ;;  %v2132_v63 = vsel %vm4893_vm6, %v4233_v51, %v2131_v41  ;;  %v3204_v41 = vrot.slane %v3202_v33, 4 }
 0x1ee   : > { %2255 = vst.msk [vmem:[#allocation2 + $0x4] sm:$0xf] %vm2253_vm11, %v2160_v60  ;;  %3570 = vmatpush.bf16.msra.mxu0 %v4490_v45  ;;  %v2135_v60 = vsel %vm4893_vm6, %v2133_v47, %v2134_v48  ;;  %v2822_v2 = vrot.slane %v2820_v59, 5 }
 0x1ef   : > { %2263 = vst.msk [vmem:[#allocation2 + $0x24] sm:$0xf] %vm2253_vm11, %v2176_v52  ;;  %v2745_v52 = vshrl.u32 %v4296_v56, 16 }
 0x1f0   : > { %4499 = vmatpush.bf16.msra.mxu1 %v4490_v45  ;;  %4500 = vmatpush.bf16.msra.mxu2 %v4490_v45 }
 0x1f1   : > { %4501 = vmatpush.bf16.msra.mxu3 %v4490_v45  ;;  %v2747_v9 = vrot.slane %v2745_v52, 4 }
 0x1f2   : > { %2934 = vrot.lane.b32.xlu1 %v2671_v55, %s4623_s12  ;;  %v2748_v55 = vshll.u32 %v4296_v56, 16 }
 0x1f3   : > { %2932 = vrot.lane.b32.xlu0 %v2661_v0, %s4623_s12  ;;  %2922 = vrot.lane.b32.xlu2 %v2599_v6, %s4623_s12  ;;  %v2819_v0 = vrot.slane %v2817_v58, 4  ;;  %v2760_v6 = vrot.slane %v2758_v62, 4 }
 0x1f4   : > { %v2168_v10 = vpop.permute.xlu1 %2167 }
 0x1f5   : > { %2259 = vst.msk [vmem:[#allocation2 + $0x14] sm:$0xf] %vm2253_vm11, %v2168_v10  ;;  %v2166_v14 = vpop.permute.xlu0 %2165  ;;  %v2182_v16 = vpop.permute.xlu2 %2181  ;;  %v2750_v10 = vrot.slane %v2748_v55, 5  ;;  %v2823_v13 = vor.u32 %v2822_v2, %v2819_v0  ;;  %v4279_v55 = vld [vmem:[%s4707_s5 + $0x40] sm:$0xf] }
 0x1f6   : > { %2258 = vst.msk [vmem:[#allocation2 + $0x10] sm:$0xf] %vm2253_vm11, %v2166_v14  ;;  %v2826_v14 = vshll.u32 %v4306_v4, 16  ;;  %v4278_v2 = vld [vmem:[%s4707_s5 + $0x3c] sm:$0xf]  ;;  %v2673_v4 = vshrl.u32 %v4287_v61, 16 }
 0x1f7   : > { %2266 = vst.msk [vmem:[#allocation2 + $0x30] sm:$0xf] %vm2253_vm11, %v2182_v16  ;;  %v2761_v16 = vor.u32 %v2760_v6, %v2756_v5  ;;  %v2751_v20 = vor.u32 %v2750_v10, %v2747_v9  ;;  %v2824_v21 = vrot.slane %v2823_v13, 4  ;;  %v2601_v10 = vshrl.u32 %v4278_v2, 16 }
 0x1f8   : > { %v2828_v22 = vrot.slane %v2826_v14, 5 }
 0x1f9   : > { %v2762_v24 = vrot.slane %v2761_v16, 4  ;;  %v2752_v29 = vrot.slane %v2751_v20, 4  ;;  %v2603_v20 = vrot.slane %v2601_v10, 4 }
 0x1fa   : > { %3269 = vrot.lane.b32.xlu1 %v3175_v17, %s4624_s13  ;;  %v2764_v17 = vshll.u32 %v4298_v8, 16  ;;  %v2614_v8 = vshrl.u32 %v4279_v55, 16 }
 0x1fb   : > { %3259 = vrot.lane.b32.xlu0 %v3157_v19, %s4624_s13  ;;  %3257 = vrot.lane.b32.xlu2 %v3154_v23, %s4624_s13  ;;  %v4256_v19 = vld [vmem:[%s4707_s5 + $0x88] sm:$0xf]  ;;  %v2757_v38 = vsel %vm4718_vm2, %v2752_v29, %v2756_v5  ;;  %v2676_v5 = vshll.u32 %v4287_v61, 16 }
 0x1fc   : > { %v2174_v31 = vpop.permute.xlu1 %2173  ;;  %v2766_v26 = vrot.slane %v2764_v17, 5  ;;  %v2616_v17 = vrot.slane %v2614_v8, 4 }
 0x1fd   : > { %2262 = vst.msk [vmem:[#allocation2 + $0x20] sm:$0xf] %vm2253_vm11, %v2174_v31  ;;  %v2172_v36 = vpop.permute.xlu0 %2171  ;;  %v2354_v30 = vpop.permute.xlu2 %2353  ;;  %v2832_v31 = vrot.slane %v2830_v18, 4  ;;  %v2678_v13 = vrot.slane %v2676_v5, 5 }
 0x1fe   : > { %2261 = vst.msk [vmem:[#allocation2 + $0x1c] sm:$0xf] %vm2253_vm11, %v2172_v36  ;;  %v2829_v36 = vsel %vm4718_vm2, %v2824_v21, %v2828_v22  ;;  %v2767_v37 = vsel %vm4718_vm2, %v2762_v24, %v2766_v26 }
 0x1ff   : > { %2449 = vst.msk [vmem:[#allocation2 + $0x4] sm:$0xf] %vm2447_vm13, %v2354_v30  ;;  %v4344_v30 = vld [vmem:[%s4707_s5 + $0x84] sm:$0xe] }
 0x200   : > { %v4374_v44 = vrot.slane %v4344_v30, 9 }
 0x202   : > { %2195 = vrot.lane.b32.xlu1 %v2114_v39, %s4621_s10  ;;  %v2833_v39 = vor.u32 %v2832_v31, %v2828_v22  ;;  %v3203_v51 = vsel %vm4893_vm6, %v4374_v44, %v3202_v33 }
 0x203   : > { %2193 = vrot.lane.b32.xlu0 %v2111_v40, %s4621_s10  ;;  %3271 = vrot.lane.b32.xlu2 %v3178_v43, %s4624_s13  ;;  %v2836_v40 = vshll.u32 %v4307_v34, 16 }
 0x204   : > { %v2180_v46 = vpop.permute.xlu1 %2179  ;;  %v2834_v47 = vrot.slane %v2833_v39, 4 }
 0x205   : > { %2265 = vst.msk [vmem:[#allocation2 + $0x2c] sm:$0xf] %vm2253_vm11, %v2180_v46  ;;  %v2178_v50 = vpop.permute.xlu0 %2177  ;;  %v3250_v54 = vpop.permute.xlu2 %3249  ;;  %v4354_v46 = vld [vmem:[%s4707_s5 + $0xac] sm:$0xf]  ;;  %v2838_v48 = vrot.slane %v2836_v40, 5 }
 0x206   : > { %2264 = vst.msk [vmem:[#allocation2 + $0x28] sm:$0xf] %vm2253_vm11, %v2178_v50  ;;  %v3206_v50 = vsel %vm4893_vm6, %v3204_v41, %v3205_v42  ;;  %v3223_v53 = vrot.slane %v4354_v46, 5 }
 0x207   : > { %v2839_v56 = vsel %vm4718_vm2, %v2834_v47, %v2838_v48  ;;  %v4328_v47 = vld [vmem:[%s4707_s5 + $0x44] sm:$0x1]  ;;  %v4326_v48 = vld [vmem:[%s4707_s5 + $0x3c] sm:$0xe] }
 0x208   : > { %v3225_v59 = vrot.slane %v3223_v53, 4 }
 0x20a   : > { %2387 = vrot.lane.b32.xlu1 %v4255_v57, %s4622_s11  ;;  %v4353_v57 = vld [vmem:[%s4707_s5 + $0xa8] sm:$0xe] }
 0x20b   : > { %2207 = vrot.lane.b32.xlu0 %v2135_v60, %s4621_s10  ;;  %2205 = vrot.lane.b32.xlu2 %v2132_v63, %s4621_s10  ;;  %v4377_v52 = vrot.slane %v4353_v57, 9  ;;  %v4368_v57 = vrot.slane %v4326_v48, 9 }
 0x20c   : > { %v2352_v3 = vpop.permute.xlu1 %2351 }
 0x20d   : > { %2448 = vst.msk [vmem:[#allocation2] sm:$0xf] %vm2447_vm13, %v2352_v3  ;;  %v2184_v7 = vpop.permute.xlu0 %2183  ;;  %v2358_v11 = vpop.permute.xlu2 %2357  ;;  %v4243_v3 = vld [vmem:[%s4707_s5 + $0x3c] sm:$0xf]  ;;  %v3224_v9 = vsel %vm4893_vm6, %v4377_v52, %v3223_v53 }
 0x20e   : > { %2267 = vst.msk [vmem:[#allocation2 + $0x34] sm:$0xf] %vm2253_vm11, %v2184_v7  ;;  %v2610_v7 = vshll.u32 %v4279_v55, 16 }
 0x20f   : > { %2451 = vst.msk [vmem:[#allocation2 + $0xc] sm:$0xf] %vm2447_vm13, %v2358_v11  ;;  %v2604_v11 = vshll.u32 %v4278_v2, 16  ;;  %v4204_v2 = vld [vmem:[%s4707_s5 + $0x88] sm:$0xf] }
 0x210   : > { %v2612_v16 = vrot.slane %v2610_v7, 5  ;;  %v2117_v8 = vrot.slane %v4204_v2, 5 }
 0x211   : > { %v2606_v21 = vrot.slane %v2604_v11, 5 }
 0x212   : > { %2401 = vrot.lane.b32.xlu1 %v4262_v12, %s4622_s11  ;;  %v2675_v12 = vrot.slane %v2673_v4, 4  ;;  %v4337_v4 = vld [vmem:[%s4707_s5 + $0x68] sm:$0x1] }
 0x213   : > { %2399 = vrot.lane.b32.xlu0 %v4261_v15, %s4622_s11  ;;  %2389 = vrot.lane.b32.xlu2 %v4256_v19, %s4622_s11  ;;  %v4288_v15 = vld [vmem:[%s4707_s5 + $0x64] sm:$0xf]  ;;  %v2607_v34 = vor.u32 %v2606_v21, %v2603_v20  ;;  %v3184_v11 = vrot.slane %v4337_v4, 5  ;;  %v4214_v20 = vld [vmem:[%s4707_s5 + $0xb0] sm:$0x1] }
 0x214   : > { %v2915_v23 = vpop.permute.xlu1 %2914  ;;  %v4280_v19 = vld [vmem:[%s4707_s5 + $0x44] sm:$0x1]  ;;  %v2679_v24 = vor.u32 %v2678_v13, %v2675_v12  ;;  %v2682_v26 = vshll.u32 %v4288_v15, 16  ;;  %v2686_v31 = vshrl.u32 %v4288_v15, 16  ;;  %v4213_v12 = vld [vmem:[%s4707_s5 + $0xac] sm:$0xf] }
 0x215   : > { %3010 = vst.msk [vmem:[#allocation2 + $0x4] sm:$0xf] %vm3008_vm14, %v2915_v23  ;;  %v2913_v28 = vpop.permute.xlu0 %2912  ;;  %v2917_v32 = vpop.permute.xlu2 %2916  ;;  %v4250_v23 = vld [vmem:[%s4707_s5 + $0x64] sm:$0xf]  ;;  %v2620_v29 = vshll.u32 %v4280_v19, 16  ;;  %v2608_v40 = vrot.slane %v2607_v34, 4 }
 0x216   : > { %3009 = vst.msk [vmem:[#allocation2] sm:$0xf] %vm3008_vm14, %v2913_v28  ;;  %v2617_v28 = vor.u32 %v2616_v17, %v2612_v16  ;;  %v2684_v33 = vrot.slane %v2682_v26, 5  ;;  %v2688_v41 = vrot.slane %v2686_v31, 4  ;;  %v4212_v21 = vld [vmem:[%s4707_s5 + $0xa8] sm:$0xe] }
 0x217   : > { %3346 = vst.msk [vmem:[#allocation2] sm:$0xf] %vm3345_vm15, %v3250_v54  ;;  %v4355_v54 = vld [vmem:[%s4707_s5 + $0xb0] sm:$0x1]  ;;  %v2622_v30 = vrot.slane %v2620_v29, 5  ;;  %v2141_v26 = vrot.slane %v4214_v20, 5 }
 0x218   : > { %v3226_v60 = vrot.slane %v4355_v54, 5  ;;  %v2618_v35 = vrot.slane %v2617_v28, 4  ;;  %v3163_v54 = vrot.slane %v4328_v47, 5  ;;  %v4234_v28 = vrot.slane %v4212_v21, 9  ;;  %v4300_v29 = vld [vmem:[%s4707_s5 + $0x94] sm:$0xf] }
 0x21a   : > { %2960 = vrot.lane.b32.xlu1 %v2829_v36, %s4623_s12  ;;  %v3227_v6 = vsel %vm4893_vm6, %v3225_v59, %v3226_v60  ;;  %v2680_v36 = vrot.slane %v2679_v24, 4  ;;  %v2623_v46 = vsel %vm4718_vm2, %v2618_v35, %v2622_v30  ;;  %v2778_v35 = vshll.u32 %v4300_v29, 16 }
 0x21b   : > { %2950 = vrot.lane.b32.xlu0 %v2767_v37, %s4623_s12  ;;  %2948 = vrot.lane.b32.xlu2 %v2757_v38, %s4623_s12  ;;  %v4327_v38 = vld [vmem:[%s4707_s5 + $0x40] sm:$0xf]  ;;  %v2782_v30 = vshrl.u32 %v4300_v29, 16 }
 0x21c   : > { %v2356_v43 = vpop.permute.xlu1 %2355  ;;  %v2685_v44 = vsel %vm4718_vm2, %v2680_v36, %v2684_v33  ;;  %v4299_v36 = vld [vmem:[%s4707_s5 + $0x90] sm:$0xf] }
 0x21d   : > { %2450 = vst.msk [vmem:[#allocation2 + $0x8] sm:$0xf] %vm2447_vm13, %v2356_v43  ;;  %v3252_v45 = vpop.permute.xlu0 %3251  ;;  %v2931_v49 = vpop.permute.xlu2 %2930  ;;  %v4289_v43 = vld [vmem:[%s4707_s5 + $0x68] sm:$0x1] }
 0x21e   : > { %3347 = vst.msk [vmem:[#allocation2 + $0x4] sm:$0xf] %vm3345_vm15, %v3252_v45  ;;  %v3160_v45 = vrot.slane %v4327_v38, 5 }
 0x21f   : > { %3011 = vst.msk [vmem:[#allocation2 + $0x8] sm:$0xf] %vm3008_vm14, %v2917_v32  ;;  %v4244_v32 = vld [vmem:[%s4707_s5 + $0x40] sm:$0xf] }
 0x220   : > { %v3162_v53 = vrot.slane %v3160_v45, 4  ;;  %v3161_v55 = vsel %vm4893_vm6, %v4368_v57, %v3160_v45  ;;  %v4301_v45 = vld [vmem:[%s4707_s5 + $0x98] sm:$0x1] }
 0x221   : > { %v2788_v57 = vshll.u32 %v4301_v45, 16  ;;  %v4290_v45 = vld [vmem:[%s4707_s5 + $0x6c] sm:$0xf] }
 0x222   : > { %3287 = vrot.lane.b32.xlu1 %v3206_v50, %s4624_s13  ;;  %v2689_v50 = vor.u32 %v2688_v41, %v2684_v33  ;;  %v3164_v52 = vsel %vm4893_vm6, %v3162_v53, %v3163_v54  ;;  %v4308_v53 = vld [vmem:[%s4707_s5 + $0xb4] sm:$0xf] }
 0x223   : > { %3285 = vrot.lane.b32.xlu0 %v3203_v51, %s4624_s13  ;;  %2962 = vrot.lane.b32.xlu2 %v2839_v56, %s4623_s12  ;;  %v2692_v51 = vshll.u32 %v4289_v43, 16  ;;  %v2784_v43 = vrot.slane %v2782_v30, 4  ;;  %v4263_v54 = vld [vmem:[%s4707_s5 + $0xb4] sm:$0xf] }
 0x224   : > { %v2370_v58 = vpop.permute.xlu1 %2369  ;;  %v2690_v61 = vrot.slane %v2689_v50, 4 }
 0x225   : > { %2457 = vst.msk [vmem:[#allocation2 + $0x24] sm:$0xf] %vm2447_vm13, %v2370_v58  ;;  %v2368_v62 = vpop.permute.xlu0 %2367  ;;  %v4474_v63 = vld [vmem:[#allocation2] sm:$0xff]  ;;  %v3266_v0 = vpop.permute.xlu2 %3265 }
 0x226   : > { %2456 = vst.msk [vmem:[#allocation2 + $0x20] sm:$0xf] %vm2447_vm13, %v2368_v62  ;;  %4453 = vmatmul.msk.bf16.vlgmr.msra.gmra.mxu0 %vm3510_vm0, %v4474_v63  ;;  %v4336_v58 = vld [vmem:[%s4707_s5 + $0x64] sm:$0xf]  ;;  %v2694_v62 = vrot.slane %v2692_v51, 5 }
 0x227   : > { %3018 = vst.msk [vmem:[#allocation2 + $0x24] sm:$0xf] %vm3008_vm14, %v2931_v49  ;;  %v2613_v49 = vsel %vm4718_vm2, %v2608_v40, %v2612_v16  ;;  %v2772_v40 = vshll.u32 %v4299_v36, 16 }
 0x228   : > { %v2695_v5 = vsel %vm4718_vm2, %v2690_v61, %v2694_v62  ;;  %v4257_v62 = vld [vmem:[%s4707_s5 + $0x90] sm:$0xf] }
 0x229   : > { %v2774_v47 = vrot.slane %v2772_v40, 5  ;;  %v4195_v40 = vld [vmem:[%s4707_s5 + $0x64] sm:$0xf] }
 0x22a   : > { %2363 = vrot.lane.b32.xlu1 %v4243_v3, %s4622_s11  ;;  %v3181_v3 = vrot.slane %v4336_v58, 5  ;;  %v4258_v58 = vld [vmem:[%s4707_s5 + $0x94] sm:$0xf] }
 0x22b   : > { %3299 = vrot.lane.b32.xlu0 %v3227_v6, %s4624_s13  ;;  %3297 = vrot.lane.b32.xlu2 %v3224_v9, %s4624_s13  ;;  %v4335_v6 = vld [vmem:[%s4707_s5 + $0x60] sm:$0xe] }
 0x22c   : > { %v2929_v14 = vpop.permute.xlu1 %2928  ;;  %v3183_v10 = vrot.slane %v3181_v3, 4  ;;  %v4371_v15 = vrot.slane %v4335_v6, 9 }
 0x22d   : > { %3017 = vst.msk [vmem:[#allocation2 + $0x20] sm:$0xf] %vm3008_vm14, %v2929_v14  ;;  %v2919_v18 = vpop.permute.xlu0 %2918  ;;  %v2192_v22 = vpop.permute.xlu2 %2191 }
 0x22e   : > { %3012 = vst.msk [vmem:[#allocation2 + $0xc] sm:$0xf] %vm3008_vm14, %v2919_v18  ;;  %v2138_v18 = vrot.slane %v4213_v12, 5  ;;  %v3185_v19 = vsel %vm4893_vm6, %v3183_v10, %v3184_v11 }
 0x22f   : > { %3354 = vst.msk [vmem:[#allocation2 + $0x20] sm:$0xf] %vm3345_vm15, %v3266_v0  ;;  %v4203_v0 = vld [vmem:[%s4707_s5 + $0x84] sm:$0xe] }
 0x230   : > { %2271 = vst.msk [vmem:[#allocation2 + $0x44] sm:$0xf] %vm2253_vm11, %v2192_v22  ;;  %v4231_v7 = vrot.slane %v4203_v0, 9  ;;  %v3182_v22 = vsel %vm4893_vm6, %v4371_v15, %v3181_v3  ;;  %v2140_v24 = vrot.slane %v2138_v18, 4  ;;  %v2139_v38 = vsel %vm4893_vm6, %v4234_v28, %v2138_v18 }
 0x231   : > { %v2790_v0 = vrot.slane %v2788_v57, 5 }
 0x232   : > { %2377 = vrot.lane.b32.xlu1 %v4250_v23, %s4622_s11  ;;  %v2118_v17 = vsel %vm4893_vm6, %v4231_v7, %v2117_v8  ;;  %v4205_v23 = vld [vmem:[%s4707_s5 + $0x8c] sm:$0x1]  ;;  %v4310_v7 = vld [vmem:[%s4707_s5 + $0xbc] sm:$0x1] }
 0x233   : > { %2375 = vrot.lane.b32.xlu0 %v4249_v27, %s4622_s11  ;;  %2365 = vrot.lane.b32.xlu2 %v4244_v32, %s4622_s11  ;;  %v2119_v32 = vrot.slane %v2117_v8, 4  ;;  %v2120_v34 = vrot.slane %v4205_v23, 5 }
 0x234   : > { %v3256_v37 = vpop.permute.xlu1 %3255 }
 0x235   : > { %3349 = vst.msk [vmem:[#allocation2 + $0xc] sm:$0xf] %vm3345_vm15, %v3256_v37  ;;  %v3254_v39 = vpop.permute.xlu0 %3253  ;;  %v2945_v42 = vpop.permute.xlu2 %2944  ;;  %v2142_v37 = vsel %vm4893_vm6, %v2140_v24, %v2141_v26  ;;  %v2121_v41 = vsel %vm4893_vm6, %v2119_v32, %v2120_v34  ;;  %v4357_v24 = vld [vmem:[%s4707_s5 + $0xb8] sm:$0xf]  ;;  %v4358_v34 = vld [vmem:[%s4707_s5 + $0xbc] sm:$0x1] }
 0x236   : > { %3348 = vst.msk [vmem:[#allocation2 + $0x8] sm:$0xf] %vm3345_vm15, %v3254_v39  ;;  %v2769_v39 = vshrl.u32 %v4299_v36, 16  ;;  %v4356_v36 = vld [vmem:[%s4707_s5 + $0xb4] sm:$0xe]  ;;  %v3233_v30 = vrot.slane %v4358_v34, 5 }
 0x23a   : > { %2936 = vrot.lane.b32.xlu1 %v2685_v44, %s4623_s12 }
 0x23b   : > { %2926 = vrot.lane.b32.xlu0 %v2623_v46, %s4623_s12  ;;  %2924 = vrot.lane.b32.xlu2 %v2613_v49, %s4623_s12  ;;  %v2771_v46 = vrot.slane %v2769_v39, 4  ;;  %v4309_v49 = vld [vmem:[%s4707_s5 + $0xb8] sm:$0xf]  ;;  %v4378_v39 = vrot.slane %v4356_v36, 9 }
 0x23c   : > { %v2190_v56 = vpop.permute.xlu1 %2189  ;;  %v2854_v61 = vshrl.u32 %v4309_v49, 16 }
 0x23d   : > { %2270 = vst.msk [vmem:[#allocation2 + $0x40] sm:$0xf] %vm2253_vm11, %v2190_v56  ;;  %v3268_v59 = vpop.permute.xlu0 %3267  ;;  %v4475_v60 = vld [vmem:[#allocation2 + $0x8] sm:$0xff]  ;;  %v3284_v63 = vpop.permute.xlu2 %3283 }
 0x23e   : > { %3355 = vst.msk [vmem:[#allocation2 + $0x24] sm:$0xf] %vm3345_vm15, %v3268_v59  ;;  %4454 = vmatmul.msk.bf16.gmra.mxu0 %vm3510_vm0, %v4475_v60  ;;  %v2775_v59 = vor.u32 %v2774_v47, %v2771_v46  ;;  %v2850_v60 = vshll.u32 %v4309_v49, 16 }
 0x240   : > { %v2776_v3 = vrot.slane %v2775_v59, 4  ;;  %v2852_v4 = vrot.slane %v2850_v60, 5 }
 0x242   : > { %3263 = vrot.lane.b32.xlu1 %v3164_v52, %s4624_s13  ;;  %v2844_v52 = vshll.u32 %v4308_v53, 16 }
 0x243   : > { %3261 = vrot.lane.b32.xlu0 %v3161_v55, %s4624_s13  ;;  %2938 = vrot.lane.b32.xlu2 %v2695_v5, %s4623_s12  ;;  %v2856_v5 = vrot.slane %v2854_v61, 4 }
 0x244   : > { %v2386_v9 = vpop.permute.xlu1 %2385 }
 0x245   : > { %2465 = vst.msk [vmem:[#allocation2 + $0x44] sm:$0xf] %vm2447_vm13, %v2386_v9  ;;  %v2384_v13 = vpop.permute.xlu0 %2383  ;;  %v4478_v14 = vld [vmem:[#allocation2 + $0x20] sm:$0xff]  ;;  %v2372_v16 = vpop.permute.xlu2 %2371  ;;  %v2846_v9 = vrot.slane %v2844_v52, 5  ;;  %v2857_v15 = vor.u32 %v2856_v5, %v2852_v4 }
 0x246   : > { %2464 = vst.msk [vmem:[#allocation2 + $0x40] sm:$0xf] %vm2447_vm13, %v2384_v13  ;;  %4457 = vmatmul.msk.bf16.vlgmr.msra.gmra.mxu1 %vm3510_vm0, %v4478_v14  ;;  %v4347_v13 = vld [vmem:[%s4707_s5 + $0x90] sm:$0xe]  ;;  %v4348_v14 = vld [vmem:[%s4707_s5 + $0x94] sm:$0xf] }
 0x247   : > { %3025 = vst.msk [vmem:[#allocation2 + $0x40] sm:$0xf] %vm3008_vm14, %v2945_v42  ;;  %v2780_v42 = vrot.slane %v2778_v35, 5  ;;  %v3209_v20 = vrot.slane %v4348_v14, 5 }
 0x248   : > { %2458 = vst.msk [vmem:[#allocation2 + $0x28] sm:$0xf] %vm2447_vm13, %v2372_v16  ;;  %v2860_v16 = vshll.u32 %v4310_v7, 16  ;;  %v4251_v7 = vld [vmem:[%s4707_s5 + $0x6c] sm:$0xf] }
 0x249   : > { %v2785_v56 = vor.u32 %v2784_v43, %v2780_v42  ;;  %v2781_v12 = vsel %vm4718_vm2, %v2776_v3, %v2780_v42  ;;  %v3211_v43 = vrot.slane %v3209_v20, 4 }
 0x24a   : > { %2197 = vrot.lane.b32.xlu1 %v2118_v17, %s4621_s10  ;;  %v4264_v17 = vld [vmem:[%s4707_s5 + $0xb8] sm:$0xf]  ;;  %v2862_v23 = vrot.slane %v2860_v16, 5 }
 0x24b   : > { %3275 = vrot.lane.b32.xlu0 %v3185_v19, %s4624_s13  ;;  %3273 = vrot.lane.b32.xlu2 %v3182_v22, %s4624_s13  ;;  %v2786_v55 = vrot.slane %v2785_v56, 4  ;;  %v4375_v19 = vrot.slane %v4347_v13, 9  ;;  %v2858_v22 = vrot.slane %v2857_v15, 4  ;;  %v4196_v56 = vld [vmem:[%s4707_s5 + $0x68] sm:$0x1] }
 0x24c   : > { %v3282_v27 = vpop.permute.xlu1 %3281  ;;  %v2099_v52 = vrot.slane %v4196_v56, 5 }
 0x24d   : > { %3362 = vst.msk [vmem:[#allocation2 + $0x40] sm:$0xf] %vm3345_vm15, %v3282_v27  ;;  %v2947_v31 = vpop.permute.xlu0 %2946  ;;  %v2923_v33 = vpop.permute.xlu2 %2922  ;;  %v2791_v11 = vsel %vm4718_vm2, %v2786_v55, %v2790_v0  ;;  %v3210_v29 = vsel %vm4893_vm6, %v4375_v19, %v3209_v20  ;;  %v2863_v32 = vsel %vm4718_vm2, %v2858_v22, %v2862_v23  ;;  %v4292_v55 = vld [vmem:[%s4707_s5 + $0x74] sm:$0x1]  ;;  %v4206_v22 = vld [vmem:[%s4707_s5 + $0x90] sm:$0xe] }
 0x24e   : > { %3026 = vst.msk [vmem:[#allocation2 + $0x44] sm:$0xf] %vm3008_vm14, %v2947_v31  ;;  %v3230_v31 = vrot.slane %v4357_v24, 5  ;;  %v4207_v23 = vld [vmem:[%s4707_s5 + $0x94] sm:$0xf] }
 0x24f   : > { %3363 = vst.msk [vmem:[#allocation2 + $0x44] sm:$0xf] %vm3345_vm15, %v3284_v63  ;;  %v2841_v63 = vshrl.u32 %v4308_v53, 16  ;;  %v2697_v53 = vshrl.u32 %v4290_v45, 16 }
 0x250   : > { %v3232_v35 = vrot.slane %v3230_v31, 4 }
 0x251   : > { %v2843_v8 = vrot.slane %v2841_v63, 4  ;;  %v2699_v0 = vrot.slane %v2697_v53, 4 }
 0x252   : > { %2211 = vrot.lane.b32.xlu1 %v2142_v37, %s4621_s10  ;;  %v4349_v37 = vld [vmem:[%s4707_s5 + $0x98] sm:$0x1]  ;;  %v3234_v47 = vsel %vm4893_vm6, %v3232_v35, %v3233_v30 }
 0x253   : > { %2209 = vrot.lane.b32.xlu0 %v2139_v38, %s4621_s10  ;;  %2199 = vrot.lane.b32.xlu2 %v2121_v41, %s4621_s10  ;;  %v2847_v18 = vor.u32 %v2846_v9, %v2843_v8  ;;  %v4291_v41 = vld [vmem:[%s4707_s5 + $0x70] sm:$0xf]  ;;  %v2716_v9 = vshll.u32 %v4292_v55, 16 }
 0x254   : > { %v2362_v44 = vpop.permute.xlu1 %2361  ;;  %v2706_v49 = vshll.u32 %v4291_v41, 16 }
 0x255   : > { %2453 = vst.msk [vmem:[#allocation2 + $0x14] sm:$0xf] %vm2447_vm13, %v2362_v44  ;;  %v2360_v48 = vpop.permute.xlu0 %2359  ;;  %v3258_v51 = vpop.permute.xlu2 %3257  ;;  %v2848_v27 = vrot.slane %v2847_v18, 4  ;;  %v3212_v44 = vrot.slane %v4349_v37, 5  ;;  %v2718_v14 = vrot.slane %v2716_v9, 5 }
 0x256   : > { %2452 = vst.msk [vmem:[#allocation2 + $0x10] sm:$0xf] %vm2447_vm13, %v2360_v48  ;;  %v4482_v50 = vld [vmem:[#allocation2 + $0x40] sm:$0xff]  ;;  %v2096_v48 = vrot.slane %v4195_v40, 5  ;;  %v2708_v60 = vrot.slane %v2706_v49, 5 }
 0x257   : > { %3014 = vst.msk [vmem:[#allocation2 + $0x14] sm:$0xf] %vm3008_vm14, %v2923_v33  ;;  %4461 = vmatmul.msk.bf16.vlgmr.msra.gmra.mxu2 %vm3510_vm0, %v4482_v50  ;;  %v2853_v33 = vsel %vm4718_vm2, %v2848_v27, %v2852_v4  ;;  %v2710_v50 = vshrl.u32 %v4291_v41, 16  ;;  %v3213_v57 = vsel %vm4893_vm6, %v3211_v43, %v3212_v44  ;;  %v4339_v18 = vld [vmem:[%s4707_s5 + $0x70] sm:$0xf] }
 0x258   : > { %v2098_v59 = vrot.slane %v2096_v48, 4  ;;  %v3188_v24 = vrot.slane %v4339_v18, 5  ;;  %v4252_v27 = vld [vmem:[%s4707_s5 + $0x70] sm:$0xf]  ;;  %v4217_v41 = vld [vmem:[%s4707_s5 + $0xbc] sm:$0x1] }
 0x259   : > { %v2712_v61 = vrot.slane %v2710_v50, 4  ;;  %v4208_v44 = vld [vmem:[%s4707_s5 + $0x98] sm:$0x1]  ;;  %v4303_v49 = vld [vmem:[%s4707_s5 + $0xa0] sm:$0xf] }
 0x25a   : > { %2403 = vrot.lane.b32.xlu1 %v4263_v54, %s4622_s11  ;;  %v2700_v54 = vshll.u32 %v4290_v45, 16  ;;  %v3190_v34 = vrot.slane %v3188_v24, 4  ;;  %v2127_v53 = vrot.slane %v4208_v44, 5  ;;  %v4265_v9 = vld [vmem:[%s4707_s5 + $0xc0] sm:$0xf] }
 0x25b   : > { %2393 = vrot.lane.b32.xlu0 %v4258_v58, %s4622_s11  ;;  %2391 = vrot.lane.b32.xlu2 %v4257_v62, %s4622_s11  ;;  %v4194_v58 = vld [vmem:[%s4707_s5 + $0x60] sm:$0xe]  ;;  %v2713_v8 = vor.u32 %v2712_v61, %v2708_v60 }
 0x25c   : > { %v2921_v2 = vpop.permute.xlu1 %2920  ;;  %v4228_v5 = vrot.slane %v4194_v58, 9  ;;  %v2802_v58 = vshll.u32 %v4303_v49, 16 }
 0x25d   : > { %3013 = vst.msk [vmem:[#allocation2 + $0x10] sm:$0xf] %vm3008_vm14, %v2921_v2  ;;  %v2374_v6 = vpop.permute.xlu0 %2373  ;;  %v3272_v10 = vpop.permute.xlu2 %3271  ;;  %v2702_v2 = vrot.slane %v2700_v54, 5  ;;  %v2714_v13 = vrot.slane %v2713_v8, 4  ;;  %v4302_v54 = vld [vmem:[%s4707_s5 + $0x9c] sm:$0xf] }
 0x25e   : > { %2459 = vst.msk [vmem:[#allocation2 + $0x2c] sm:$0xf] %vm2447_vm13, %v2374_v6  ;;  %v2793_v61 = vshrl.u32 %v4302_v54, 16  ;;  %v4311_v8 = vld [vmem:[%s4707_s5 + $0xc0] sm:$0xf] }
 0x25f   : > { %3350 = vst.msk [vmem:[#allocation2 + $0x10] sm:$0xf] %vm3345_vm15, %v3258_v51  ;;  %v3231_v51 = vsel %vm4893_vm6, %v4378_v39, %v3230_v31  ;;  %v2719_v20 = vsel %vm4718_vm2, %v2714_v13, %v2718_v14  ;;  %v2124_v31 = vrot.slane %v4207_v23, 5  ;;  %v2868_v18 = vshll.u32 %v4311_v8, 16  ;;  %v4313_v23 = vld [vmem:[%s4707_s5 + $0xc8] sm:$0x1] }
 0x262   : > { %2954 = vrot.lane.b32.xlu1 %v2791_v11, %s4623_s12  ;;  %v2703_v11 = vor.u32 %v2702_v2, %v2699_v0  ;;  %v4304_v2 = vld [vmem:[%s4707_s5 + $0xa4] sm:$0x1] }
 0x263   : > { %2952 = vrot.lane.b32.xlu0 %v2781_v12, %s4623_s12  ;;  %2405 = vrot.lane.b32.xlu2 %v4264_v17, %s4622_s11  ;;  %v2097_v12 = vsel %vm4893_vm6, %v4228_v5, %v2096_v48 }
 0x264   : > { %v2935_v21 = vpop.permute.xlu1 %2934  ;;  %v2704_v16 = vrot.slane %v2703_v11, 4  ;;  %v2812_v11 = vshll.u32 %v4304_v2, 16  ;;  %v4314_v2 = vld [vmem:[%s4707_s5 + $0xcc] sm:$0xf] }
 0x265   : > { %3020 = vst.msk [vmem:[#allocation2 + $0x2c] sm:$0xf] %vm3008_vm14, %v2935_v21  ;;  %v2933_v26 = vpop.permute.xlu0 %2932  ;;  %v2206_v28 = vpop.permute.xlu2 %2205 }
 0x266   : > { %3019 = vst.msk [vmem:[#allocation2 + $0x28] sm:$0xf] %vm3008_vm14, %v2933_v26  ;;  %v2709_v21 = vsel %vm4718_vm2, %v2704_v16, %v2708_v60  ;;  %v4340_v26 = vld [vmem:[%s4707_s5 + $0x74] sm:$0x1]  ;;  %v4259_v16 = vld [vmem:[%s4707_s5 + $0x9c] sm:$0xf] }
 0x267   : > { %3357 = vst.msk [vmem:[#allocation2 + $0x2c] sm:$0xf] %vm3345_vm15, %v3272_v10  ;;  %v2100_v10 = vsel %vm4893_vm6, %v2098_v59, %v2099_v52  ;;  %v3191_v36 = vrot.slane %v4340_v26, 5  ;;  %v2806_v59 = vshrl.u32 %v4303_v49, 16  ;;  %v2804_v52 = vrot.slane %v2802_v58, 5 }
 0x268   : > { %2278 = vst.msk [vmem:[#allocation2 + $0x60] sm:$0xf] %vm2253_vm11, %v2206_v28  ;;  %v4338_v28 = vld [vmem:[%s4707_s5 + $0x6c] sm:$0xe]  ;;  %v4352_v58 = vld [vmem:[%s4707_s5 + $0xa4] sm:$0x1] }
 0x269   : > { %v4372_v35 = vrot.slane %v4338_v28, 9  ;;  %v3192_v40 = vsel %vm4893_vm6, %v3190_v34, %v3191_v36  ;;  %v2808_v55 = vrot.slane %v2806_v59, 4 }
 0x26a   : > { %3289 = vrot.lane.b32.xlu1 %v3210_v29, %s4624_s13  ;;  %v4232_v29 = vrot.slane %v4206_v22, 9 }
 0x26b   : > { %2966 = vrot.lane.b32.xlu0 %v2863_v32, %s4623_s12  ;;  %2964 = vrot.lane.b32.xlu2 %v2853_v33, %s4623_s12  ;;  %v4216_v33 = vld [vmem:[%s4707_s5 + $0xb8] sm:$0xf]  ;;  %v3189_v43 = vsel %vm4893_vm6, %v4372_v35, %v3188_v24 }
 0x26c   : > { %v3270_v38 = vpop.permute.xlu1 %3269  ;;  %v2145_v39 = vrot.slane %v4216_v33, 5  ;;  %v4350_v33 = vld [vmem:[%s4707_s5 + $0x9c] sm:$0xe] }
 0x26d   : > { %3356 = vst.msk [vmem:[#allocation2 + $0x28] sm:$0xf] %vm3345_vm15, %v3270_v38  ;;  %v3260_v42 = vpop.permute.xlu0 %3259  ;;  %v2390_v46 = vpop.permute.xlu2 %2389  ;;  %v2125_v38 = vsel %vm4893_vm6, %v4232_v29, %v2124_v31 }
 0x26e   : > { %3351 = vst.msk [vmem:[#allocation2 + $0x14] sm:$0xf] %vm3345_vm15, %v3260_v42  ;;  %v4215_v42 = vld [vmem:[%s4707_s5 + $0xb4] sm:$0xe]  ;;  %v2147_v45 = vrot.slane %v2145_v39, 4 }
 0x26f   : > { %v4235_v48 = vrot.slane %v4215_v42, 9 }
 0x271   : > { %v2146_v60 = vsel %vm4893_vm6, %v4235_v48, %v2145_v39 }
 0x272   : > { %3303 = vrot.lane.b32.xlu1 %v3234_v47, %s4624_s13 }
 0x273   : > { %3301 = vrot.lane.b32.xlu0 %v3231_v51, %s4624_s13  ;;  %3291 = vrot.lane.b32.xlu2 %v3213_v57, %s4624_s13  ;;  %v2126_v51 = vrot.slane %v2124_v31, 4  ;;  %v2870_v31 = vrot.slane %v2868_v18, 5 }
 0x274   : > { %v2196_v62 = vpop.permute.xlu1 %2195  ;;  %v4479_v63 = vld [vmem:[#allocation2 + $0x28] sm:$0xff] }
 0x275   : > { %2273 = vst.msk [vmem:[#allocation2 + $0x4c] sm:$0xf] %vm2253_vm11, %v2196_v62  ;;  %v2194_v3 = vpop.permute.xlu0 %2193  ;;  %v4476_v4 = vld [vmem:[#allocation2 + $0x10] sm:$0xff]  ;;  %4458 = vmatmul.msk.bf16.gmra.mxu1 %vm3510_vm0, %v4479_v63  ;;  %v2949_v6 = vpop.permute.xlu2 %2948  ;;  %v2796_v62 = vshll.u32 %v4302_v54, 16  ;;  %v2128_v63 = vsel %vm4893_vm6, %v2126_v51, %v2127_v53  ;;  %v4361_v54 = vld [vmem:[%s4707_s5 + $0xc8] sm:$0x1] }
 0x276   : > { %2272 = vst.msk [vmem:[#allocation2 + $0x48] sm:$0xf] %vm2253_vm11, %v2194_v3  ;;  %4455 = vmatmul.msk.bf16.gmra.mxu0 %vm3510_vm0, %v4476_v4  ;;  %v2795_v3 = vrot.slane %v2793_v61, 4 }
 0x277   : > { %2467 = vst.msk [vmem:[#allocation2 + $0x4c] sm:$0xf] %vm2447_vm13, %v2390_v46  ;;  %v2148_v46 = vrot.slane %v4217_v41, 5  ;;  %v2798_v4 = vrot.slane %v2796_v62, 5 }
 0x279   : > { %v2149_v57 = vsel %vm4893_vm6, %v2147_v45, %v2148_v46  ;;  %v2799_v13 = vor.u32 %v2798_v4, %v2795_v3  ;;  %v4360_v45 = vld [vmem:[%s4707_s5 + $0xc4] sm:$0xf]  ;;  %v4315_v4 = vld [vmem:[%s4707_s5 + $0xd0] sm:$0xf] }
 0x27a   : > { %2379 = vrot.lane.b32.xlu1 %v4251_v7, %s4622_s11  ;;  %v3237_v51 = vrot.slane %v4360_v45, 5  ;;  %v4268_v45 = vld [vmem:[%s4707_s5 + $0xd0] sm:$0xf] }
 0x27b   : > { %2187 = vrot.lane.b32.xlu0 %v2100_v10, %s4621_s10  ;;  %2185 = vrot.lane.b32.xlu2 %v2097_v12, %s4621_s10  ;;  %v2809_v10 = vor.u32 %v2808_v55, %v2804_v52  ;;  %v4260_v12 = vld [vmem:[%s4707_s5 + $0xa0] sm:$0xf]  ;;  %v2800_v22 = vrot.slane %v2799_v13, 4  ;;  %v2898_v13 = vshll.u32 %v4315_v4, 16 }
 0x27c   : > { %v2388_v15 = vpop.permute.xlu1 %2387  ;;  %v3239_v59 = vrot.slane %v3237_v51, 4 }
 0x27d   : > { %2466 = vst.msk [vmem:[#allocation2 + $0x48] sm:$0xf] %vm2447_vm13, %v2388_v15  ;;  %v2208_v17 = vpop.permute.xlu0 %2207  ;;  %v2963_v19 = vpop.permute.xlu2 %2962  ;;  %v2805_v36 = vsel %vm4718_vm2, %v2800_v22, %v2804_v52 }
 0x27e   : > { %2279 = vst.msk [vmem:[#allocation2 + $0x64] sm:$0xf] %vm2253_vm11, %v2208_v17  ;;  %v2865_v17 = vshrl.u32 %v4311_v8, 16 }
 0x27f   : > { %3027 = vst.msk [vmem:[#allocation2 + $0x48] sm:$0xf] %vm3008_vm14, %v2949_v6  ;;  %v4312_v6 = vld [vmem:[%s4707_s5 + $0xc4] sm:$0xf] }
 0x280   : > { %v2874_v14 = vshll.u32 %v4312_v6, 16  ;;  %v2878_v15 = vshrl.u32 %v4312_v6, 16  ;;  %v2867_v29 = vrot.slane %v2865_v17, 4  ;;  %v2902_v6 = vshrl.u32 %v4315_v4, 16 }
 0x282   : > { %2942 = vrot.lane.b32.xlu1 %v2719_v20, %s4623_s12  ;;  %v2814_v20 = vrot.slane %v2812_v11, 5  ;;  %v2876_v24 = vrot.slane %v2874_v14, 5  ;;  %v2880_v26 = vrot.slane %v2878_v15, 4  ;;  %v2871_v39 = vor.u32 %v2870_v31, %v2867_v29  ;;  %v4220_v11 = vld [vmem:[%s4707_s5 + $0xc8] sm:$0x1] }
 0x283   : > { %2940 = vrot.lane.b32.xlu0 %v2709_v21, %s4623_s12  ;;  %2381 = vrot.lane.b32.xlu2 %v4252_v27, %s4622_s11  ;;  %v4218_v14 = vld [vmem:[%s4707_s5 + $0xc0] sm:$0xe]  ;;  %v2904_v15 = vrot.slane %v2902_v6, 4  ;;  %v2155_v18 = vrot.slane %v4220_v11, 5 }
 0x284   : > { %v2402_v32 = vpop.permute.xlu1 %2401  ;;  %v2881_v35 = vor.u32 %v2880_v26, %v2876_v24  ;;  %v2872_v48 = vrot.slane %v2871_v39, 4  ;;  %v4363_v39 = vld [vmem:[%s4707_s5 + $0xd0] sm:$0xf] }
 0x285   : > { %2473 = vst.msk [vmem:[#allocation2 + $0x64] sm:$0xf] %vm2447_vm13, %v2402_v32  ;;  %v2400_v37 = vpop.permute.xlu0 %2399  ;;  %v3298_v30 = vpop.permute.xlu2 %3297 }
 0x286   : > { %2472 = vst.msk [vmem:[#allocation2 + $0x60] sm:$0xf] %vm2447_vm13, %v2400_v37  ;;  %v4351_v37 = vld [vmem:[%s4707_s5 + $0xa0] sm:$0xf] }
 0x287   : > { %3034 = vst.msk [vmem:[#allocation2 + $0x64] sm:$0xf] %vm3008_vm14, %v2963_v19  ;;  %v2810_v19 = vrot.slane %v2809_v10, 4  ;;  %v3216_v41 = vrot.slane %v4351_v37, 5  ;;  %v2892_v10 = vshll.u32 %v4314_v2, 16 }
 0x289   : > { %v2815_v34 = vsel %vm4718_vm2, %v2810_v19, %v2814_v20  ;;  %v3218_v55 = vrot.slane %v3216_v41, 4  ;;  %v2894_v20 = vrot.slane %v2892_v10, 5 }
 0x28a   : > { %2201 = vrot.lane.b32.xlu1 %v2125_v38, %s4621_s10  ;;  %v4266_v38 = vld [vmem:[%s4707_s5 + $0xc4] sm:$0xf] }
 0x28b   : > { %3279 = vrot.lane.b32.xlu0 %v3192_v40, %s4624_s13  ;;  %3277 = vrot.lane.b32.xlu2 %v3189_v43, %s4624_s13  ;;  %v4376_v40 = vrot.slane %v4350_v33, 9  ;;  %v2882_v43 = vrot.slane %v2881_v35, 4 }
 0x28c   : > { %v2961_v47 = vpop.permute.xlu1 %2960 }
 0x28d   : > { %3033 = vst.msk [vmem:[#allocation2 + $0x60] sm:$0xf] %vm3008_vm14, %v2961_v47  ;;  %v2951_v50 = vpop.permute.xlu0 %2950  ;;  %v2366_v56 = vpop.permute.xlu2 %2365 }
 0x28e   : > { %3028 = vst.msk [vmem:[#allocation2 + $0x4c] sm:$0xf] %vm3008_vm14, %v2951_v50  ;;  %v3217_v50 = vsel %vm4893_vm6, %v4376_v40, %v3216_v41 }
 0x28f   : > { %3370 = vst.msk [vmem:[#allocation2 + $0x60] sm:$0xf] %vm3345_vm15, %v3298_v30  ;;  %v2884_v30 = vshll.u32 %v4313_v23, 16  ;;  %v2900_v23 = vrot.slane %v2898_v13, 5 }
 0x290   : > { %2455 = vst.msk [vmem:[#allocation2 + $0x1c] sm:$0xf] %vm2447_vm13, %v2366_v56  ;;  %v4359_v56 = vld [vmem:[%s4707_s5 + $0xc0] sm:$0xe] }
 0x291   : > { %v2886_v44 = vrot.slane %v2884_v30, 5  ;;  %v4379_v62 = vrot.slane %v4359_v56, 9 }
 0x292   : > { %2215 = vrot.lane.b32.xlu1 %v2149_v57, %s4621_s10  ;;  %v2877_v57 = vsel %vm4718_vm2, %v2872_v48, %v2876_v24  ;;  %v4236_v24 = vrot.slane %v4218_v14, 9 }
 0x293   : > { %2213 = vrot.lane.b32.xlu0 %v2146_v60, %s4621_s10  ;;  %2203 = vrot.lane.b32.xlu2 %v2128_v63, %s4621_s10  ;;  %v2887_v53 = vsel %vm4718_vm2, %v2882_v43, %v2886_v44  ;;  %v3240_v60 = vrot.slane %v4361_v54, 5  ;;  %v4219_v63 = vld [vmem:[%s4707_s5 + $0xc4] sm:$0xf]  ;;  %v3244_v43 = vrot.slane %v4363_v39, 5  ;;  %v4364_v44 = vld [vmem:[%s4707_s5 + $0xd4] sm:$0x1] }
 0x294   : > { %v3288_v0 = vpop.permute.xlu1 %3287  ;;  %v2152_v8 = vrot.slane %v4219_v63, 5 }
 0x295   : > { %3365 = vst.msk [vmem:[#allocation2 + $0x4c] sm:$0xf] %vm3345_vm15, %v3288_v0  ;;  %v3286_v5 = vpop.permute.xlu0 %3285  ;;  %v2925_v7 = vpop.permute.xlu2 %2924  ;;  %v3219_v0 = vrot.slane %v4352_v58, 5  ;;  %v3246_v48 = vrot.slane %v3244_v43, 4 }
 0x296   : > { %3364 = vst.msk [vmem:[#allocation2 + $0x48] sm:$0xf] %vm3345_vm15, %v3286_v5  ;;  %v3241_v5 = vsel %vm4893_vm6, %v3239_v59, %v3240_v60  ;;  %v2154_v17 = vrot.slane %v2152_v8, 4 }
 0x298   : > { %v2156_v31 = vsel %vm4893_vm6, %v2154_v17, %v2155_v18 }
 0x29a   : > { %2407 = vrot.lane.b32.xlu1 %v4265_v9, %s4622_s11  ;;  %v2889_v9 = vshrl.u32 %v4314_v2, 16 }
 0x29b   : > { %2397 = vrot.lane.b32.xlu0 %v4260_v12, %s4622_s11  ;;  %2395 = vrot.lane.b32.xlu2 %v4259_v16, %s4622_s11  ;;  %v3220_v12 = vsel %vm4893_vm6, %v3218_v55, %v3219_v0 }
 0x29c   : > { %v2364_v21 = vpop.permute.xlu1 %2363  ;;  %v2891_v19 = vrot.slane %v2889_v9, 4 }
 0x29d   : > { %2454 = vst.msk [vmem:[#allocation2 + $0x18] sm:$0xf] %vm2447_vm13, %v2364_v21  ;;  %v3300_v27 = vpop.permute.xlu0 %3299  ;;  %v4483_v28 = vld [vmem:[#allocation2 + $0x48] sm:$0xff]  ;;  %v2939_v32 = vpop.permute.xlu2 %2938  ;;  %v4316_v21 = vld [vmem:[%s4707_s5 + $0xd4] sm:$0x1] }
 0x29e   : > { %3371 = vst.msk [vmem:[#allocation2 + $0x64] sm:$0xf] %vm3345_vm15, %v3300_v27  ;;  %4462 = vmatmul.msk.bf16.gmra.mxu2 %vm3510_vm0, %v4483_v28  ;;  %v4267_v27 = vld [vmem:[%s4707_s5 + $0xcc] sm:$0xf]  ;;  %v2905_v28 = vor.u32 %v2904_v15, %v2900_v23  ;;  %v2908_v29 = vshll.u32 %v4316_v21, 16 }
 0x29f   : > { %3015 = vst.msk [vmem:[#allocation2 + $0x18] sm:$0xf] %vm3008_vm14, %v2925_v7  ;;  %v3238_v7 = vsel %vm4893_vm6, %v4379_v62, %v3237_v51 }
 0x2a0   : > { %v2910_v33 = vrot.slane %v2908_v29, 5 }
 0x2a2   : > { %2958 = vrot.lane.b32.xlu1 %v2815_v34, %s4623_s12  ;;  %v2153_v34 = vsel %vm4893_vm6, %v4236_v24, %v2152_v8 }
 0x2a3   : > { %2956 = vrot.lane.b32.xlu0 %v2805_v36, %s4623_s12  ;;  %2409 = vrot.lane.b32.xlu2 %v4266_v38, %s4622_s11  ;;  %v2906_v36 = vrot.slane %v2905_v28, 4 }
 0x2a4   : > { %v2378_v42 = vpop.permute.xlu1 %2377 }
 0x2a5   : > { %2461 = vst.msk [vmem:[#allocation2 + $0x34] sm:$0xf] %vm2447_vm13, %v2378_v42  ;;  %v2376_v46 = vpop.permute.xlu0 %2375  ;;  %v4486_v47 = vld [vmem:[#allocation2 + $0x60] sm:$0xff]  ;;  %v3274_v49 = vpop.permute.xlu2 %3273  ;;  %v2911_v41 = vsel %vm4718_vm2, %v2906_v36, %v2910_v33 }
 0x2a6   : > { %2460 = vst.msk [vmem:[#allocation2 + $0x30] sm:$0xf] %vm2447_vm13, %v2376_v46  ;;  %4465 = vmatmul.msk.bf16.vlgmr.msra.gmra.mxu3 %vm3510_vm0, %v4486_v47  ;;  %v4362_v46 = vld [vmem:[%s4707_s5 + $0xcc] sm:$0xe] }
 0x2a7   : > { %3022 = vst.msk [vmem:[#allocation2 + $0x34] sm:$0xf] %vm3008_vm14, %v2939_v32  ;;  %v2895_v32 = vor.u32 %v2894_v20, %v2891_v19 }
 0x2a9   : > { %v2896_v35 = vrot.slane %v2895_v32, 4 }
 0x2aa   : > { %3293 = vrot.lane.b32.xlu1 %v3217_v50, %s4624_s13 }
 0x2ab   : > { %2970 = vrot.lane.b32.xlu0 %v2887_v53, %s4623_s12  ;;  %2968 = vrot.lane.b32.xlu2 %v2877_v57, %s4623_s12  ;;  %v2901_v42 = vsel %vm4718_vm2, %v2896_v35, %v2900_v23  ;;  %v4380_v53 = vrot.slane %v4362_v46, 9 }
 0x2ac   : > { %v2937_v61 = vpop.permute.xlu1 %2936 }
 0x2ad   : > { %3021 = vst.msk [vmem:[#allocation2 + $0x30] sm:$0xf] %vm3008_vm14, %v2937_v61  ;;  %v2927_v52 = vpop.permute.xlu0 %2926  ;;  %v2200_v3 = vpop.permute.xlu2 %2199  ;;  %v3245_v56 = vsel %vm4893_vm6, %v4380_v53, %v3244_v43 }
 0x2ae   : > { %3016 = vst.msk [vmem:[#allocation2 + $0x1c] sm:$0xf] %vm3008_vm14, %v2927_v52 }
 0x2af   : > { %3358 = vst.msk [vmem:[#allocation2 + $0x30] sm:$0xf] %vm3345_vm15, %v3274_v49  ;;  %v3247_v49 = vrot.slane %v4364_v44, 5 }
 0x2b0   : > { %2275 = vst.msk [vmem:[#allocation2 + $0x54] sm:$0xf] %vm2253_vm11, %v2200_v3 }
 0x2b1   : > { %v3248_v54 = vsel %vm4893_vm6, %v3246_v48, %v3247_v49 }
 0x2b2   : > { %3307 = vrot.lane.b32.xlu1 %v3241_v5, %s4624_s13 }
 0x2b3   : > { %3305 = vrot.lane.b32.xlu0 %v3238_v7, %s4624_s13  ;;  %3295 = vrot.lane.b32.xlu2 %v3220_v12, %s4624_s13 }
 0x2b4   : > { %v3264_v16 = vpop.permute.xlu1 %3263 }
 0x2b5   : > { %3353 = vst.msk [vmem:[#allocation2 + $0x1c] sm:$0xf] %vm3345_vm15, %v3264_v16  ;;  %v3262_v22 = vpop.permute.xlu0 %3261  ;;  %v2392_v26 = vpop.permute.xlu2 %2391 }
 0x2b6   : > { %3352 = vst.msk [vmem:[#allocation2 + $0x18] sm:$0xf] %vm3345_vm15, %v3262_v22 }
 0x2ba   : > { %2411 = vrot.lane.b32.xlu1 %v4267_v27, %s4622_s11 }
 0x2bb   : > { %2219 = vrot.lane.b32.xlu0 %v2156_v31, %s4621_s10  ;;  %2217 = vrot.lane.b32.xlu2 %v2153_v34, %s4621_s10  ;;  %s223_s10 = scalar_lea.vmem %s6457_s3, %s4701_s27  ;;  %s4492_s27 = sshll.u32 %s4672_s19, 8 }
 0x2bc   : > { %v2198_v37 = vpop.permute.xlu1 %2197  ;;  %s3987_s20 = scalar_lea.hbm %s6458_s4, %s4492_s27 }
 0x2bd   : > { %2274 = vst.msk [vmem:[#allocation2 + $0x50] sm:$0xf] %vm2253_vm11, %v2198_v37  ;;  %v3276_v30 = vpop.permute.xlu0 %3275  ;;  %v4477_v38 = vld [vmem:[#allocation2 + $0x18] sm:$0xff]  ;;  %v2406_v40 = vpop.permute.xlu2 %2405  ;;  %s3990_s23 = sshll.u32 %s3987_s20, 4  ;;  %s3991_s23 = int_to_ptr.hbm [resolvable:$true] %s3990_s23 }
 0x2be   : > { %3359 = vst.msk [vmem:[#allocation2 + $0x34] sm:$0xf] %vm3345_vm15, %v3276_v30  ;;  %4456 = vmatmul.msk.bf16.gmra.mxu0 %vm3510_vm0, %v4477_v38  ;;  %v6118_v30 = vpop.f32.mrf.mxu0  ;;  %s4567_s29 = sshra.s32 %s3991_s23, 4  ;;  %s4568_s29 = int_to_ptr.hbm [resolvable:$true] %s4567_s29 }
 0x2bf   : > { %2468 = vst.msk [vmem:[#allocation2 + $0x50] sm:$0xf] %vm2447_vm13, %v2392_v26  ;;  %s4569_s30 = scalar_lea.hbm %s4568_s29, 256  ;;  %p4574_p0 = scmp.lt.s32.totalorder %s4568_s29, %s6458_s4 }
 0x2c0   : > { %p4570_p11 = scmp.ne.s32.totalorder %s4568_s29, %s4569_s30  ;;  %p4575_p1 = scmp.lt.s32.totalorder %s4573_s8, %s4569_s30 }
 0x2c2   : > { %2974 = vrot.lane.b32.xlu1 %v2911_v41, %s4623_s12  ;;  %p4571_p12 = pnand %p4570_p11, %p4689_p5  ;;  %p4576_p2 = por %p4575_p1, %p4574_p0 }
 0x2c3   : > { %2972 = vrot.lane.b32.xlu0 %v2901_v42, %s4623_s12  ;;  %2413 = vrot.lane.b32.xlu2 %v4268_v45, %s4622_s11  ;;  %v6128_v43 = vpop.f32.mrf.mxu1  ;;  %s210_s11 = sand.u32 1, %s4607_s16  }
 0x2c4   : > { %v2212_v47 = vpop.permute.xlu1 %2211  ;;  %s4075_s12 = sshll.u32 %s210_s11, 8  ;;  %s3976_s28 = scalar_lea.sflag [#allocation4], %s210_s11 }
 0x2c5   : > { %2281 = vst.msk [vmem:[#allocation2 + $0x6c] sm:$0xf] %vm2253_vm11, %v2212_v47  ;;  %v2210_v50 = vpop.permute.xlu0 %2209  ;;  %v4480_v51 = vld [vmem:[#allocation2 + $0x30] sm:$0xff]  ;;  %v2965_v25 = vpop.permute.xlu2 %2964  ;;  %p4572_p13 = pneg %p4571_p12 }
 0x2c6   : > { %2280 = vst.msk [vmem:[#allocation2 + $0x68] sm:$0xf] %vm2253_vm11, %v2210_v50  ;;  %4459 = vmatmul.msk.bf16.gmra.mxu1 %vm3510_vm0, %v4480_v51  ;;  %v6121_v39 = vpop.f32.mrf.mxu0  ;;  %v3753_v51 = vmul.f32 %v6118_v30, %v6118_v30 }
 0x2c7   : > { %2475 = vst.msk [vmem:[#allocation2 + $0x6c] sm:$0xf] %vm2447_vm13, %v2406_v40  ;;  %v3754_v49 = vmul.f32 %v6121_v39, %v6121_v39  ;;  %v3716_v53 = vadd.f32 %v6121_v39, %v6118_v30  ;;  %p4577_p3 = pnand %p4576_p2, %p4572_p13 }
 0x2cb   : > { %3311 = vrot.lane.b32.xlu0 %v3248_v54, %s4624_s13  ;;  %3309 = vrot.lane.b32.xlu2 %v3245_v56, %s4624_s13  ;;  %v6132_v45 = vpop.f32.mrf.mxu1  ;;  %v3785_v56 = vadd.f32 %v3754_v49, %v3753_v51  ;;  %s6292_s13 = scalar_lea.vmem [#allocation3], %s4075_s12 }
 0x2cc   : > { %v2404_v57 = vpop.permute.xlu1 %2403  ;;  %s3988_s22 = sshll.u32 %s6292_s13, 4  ;;  %s3989_s22 = int_to_ptr.vmem [resolvable:$true] %s3988_s22 }
 0x2cd   : > { %2474 = vst.msk [vmem:[#allocation2 + $0x68] sm:$0xf] %vm2447_vm13, %v2404_v57  ;;  %v2394_v58 = vpop.permute.xlu0 %2393  ;;  %v3292_v59 = vpop.permute.xlu2 %3291 }
 0x2ce   : > { %2469 = vst.msk [vmem:[#allocation2 + $0x54] sm:$0xf] %vm2447_vm13, %v2394_v58  ;;  %v6124_v41 = vpop.f32.mrf.mxu0 }
 0x2cf   : > { %3035 = vst.msk [vmem:[#allocation2 + $0x68] sm:$0xf] %vm3008_vm14, %v2965_v25  ;;  %v3755_v25 = vmul.f32 %v6124_v41, %v6124_v41  ;;  %v3717_v57 = vadd.f32 %v3716_v53, %v6124_v41 }
 0x2d4   : > { %v2955_v60 = vpop.permute.xlu1 %2954 }
 0x2d5   : > { %3030 = vst.msk [vmem:[#allocation2 + $0x54] sm:$0xf] %vm3008_vm14, %v2955_v60  ;;  %v2953_v61 = vpop.permute.xlu0 %2952  ;;  %v2186_v1 = vpop.permute.xlu2 %2185 }
 0x2d6   : > { %3029 = vst.msk [vmem:[#allocation2 + $0x50] sm:$0xf] %vm3008_vm14, %v2953_v61  ;;  %v6126_v42 = vpop.f32.mrf.mxu0 }
 0x2d7   : > { %3367 = vst.msk [vmem:[#allocation2 + $0x54] sm:$0xf] %vm3345_vm15, %v3292_v59  ;;  %v3756_v58 = vmul.f32 %v6126_v42, %v6126_v42  ;;  %v3786_v59 = vadd.f32 %v3785_v56, %v3755_v25  ;;  %v3718_v60 = vadd.f32 %v3717_v57, %v6126_v42 }
 0x2d8   : > { %2268 = vst.msk [vmem:[#allocation2 + $0x38] sm:$0xf] %vm2253_vm11, %v2186_v1 }
 0x2d9   : > { %v3787_v1 = vadd.f32 %v3786_v59, %v3756_v58 }
 0x2da   : > { %v6150_v54 = vpop.f32.mrf.mxu2 }
 0x2db   : > { %v3769_v57 = vmul.f32 %v6150_v54, %v6150_v54 }
 0x2dc   : > { %v3290_v62 = vpop.permute.xlu1 %3289 }
 0x2dd   : > { %3366 = vst.msk [vmem:[#allocation2 + $0x50] sm:$0xf] %vm3345_vm15, %v3290_v62  ;;  %v2967_v63 = vpop.permute.xlu0 %2966  ;;  %v2382_v52 = vpop.permute.xlu2 %2381 }
 0x2de   : > { %3036 = vst.msk [vmem:[#allocation2 + $0x6c] sm:$0xf] %vm3008_vm14, %v2967_v63 }
 0x2e4   : > { %v3304_v55 = vpop.permute.xlu1 %3303  ;;  %v4484_v0 = vld [vmem:[#allocation2 + $0x50] sm:$0xff] }
 0x2e5   : > { %3373 = vst.msk [vmem:[#allocation2 + $0x6c] sm:$0xf] %vm3345_vm15, %v3304_v55  ;;  %v3302_v2 = vpop.permute.xlu0 %3301  ;;  %4463 = vmatmul.msk.bf16.gmra.mxu2 %vm3510_vm0, %v4484_v0  ;;  %v3278_v3 = vpop.permute.xlu2 %3277 }
 0x2e6   : > { %3372 = vst.msk [vmem:[#allocation2 + $0x68] sm:$0xf] %vm3345_vm15, %v3302_v2 }
 0x2ec   : > { %v2380_v4 = vpop.permute.xlu1 %2379 }
 0x2ed   : > { %2462 = vst.msk [vmem:[#allocation2 + $0x38] sm:$0xf] %vm2447_vm13, %v2380_v4  ;;  %v2188_v5 = vpop.permute.xlu0 %2187  ;;  %v4487_v6 = vld [vmem:[#allocation2 + $0x68] sm:$0xff]  ;;  %v2204_v7 = vpop.permute.xlu2 %2203 }
 0x2ee   : > { %2269 = vst.msk [vmem:[#allocation2 + $0x3c] sm:$0xf] %vm2253_vm11, %v2188_v5  ;;  %4466 = vmatmul.msk.bf16.gmra.mxu3 %vm3510_vm0, %v4487_v6  ;;  %v6168_v4 = vpop.f32.mrf.mxu2 }
 0x2ef   : > { %2463 = vst.msk [vmem:[#allocation2 + $0x3c] sm:$0xf] %vm2447_vm13, %v2382_v52 }
 0x2f0   : > { %2277 = vst.msk [vmem:[#allocation2 + $0x5c] sm:$0xf] %vm2253_vm11, %v2204_v7 }
 0x2f2   : > { %v6134_v46 = vpop.f32.mrf.mxu1 }
 0x2f3   : > { %v6130_v44 = vpop.f32.mrf.mxu0 }
 0x2f4   : > { %v2943_v8 = vpop.permute.xlu1 %2942  ;;  %v3757_v61 = vmul.f32 %v6130_v44, %v6130_v44  ;;  %v3719_v62 = vadd.f32 %v3718_v60, %v6130_v44 }
 0x2f5   : > { %3024 = vst.msk [vmem:[#allocation2 + $0x3c] sm:$0xf] %vm3008_vm14, %v2943_v8  ;;  %v2941_v9 = vpop.permute.xlu0 %2940  ;;  %v2396_v10 = vpop.permute.xlu2 %2395 }
 0x2f6   : > { %3023 = vst.msk [vmem:[#allocation2 + $0x38] sm:$0xf] %vm3008_vm14, %v2941_v9  ;;  %v3788_v0 = vadd.f32 %v3787_v1, %v3757_v61  ;;  %v3770_v61 = vmul.f32 %v6168_v4, %v6168_v4 }
 0x2f7   : > { %3360 = vst.msk [vmem:[#allocation2 + $0x38] sm:$0xf] %vm3345_vm15, %v3278_v3 }
 0x2fa   : > { %v6142_v50 = vpop.f32.mrf.mxu1 }
 0x2fb   : > { %v6136_v47 = vpop.f32.mrf.mxu0 }
 0x2fc   : > { %v2202_v11 = vpop.permute.xlu1 %2201  ;;  %v3758_v63 = vmul.f32 %v6136_v47, %v6136_v47  ;;  %v3720_v2 = vadd.f32 %v3719_v62, %v6136_v47 }
 0x2fd   : > { %2276 = vst.msk [vmem:[#allocation2 + $0x58] sm:$0xf] %vm2253_vm11, %v2202_v11  ;;  %v3280_v12 = vpop.permute.xlu0 %3279  ;;  %v2410_v13 = vpop.permute.xlu2 %2409  ;;  %v3761_v11 = vmul.f32 %v6128_v43, %v6128_v43 }
 0x2fe   : > { %3361 = vst.msk [vmem:[#allocation2 + $0x3c] sm:$0xf] %vm3345_vm15, %v3280_v12  ;;  %v3789_v5 = vadd.f32 %v3788_v0, %v3758_v63 }
 0x2ff   : > { %2470 = vst.msk [vmem:[#allocation2 + $0x58] sm:$0xf] %vm2447_vm13, %v2396_v10 }
 0x304   : > { %v2216_v14 = vpop.permute.xlu1 %2215 }
 0x305   : > { %2283 = vst.msk [vmem:[#allocation2 + $0x74] sm:$0xf] %vm2253_vm11, %v2216_v14  ;;  %v2214_v15 = vpop.permute.xlu0 %2213  ;;  %v4481_v16 = vld [vmem:[#allocation2 + $0x38] sm:$0xff]  ;;  %v2969_v17 = vpop.permute.xlu2 %2968 }
 0x306   : > { %2282 = vst.msk [vmem:[#allocation2 + $0x70] sm:$0xf] %vm2253_vm11, %v2214_v15  ;;  %4460 = vmatmul.msk.bf16.gmra.mxu1 %vm3510_vm0, %v4481_v16  ;;  %v3762_v16 = vmul.f32 %v6132_v45, %v6132_v45 }
 0x307   : > { %2477 = vst.msk [vmem:[#allocation2 + $0x74] sm:$0xf] %vm2447_vm13, %v2410_v13 }
 0x30c   : > { %v2408_v18 = vpop.permute.xlu1 %2407 }
 0x30d   : > { %2476 = vst.msk [vmem:[#allocation2 + $0x70] sm:$0xf] %vm2447_vm13, %v2408_v18  ;;  %v2398_v19 = vpop.permute.xlu0 %2397  ;;  %v3296_v20 = vpop.permute.xlu2 %3295 }
 0x30e   : > { %2471 = vst.msk [vmem:[#allocation2 + $0x5c] sm:$0xf] %vm2447_vm13, %v2398_v19  ;;  %v3763_v19 = vmul.f32 %v6134_v46, %v6134_v46 }
 0x30f   : > { %3037 = vst.msk [vmem:[#allocation2 + $0x70] sm:$0xf] %vm3008_vm14, %v2969_v17 }
 0x314   : > { %v2959_v21 = vpop.permute.xlu1 %2958 }
 0x315   : > { %3032 = vst.msk [vmem:[#allocation2 + $0x5c] sm:$0xf] %vm3008_vm14, %v2959_v21  ;;  %v2957_v22 = vpop.permute.xlu0 %2956  ;;  %v2218_v23 = vpop.permute.xlu2 %2217 }
 0x316   : > { %3031 = vst.msk [vmem:[#allocation2 + $0x58] sm:$0xf] %vm3008_vm14, %v2957_v22 }
 0x317   : > { %3369 = vst.msk [vmem:[#allocation2 + $0x5c] sm:$0xf] %vm3345_vm15, %v3296_v20 }
 0x318   : > { %2284 = vst.msk [vmem:[#allocation2 + $0x78] sm:$0xf] %vm2253_vm11, %v2218_v23  ;;  %v3764_v23 = vmul.f32 %v6142_v50, %v6142_v50 }
 0x31c   : > { %v3294_v24 = vpop.permute.xlu1 %3293 }
 0x31d   : > { %3368 = vst.msk [vmem:[#allocation2 + $0x58] sm:$0xf] %vm3345_vm15, %v3294_v24  ;;  %v2971_v26 = vpop.permute.xlu0 %2970  ;;  %v2414_v31 = vpop.permute.xlu2 %2413 }
 0x31e   : > { %3038 = vst.msk [vmem:[#allocation2 + $0x74] sm:$0xf] %vm3008_vm14, %v2971_v26 }
 0x321   : > { %v6179_v14 = vpop.f32.mrf.mxu2 }
 0x322   : > { %v3771_v0 = vmul.f32 %v6179_v14, %v6179_v14 }
 0x324   : > { %v3308_v27 = vpop.permute.xlu1 %3307  ;;  %v4485_v28 = vld [vmem:[#allocation2 + $0x58] sm:$0xff] }
 0x325   : > { %3375 = vst.msk [vmem:[#allocation2 + $0x74] sm:$0xf] %vm3345_vm15, %v3308_v27  ;;  %v3306_v29 = vpop.permute.xlu0 %3305  ;;  %4464 = vmatmul.msk.bf16.gmra.mxu2 %vm3510_vm0, %v4485_v28  ;;  %v3310_v37 = vpop.permute.xlu2 %3309 }
 0x326   : > { %3374 = vst.msk [vmem:[#allocation2 + $0x70] sm:$0xf] %vm3345_vm15, %v3306_v29 }
 0x329   : > { %v6191_v24 = vpop.f32.mrf.mxu2 }
 0x32c   : > { %v2412_v32 = vpop.permute.xlu1 %2411 }
 0x32d   : > { %v2220_v34 = vpop.permute.xlu0 %2219  ;;  %v4488_v36 = vld [vmem:[#allocation2 + $0x70] sm:$0xff]  ;;  %2478 = vst.msk [vmem:[#allocation2 + $0x78] sm:$0xf] %vm2447_vm13, %v2412_v32 }
 0x32e   : > { %2285 = vst.msk [vmem:[#allocation2 + $0x7c] sm:$0xf] %vm2253_vm11, %v2220_v34  ;;  %4467 = vmatmul.msk.bf16.gmra.mxu3 %vm3510_vm0, %v4488_v36 }
 0x32f   : > { %2479 = vst.msk [vmem:[#allocation2 + $0x7c] sm:$0xf] %vm2447_vm13, %v2414_v31  ;;  %v6197_v31 = vpop.f32.mrf.mxu3 }
 0x334   : > { %v2975_v33 = vpop.permute.xlu1 %2974 }
 0x335   : > { %v2973_v35 = vpop.permute.xlu0 %2972  ;;  %3040 = vst.msk [vmem:[#allocation2 + $0x7c] sm:$0xf] %vm3008_vm14, %v2975_v33 }
 0x336   : > { %3039 = vst.msk [vmem:[#allocation2 + $0x78] sm:$0xf] %vm3008_vm14, %v2973_v35 }
 0x337   : > { %3376 = vst.msk [vmem:[#allocation2 + $0x78] sm:$0xf] %vm3345_vm15, %v3310_v37  ;;  %v6212_v56 = vpop.f32.mrf.mxu3 }
 0x33b   : > { %v6138_v48 = vpop.f32.mrf.mxu0 }
 0x33c   : > { %v3759_v3 = vmul.f32 %v6138_v48, %v6138_v48  ;;  %v3721_v6 = vadd.f32 %v3720_v2, %v6138_v48 }
 0x33d   : > { %v3312_v38 = vpop.permute.xlu0 %3311 }
 0x33e   : > { %3377 = vst.msk [vmem:[#allocation2 + $0x7c] sm:$0xf] %vm3345_vm15, %v3312_v38  ;;  %v3790_v8 = vadd.f32 %v3789_v5, %v3759_v3 }
 0x343   : > { %v6161_v52 = vpop.f32.mrf.mxu0  ;;  %v6163_v55 = vpop.f32.mrf.mxu1 }
 0x344   : > { %v3760_v7 = vmul.f32 %v6161_v52, %v6161_v52  ;;  %v3722_v9 = vadd.f32 %v3721_v6, %v6161_v52  ;;  %v3765_v29 = vmul.f32 %v6163_v55, %v6163_v55  ;;  %v3772_v6 = vmul.f32 %v6191_v24, %v6191_v24 }
 0x345   : > { %v4489_v40 = vld [vmem:[#allocation2 + $0x78] sm:$0xff] }
 0x346   : > { %4468 = vmatmul.msk.bf16.gmra.mxu3 %vm3510_vm0, %v4489_v40  ;;  %v3791_v10 = vadd.f32 %v3790_v8, %v3760_v7  ;;  %v3723_v12 = vadd.f32 %v3722_v9, %v6128_v43 }
 0x348   : > { %v3792_v15 = vadd.f32 %v3791_v10, %v3761_v11  ;;  %v3724_v17 = vadd.f32 %v3723_v12, %v6132_v45 }
 0x34a   : > { %v3793_v18 = vadd.f32 %v3792_v15, %v3762_v16  ;;  %v3725_v20 = vadd.f32 %v3724_v17, %v6134_v46 }
 0x34b   : > { %v6177_v13 = vpop.f32.mrf.mxu1 }
 0x34c   : > { %v3794_v22 = vadd.f32 %v3793_v18, %v3763_v19  ;;  %v3726_v26 = vadd.f32 %v3725_v20, %v6142_v50  ;;  %v3766_v33 = vmul.f32 %v6177_v13, %v6177_v13 }
 0x34e   : > { %v3795_v27 = vadd.f32 %v3794_v22, %v3764_v23  ;;  %v3727_v28 = vadd.f32 %v3726_v26, %v6163_v55 }
 0x350   : > { %v3796_v32 = vadd.f32 %v3795_v27, %v3765_v29  ;;  %v3728_v36 = vadd.f32 %v3727_v28, %v6177_v13  ;;  %v3777_v29 = vmul.f32 %v6197_v31, %v6197_v31 }
 0x352   : > { %v3797_v38 = vadd.f32 %v3796_v32, %v3766_v33  ;;  %v3778_v33 = vmul.f32 %v6212_v56, %v6212_v56 }
 0x368   : > { %v6204_v37 = vpop.f32.mrf.mxu2 }
 0x369   : > { %v3773_v9 = vmul.f32 %v6204_v37, %v6204_v37 }
 0x370   : > { %v6217_v59 = vpop.f32.mrf.mxu2 }
 0x371   : > { %v6222_v63 = vpop.f32.mrf.mxu3  ;;  %v3774_v16 = vmul.f32 %v6217_v59, %v6217_v59 }
 0x379   : > { %v6235_v11 = vpop.f32.mrf.mxu3 }
 0x383   : > { %v6187_v21 = vpop.f32.mrf.mxu1 }
 0x384   : > { %v3767_v35 = vmul.f32 %v6187_v21, %v6187_v21  ;;  %v3729_v40 = vadd.f32 %v3728_v36, %v6187_v21 }
 0x386   : > { %v3798_v51 = vadd.f32 %v3797_v38, %v3767_v35 }
 0x38b   : > { %v6199_v34 = vpop.f32.mrf.mxu1 }
 0x38c   : > { %v3768_v49 = vmul.f32 %v6199_v34, %v6199_v34  ;;  %v3730_v53 = vadd.f32 %v3729_v40, %v6199_v34 }
 0x38e   : > { %v3799_v25 = vadd.f32 %v3798_v51, %v3768_v49  ;;  %v3731_v58 = vadd.f32 %v3730_v53, %v6150_v54  ;;  %v3779_v49 = vmul.f32 %v6222_v63, %v6222_v63 }
 0x390   : > { %v3800_v60 = vadd.f32 %v3799_v25, %v3769_v57  ;;  %v3732_v1 = vadd.f32 %v3731_v58, %v6168_v4  ;;  %v3780_v25 = vmul.f32 %v6235_v11, %v6235_v11 }
 0x392   : > { %v3801_v62 = vadd.f32 %v3800_v60, %v3770_v61  ;;  %v3733_v2 = vadd.f32 %v3732_v1, %v6179_v14 }
 0x394   : > { %v3802_v3 = vadd.f32 %v3801_v62, %v3771_v0  ;;  %v3734_v7 = vadd.f32 %v3733_v2, %v6191_v24 }
 0x396   : > { %v3803_v8 = vadd.f32 %v3802_v3, %v3772_v6  ;;  %v3735_v10 = vadd.f32 %v3734_v7, %v6204_v37 }
 0x398   : > { %v3804_v12 = vadd.f32 %v3803_v8, %v3773_v9  ;;  %v3736_v17 = vadd.f32 %v3735_v10, %v6217_v59 }
 0x39a   : > { %v3805_v20 = vadd.f32 %v3804_v12, %v3774_v16 }
 0x3a8   : > { %v6227_v5 = vpop.f32.mrf.mxu2 }
 0x3a9   : > { %v3775_v18 = vmul.f32 %v6227_v5, %v6227_v5  ;;  %v3737_v19 = vadd.f32 %v3736_v17, %v6227_v5 }
 0x3ab   : > { %v3806_v23 = vadd.f32 %v3805_v20, %v3775_v18 }
 0x3b0   : > { %v6237_v15 = vpop.f32.mrf.mxu2 }
 0x3b1   : > { %v3776_v22 = vmul.f32 %v6237_v15, %v6237_v15  ;;  %v3738_v26 = vadd.f32 %v3737_v19, %v6237_v15  ;;  %v6248_v27 = vpop.f32.mrf.mxu3 }
 0x3b2   : > { %v3781_v1 = vmul.f32 %v6248_v27, %v6248_v27 }
 0x3b3   : > { %v3807_v28 = vadd.f32 %v3806_v23, %v3776_v22  ;;  %v3739_v32 = vadd.f32 %v3738_v26, %v6197_v31 }
 0x3b5   : > { %v3808_v36 = vadd.f32 %v3807_v28, %v3777_v29  ;;  %v3740_v35 = vadd.f32 %v3739_v32, %v6212_v56 }
 0x3b7   : > { %v3809_v38 = vadd.f32 %v3808_v36, %v3778_v33  ;;  %v3741_v51 = vadd.f32 %v3740_v35, %v6222_v63 }
 0x3b9   : > { %v6256_v40 = vpop.f32.mrf.mxu3  ;;  %v3810_v53 = vadd.f32 %v3809_v38, %v3779_v49  ;;  %v3742_v57 = vadd.f32 %v3741_v51, %v6235_v11 }
 0x3ba   : > { %v3782_v2 = vmul.f32 %v6256_v40, %v6256_v40 }
 0x3bb   : > { %v3811_v58 = vadd.f32 %v3810_v53, %v3780_v25  ;;  %v3743_v61 = vadd.f32 %v3742_v57, %v6248_v27 }
 0x3bd   : > { %v3812_v62 = vadd.f32 %v3811_v58, %v3781_v1  ;;  %v3744_v0 = vadd.f32 %v3743_v61, %v6256_v40 }
 0x3bf   : > { %v3813_v6 = vadd.f32 %v3812_v62, %v3782_v2  ;;  %v3838_v2 = vld [vmem:[%s220_s6] sm:$0x1] }
 0x3c9   : > { %v6264_v60 = vpop.f32.mrf.mxu3 }
 0x3ca   : > { %v3783_v3 = vmul.f32 %v6264_v60, %v6264_v60  ;;  %v3745_v7 = vadd.f32 %v3744_v0, %v6264_v60 }
 0x3cc   : > { %v3814_v9 = vadd.f32 %v3813_v6, %v3783_v3 }
 0x3d1   : > { %v3649_v8 = vpop.f32.mrf.mxu3 }
 0x3d2   : > { %v3746_v10 = vadd.f32 %v3745_v7, %v3649_v8  ;;  %v3784_v12 = vmul.f32 %v3649_v8, %v3649_v8  ;;  %v3840_v7 = vld [vmem:[%s223_s10] sm:$0x1] }
 0x3d4   : > { %v3747_v16 = vrot.slane %v3746_v10, 4  ;;  %v3815_v17 = vadd.f32 %v3814_v9, %v3784_v12 }
 0x3d6   : > { %v3748_v18 = vadd.f32 %v3747_v16, %v3746_v10  ;;  %v3816_v19 = vrot.slane %v3815_v17, 4 }
 0x3d8   : > { %v3749_v20 = vrot.slane %v3748_v18, 2  ;;  %v3817_v22 = vadd.f32 %v3816_v19, %v3815_v17 }
 0x3da   : > { %v3750_v23 = vadd.f32 %v3749_v20, %v3748_v18  ;;  %v3818_v26 = vrot.slane %v3817_v22, 2 }
 0x3dc   : > { %v3751_v28 = vrot.slane %v3750_v23, 1  ;;  %v3819_v29 = vadd.f32 %v3818_v26, %v3817_v22 }
 0x3de   : > { %v3752_v32 = vadd.f32 %v3751_v28, %v3750_v23  ;;  %v3820_v36 = vrot.slane %v3819_v29, 1 }
 0x3e0   : > { %v3821_v33 = vadd.f32 %v3820_v36, %v3819_v29  ;;  %v3822_v35 = vmul.f32 0.00390625, %v3752_v32 }
 0x3e2   : > { %v3823_v38 = vmul.f32 0.00390625, %v3821_v33  ;;  %v3824_v49 = vmul.f32 %v3822_v35, %v3822_v35 }
 0x3e4   : > { %v3825_v51 = vsub.f32 %v3823_v38, %v3824_v49 }
 0x3e6   : > { %v3826_v53 = vmax.f32 %v3825_v51, 0.0 }
 0x3e8   : > { %v3827_v25 = vadd.f32 1e-05, %v3826_v53 }
 0x3ea   : > { %4551 = vrsqrt.f32 %v3827_v25  ;;  %vm3834_vm2 = vweird.f32 %v3827_v25 }
 0x3f0   : > { %v4552_v57 = vpop.eup %4551 }
 0x3f1   : > { %v3829_v58 = vmul.f32 %v4552_v57, %v3827_v25  ;;  %vm3835_vm1 = vweird.f32 %v4552_v57 }
 0x3f2   : > { %vm3836_vm3 = vmor %vm3834_vm2, %vm3835_vm1 }
 0x3f3   : > { %v3830_v61 = vmul.f32 %v4552_v57, %v3829_v58 }
 0x3f5   : > { %v3831_v1 = vmul.f32 0.5, %v3830_v61 }
 0x3f7   : > { %v3832_v62 = vsub.f32 1.5, %v3831_v1 }
 0x3f9   : > { %v3833_v0 = vmul.f32 %v4552_v57, %v3832_v62 }
 0x3fb   : > { %v3837_v3 = vsel %vm3836_vm3, %v4552_v57, %v3833_v0 }
 0x3fc   : > { %v3839_v6 = vmul.f32 %v3838_v2, %v3837_v3 }
 0x3fe   : > { %v3841_v9 = vmul.f32 %v3839_v6, %v3822_v35  ;;  %v6283_v10 = vperm.slane %v3839_v6, 0 }
 0x400   : > { %v3842_v12 = vsub.f32 %v3840_v7, %v3841_v9  ;;  %v3875_v16 = vmul.f32 %v6283_v10, %v3649_v8  ;;  %v3844_v20 = vmul.f32 %v6283_v10, %v6118_v30  ;;  %v3845_v22 = vmul.f32 %v6283_v10, %v6121_v39 }
 0x401   : > { %v3846_v23 = vmul.f32 %v6283_v10, %v6124_v41  ;;  %v3847_v8 = vmul.f32 %v6283_v10, %v6126_v42  ;;  %v3848_v26 = vmul.f32 %v6283_v10, %v6130_v44  ;;  %v3849_v29 = vmul.f32 %v6283_v10, %v6136_v47 }
 0x402   : > { %v6289_v17 = vperm.slane %v3842_v12, 0  ;;  %v3850_v41 = vmul.f32 %v6283_v10, %v6138_v48  ;;  %v3851_v44 = vmul.f32 %v6283_v10, %v6161_v52  ;;  %v3852_v47 = vmul.f32 %v6283_v10, %v6128_v43 }
 0x403   : > { %v3853_v33 = vmul.f32 %v6283_v10, %v6132_v45  ;;  %v3854_v52 = vmul.f32 %v6283_v10, %v6134_v46  ;;  %v3855_v43 = vmul.f32 %v6283_v10, %v6142_v50  ;;  %v3856_v61 = vmul.f32 %v6283_v10, %v6163_v55 }
 0x404   : > { %v3910_v18 = vadd.f32 %v6289_v17, %v3875_v16  ;;  %v3879_v28 = vadd.f32 %v6289_v17, %v3844_v20  ;;  %v3880_v32 = vadd.f32 %v6289_v17, %v3845_v22  ;;  %v3881_v30 = vadd.f32 %v6289_v17, %v3846_v23 }
 0x405   : > { %v3882_v39 = vadd.f32 %v6289_v17, %v3847_v8  ;;  %v3883_v42 = vadd.f32 %v6289_v17, %v3848_v26  ;;  %v3884_v36 = vadd.f32 %v6289_v17, %v3849_v29  ;;  %v3885_v35 = vadd.f32 %v6289_v17, %v3850_v41 }
 0x406   : > { %v3942_v19 = vmax.f32 %v3910_v18, 0.0  ;;  %v3911_v38 = vmax.f32 %v3879_v28, 0.0  ;;  %v3886_v48 = vadd.f32 %v6289_v17, %v3851_v44  ;;  %v3912_v49 = vmax.f32 %v3880_v32, 0.0 }
 0x407   : > { %v3913_v51 = vmax.f32 %v3881_v30, 0.0  ;;  %v3914_v53 = vmax.f32 %v3882_v39, 0.0  ;;  %v3887_v25 = vadd.f32 %v6289_v17, %v3852_v47  ;;  %v3915_v57 = vmax.f32 %v3883_v42, 0.0 }
 0x408   : > { %3974 = vst [vmem:[%s6292_s13 + $0xf8] sm:$0xff] %v3942_v19  ;;  %v3888_v45 = vadd.f32 %v6289_v17, %v3853_v33  ;;  %v3916_v58 = vmax.f32 %v3884_v36, 0.0  ;;  %v3889_v1 = vadd.f32 %v6289_v17, %v3854_v52  ;;  %v3917_v62 = vmax.f32 %v3885_v35, 0.0 }
 0x409   : > { %3943 = vst [vmem:[%s6292_s13] sm:$0xff] %v3911_v38  ;;  %v3857_v46 = vmul.f32 %v6283_v10, %v6177_v13  ;;  %v3890_v0 = vadd.f32 %v6289_v17, %v3855_v43  ;;  %v3918_v2 = vmax.f32 %v3886_v48, 0.0  ;;  %v3858_v50 = vmul.f32 %v6283_v10, %v6187_v21 }
 0x40a   : > { %3944 = vst [vmem:[%s6292_s13 + $0x8] sm:$0xff] %v3912_v49  ;;  %v3891_v3 = vadd.f32 %v6289_v17, %v3856_v61  ;;  %v3919_v6 = vmax.f32 %v3887_v25, 0.0  ;;  %v3859_v55 = vmul.f32 %v6283_v10, %v6199_v34  ;;  %v3920_v9 = vmax.f32 %v3888_v45, 0.0 }
 0x40b   : > { %3945 = vst [vmem:[%s6292_s13 + $0x10] sm:$0xff] %v3913_v51  ;;  %v3892_v7 = vadd.f32 %v6289_v17, %v3857_v46  ;;  %v3860_v13 = vmul.f32 %v6283_v10, %v6150_v54  ;;  %v3893_v12 = vadd.f32 %v6289_v17, %v3858_v50  ;;  %v3921_v16 = vmax.f32 %v3889_v1, 0.0 }
 0x40c   : > { %3946 = vst [vmem:[%s6292_s13 + $0x18] sm:$0xff] %v3914_v53  ;;  %v3861_v21 = vmul.f32 %v6283_v10, %v6168_v4  ;;  %v3894_v18 = vadd.f32 %v6289_v17, %v3859_v55  ;;  %v3922_v19 = vmax.f32 %v3890_v0, 0.0  ;;  %v3862_v34 = vmul.f32 %v6283_v10, %v6179_v14 }
 0x40d   : > { %3947 = vst [vmem:[%s6292_s13 + $0x20] sm:$0xff] %v3915_v57  ;;  %v3895_v20 = vadd.f32 %v6289_v17, %v3860_v13  ;;  %v3923_v22 = vmax.f32 %v3891_v3, 0.0  ;;  %v3863_v54 = vmul.f32 %v6283_v10, %v6191_v24  ;;  %v3924_v8 = vmax.f32 %v3892_v7, 0.0 }
 0x40e   : > { %3948 = vst [vmem:[%s6292_s13 + $0x28] sm:$0xff] %v3916_v58  ;;  %v3896_v23 = vadd.f32 %v6289_v17, %v3861_v21  ;;  %v3864_v4 = vmul.f32 %v6283_v10, %v6204_v37  ;;  %v3897_v26 = vadd.f32 %v6289_v17, %v3862_v34  ;;  %v3925_v28 = vmax.f32 %v3893_v12, 0.0 }
 0x40f   : > { %3949 = vst [vmem:[%s6292_s13 + $0x30] sm:$0xff] %v3917_v62  ;;  %v3865_v14 = vmul.f32 %v6283_v10, %v6217_v59  ;;  %v3898_v29 = vadd.f32 %v6289_v17, %v3863_v54  ;;  %v3926_v32 = vmax.f32 %v3894_v18, 0.0  ;;  %v3866_v24 = vmul.f32 %v6283_v10, %v6227_v5 }
 0x410   : > { %3950 = vst [vmem:[%s6292_s13 + $0x38] sm:$0xff] %v3918_v2  ;;  %v3899_v30 = vadd.f32 %v6289_v17, %v3864_v4  ;;  %v3927_v39 = vmax.f32 %v3895_v20, 0.0  ;;  %v3867_v37 = vmul.f32 %v6283_v10, %v6237_v15  ;;  %v3928_v42 = vmax.f32 %v3896_v23, 0.0 }
 0x411   : > { %3951 = vst [vmem:[%s6292_s13 + $0x40] sm:$0xff] %v3919_v6  ;;  %v3900_v41 = vadd.f32 %v6289_v17, %v3865_v14  ;;  %v3868_v59 = vmul.f32 %v6283_v10, %v6197_v31  ;;  %v3901_v44 = vadd.f32 %v6289_v17, %v3866_v24  ;;  %v3929_v36 = vmax.f32 %v3897_v26, 0.0 }
 0x412   : > { %3952 = vst [vmem:[%s6292_s13 + $0x48] sm:$0xff] %v3920_v9  ;;  %v3869_v5 = vmul.f32 %v6283_v10, %v6212_v56  ;;  %v3902_v47 = vadd.f32 %v6289_v17, %v3867_v37  ;;  %v3930_v33 = vmax.f32 %v3898_v29, 0.0  ;;  %v3870_v15 = vmul.f32 %v6283_v10, %v6222_v63 }
 0x413   : > { %3953 = vst [vmem:[%s6292_s13 + $0x50] sm:$0xff] %v3921_v16  ;;  %v3903_v35 = vadd.f32 %v6289_v17, %v3868_v59  ;;  %v3931_v31 = vmax.f32 %v3899_v30, 0.0  ;;  %v3871_v38 = vmul.f32 %v6283_v10, %v6235_v11  ;;  %v3932_v56 = vmax.f32 %v3900_v41, 0.0 }
 0x414   : > { %3954 = vst [vmem:[%s6292_s13 + $0x58] sm:$0xff] %v3922_v19  ;;  %v3904_v48 = vadd.f32 %v6289_v17, %v3869_v5  ;;  %v3872_v49 = vmul.f32 %v6283_v10, %v6248_v27  ;;  %v3905_v51 = vadd.f32 %v6289_v17, %v3870_v15  ;;  %v3933_v63 = vmax.f32 %v3901_v44, 0.0 }
 0x415   : > { %3955 = vst [vmem:[%s6292_s13 + $0x60] sm:$0xff] %v3923_v22  ;;  %v3873_v53 = vmul.f32 %v6283_v10, %v6256_v40  ;;  %v3906_v52 = vadd.f32 %v6289_v17, %v3871_v38  ;;  %v3934_v11 = vmax.f32 %v3902_v47, 0.0  ;;  %v3874_v25 = vmul.f32 %v6283_v10, %v6264_v60 }
 0x416   : > { %3956 = vst [vmem:[%s6292_s13 + $0x68] sm:$0xff] %v3924_v8  ;;  %v3907_v27 = vadd.f32 %v6289_v17, %v3872_v49  ;;  %v3935_v57 = vmax.f32 %v3903_v35, 0.0  ;;  %v3936_v40 = vmax.f32 %v3904_v48, 0.0  ;;  %v3937_v58 = vmax.f32 %v3905_v51, 0.0 }
 0x417   : > { %3957 = vst [vmem:[%s6292_s13 + $0x70] sm:$0xff] %v3925_v28  ;;  %v3908_v43 = vadd.f32 %v6289_v17, %v3873_v53  ;;  %v3909_v45 = vadd.f32 %v6289_v17, %v3874_v25  ;;  %v3938_v60 = vmax.f32 %v3906_v52, 0.0 }
 0x418   : > { %3958 = vst [vmem:[%s6292_s13 + $0x78] sm:$0xff] %v3926_v32  ;;  %v3939_v10 = vmax.f32 %v3907_v27, 0.0 }
 0x419   : > { %3959 = vst [vmem:[%s6292_s13 + $0x80] sm:$0xff] %v3927_v39  ;;  %v3940_v61 = vmax.f32 %v3908_v43, 0.0  ;;  %v3941_v17 = vmax.f32 %v3909_v45, 0.0 }
 0x41a   : > { %3960 = vst [vmem:[%s6292_s13 + $0x88] sm:$0xff] %v3928_v42 }
 0x41b   : > { %3961 = vst [vmem:[%s6292_s13 + $0x90] sm:$0xff] %v3929_v36 }
 0x41c   : > { %3962 = vst [vmem:[%s6292_s13 + $0x98] sm:$0xff] %v3930_v33 }
 0x41d   : > { %3963 = vst [vmem:[%s6292_s13 + $0xa0] sm:$0xff] %v3931_v31 }
 0x41e   : > { %3964 = vst [vmem:[%s6292_s13 + $0xa8] sm:$0xff] %v3932_v56 }
 0x41f   : > { %3965 = vst [vmem:[%s6292_s13 + $0xb0] sm:$0xff] %v3933_v63 }
 0x420   : > { %3966 = vst [vmem:[%s6292_s13 + $0xb8] sm:$0xff] %v3934_v11 }
 0x421   : > { %3967 = vst [vmem:[%s6292_s13 + $0xc0] sm:$0xff] %v3935_v57 }
 0x422   : > { %3968 = vst [vmem:[%s6292_s13 + $0xc8] sm:$0xff] %v3936_v40 }
 0x423   : > { %3969 = vst [vmem:[%s6292_s13 + $0xd0] sm:$0xff] %v3937_v58 }
 0x424   : > { %3970 = vst [vmem:[%s6292_s13 + $0xd8] sm:$0xff] %v3938_v60 }
 0x425   : > { %3971 = vst [vmem:[%s6292_s13 + $0xe0] sm:$0xff] %v3939_v10 }
 0x426   : > { %3972 = vst [vmem:[%s6292_s13 + $0xe8] sm:$0xff] %v3940_v61 }
 0x427   : > { %3973 = vst [vmem:[%s6292_s13 + $0xf0] sm:$0xff] %v3941_v17 }
 0x428   : > { %4580 = shalt.err (!%p4577_p3)
}
 0x429   : > { %s4625_s11 = smov 128  }
 0x42a   : > { %4503 = dma.vmem_to_hbm [thread:$0]  (%p4689_p5), %s3989_s22, 4096, %s3991_s23, %s3976_s28, %s4625_s11, %s4625_s11, %s4618_s7  }
 0x42b PF: > { %p4509_p4 = scmp.ge.s32.totalorder %s4615_s18, 2  ;;  %s4005_s12 = sand.u32 1, %s4603_s15  }
 0x42c   : > { %s4006_s13 = scalar_lea.sflag [#allocation4], %s4005_s12 }
 0x42d   : > { %p4506_p7 = pnand %p4509_p4, %p4693_p6 }
 0x42f   : > { %p4507_p8 = pneg %p4506_p7 }
 0x431   : > { %4598 = dma.done.wait (%p4507_p8), %s4006_s13, 4096  }
 0x432   : > { %4600 = vsyncadd (%p4507_p8), %s4006_s13, 4294963200  ;;  %p14_p9 = scmp.ge.s32.totalorder %s4676_s21, 4   ;;  %s6465_s15 = smov %s4607_s16 }
 0x433   : > { %s6466_s16 = smov %s4611_s17  ;;  %s6467_s17 = smov %s4687_s24 }
 0x434   : > { %s6468_s18 = smov %s4676_s21  ;;  %16 = sbr.rel (!%p14_p9) target bundleno = 3 (0x3), region = 79 }
 0x439   :  { %4012 = vsyncpa [#allocation4], 1 }
 0x43a   :  { %4014 = vsyncpa [#allocation4 + $0x1], 1 }

</bundles_post_ra>
